<compile_context>
chip_gen: v7x
topology: tpu7x:2x2x1
jax: 0.10.0
libtpu: 0.0.40
codegen_flags: <defaults>
</compile_context>

<pallas_src>
import functools
import math

import numpy as np
import jax
import jax.numpy as jnp
from jax import lax
from jax.experimental import pallas as pl
from jax.experimental.pallas import tpu as pltpu  # noqa: F401  (CompilerParams needed only at real scale)

# ----------------------------- configuration -------------------------------
NUM_FRAMES = 2
IMG_H, IMG_W = 64, 32
PATCH = 16
GRID_H, GRID_W = IMG_H // PATCH, IMG_W // PATCH          # 4, 2
NUM_PATCHES = GRID_H * GRID_W                             # 8
SEQ = NUM_PATCHES + 1                                     # 9 (cls + patches)
EMBED_DIM = 32                                            # synthetic small (real: 768)
MOTION_DIM = 16
TEMPORAL_HEADS = 8
T_HEAD_DIM = EMBED_DIM // TEMPORAL_HEADS                  # 4
ENC_LAYERS = 12
ENC_HEADS = 4
HEAD_DIM = EMBED_DIM // ENC_HEADS                         # 8
MLP_DIM = 64
FEATURE_LEVELS = (3, 6, 9, 11)
NUM_LEVELS = len(FEATURE_LEVELS)
BATCH = 2


# ------------------------------ Pallas kernel -------------------------------
def _vit_motion_kernel(
        # stem
        patches_ref, pw_ref, pb_ref, mw1a_ref, mw1b_ref, mb1_ref, mw2_ref, mb2_ref,
        # embeddings + token-assembly scatter constants
        cls_ref, pos_ref, temp_ref, a0_ref, a1_ref, selpos_ref, seltmp_ref, selcls_ref,
        # temporal attention
        tlng_ref, tlnb_ref, twin_ref, tbin_ref, two_ref, tbo_ref,
        mtemp_ref, permq_ref, permp_ref,
        # encoder weights stacked over the 12 layers
        ln1g_ref, ln1b_ref, wqkv_ref, bqkv_ref, wo_ref, bo_ref,
        ln2g_ref, ln2b_ref, w1_ref, b1_ref, w2_ref, b2_ref,
        # encoder batched-attention helper constants
        tile_ref, headmask_ref, seqmask_ref, hsum_ref, hexp_ref,
        # output
        o_ref,
        *, bp, e, num_layers, head_dim, t_head_dim, feature_levels):
    """Whole ViTMotionEmbedding forward: stem + temporal MHA + 12 encoder blocks."""
    f32 = jnp.float32

    def layernorm(v, g, b, eps):
        mu = jnp.mean(v, axis=-1, keepdims=True)
        var = jnp.mean((v - mu) ** 2, axis=-1, keepdims=True)
        return (v - mu) * lax.rsqrt(var + eps) * g + b

    def gelu(v):
        # TODO(synk): PyTorch nn.GELU() default is the exact erf form; tanh approx keeps
        # the nonlinearity on the EUP slot (review suggestion), ~1e-3 relative deviation.
        return jax.nn.gelu(v, approximate=True)

    # -------- stage 1: patch embedding (both frames, one matmul) + motion MLP --------
    f = jnp.dot(patches_ref[...], pw_ref[...], preferred_element_type=f32) + pb_ref[...]
    f0 = f[0:bp, :]              # frame-0 features, rows ordered (b, p)
    f1 = f[bp:2 * bp, :]         # frame-1 features
    hm = (jnp.dot(f0, mw1a_ref[...], preferred_element_type=f32)
          + jnp.dot(f1, mw1b_ref[...], preferred_element_type=f32) + mb1_ref[...])
    hm = gelu(hm)
    motion = jnp.dot(hm, mw2_ref[...], preferred_element_type=f32) + mb2_ref[...]
    f1e = f1 + motion            # motion-enhanced frame-1 features

    # -------- stage 2: token assembly (cls / pos / temporal) via scatter matmuls -----
    # xs rows follow torch's contiguous (B, T, N, C) flattening.
    xs = (jnp.dot(a0_ref[...], f0, preferred_element_type=f32)
          + jnp.dot(a1_ref[...], f1e, preferred_element_type=f32)
          + jnp.dot(selpos_ref[...], pos_ref[...], preferred_element_type=f32)
          + jnp.dot(seltmp_ref[...], temp_ref[...], preferred_element_type=f32)
          + selcls_ref[...] * cls_ref[...])                                    # (S, E)

    # -------- stage 3: temporal LayerNorm + 8-head MHA over length-2 sequences -------
    h = layernorm(xs, tlng_ref[...], tlnb_ref[...], 1e-5)
    qkv = jnp.dot(h, twin_ref[...], preferred_element_type=f32) + tbin_ref[...]  # (S, 3E)
    # permq/permp reproduce torch's raw x.view(B*N, T, C) pairing; the permuted rows are
    # already in the encoder's (b, t, n) order, so no un-pairing transpose is needed.
    qkv_q = jnp.dot(permq_ref[...], qkv, preferred_element_type=f32)
    qkv_p = jnp.dot(permp_ref[...], qkv, preferred_element_type=f32)
    q = qkv_q[:, 0:e]
    k_s, v_s = qkv_q[:, e:2 * e], qkv_q[:, 2 * e:3 * e]
    k_o, v_o = qkv_p[:, e:2 * e], qkv_p[:, 2 * e:3 * e]
    mtemp = mtemp_ref[...]       # (E, E) block-diag ones: per-head dot, lane-broadcast
    t_scale = 1.0 / math.sqrt(t_head_dim)
    s_s = jnp.dot(q * k_s, mtemp, preferred_element_type=f32) * t_scale
    s_o = jnp.dot(q * k_o, mtemp, preferred_element_type=f32) * t_scale
    m = jnp.maximum(s_s, s_o)
    e_s = jnp.exp(s_s - m)
    e_o = jnp.exp(s_o - m)
    ctx = (e_s * v_s + e_o * v_o) / (e_s + e_o)        # exact softmax normalisation
    y = jnp.dot(ctx, two_ref[...], preferred_element_type=f32) + tbo_ref[...]    # (S, E)

    # -------- stage 4: 12 ViT encoder blocks on the whole (S, E) slab ----------------
    e_scale = 1.0 / math.sqrt(head_dim)
    num_levels = len(feature_levels)

    def enc_layer(l, x):
        hh = layernorm(x, ln1g_ref[l], ln1b_ref[l], 1e-6)
        qkv_l = jnp.dot(hh, wqkv_ref[l], preferred_element_type=f32) + bqkv_ref[l]
        q_l = qkv_l[:, 0:e]
        k_l = qkv_l[:, e:2 * e]
        v_l = qkv_l[:, 2 * e:3 * e]
        # All sequences x all heads batched: keys/values replicated per head (tile_ref)
        # and lane-masked to each head's channels -> two lane-dense matmuls.
        k_big = jnp.dot(tile_ref[...], k_l, preferred_element_type=f32) * headmask_ref[...]  # (H*S, E)
        v_big = jnp.dot(tile_ref[...], v_l, preferred_element_type=f32) * headmask_ref[...]
        s = lax.dot_general(q_l, k_big, (((1,), (1,)), ((), ())),
                            preferred_element_type=f32) * e_scale + seqmask_ref[...]         # (S, H*S)
        s = s - jnp.max(s, axis=-1, keepdims=True)
        p = jnp.exp(s)
        denom = jnp.dot(p, hsum_ref[...], preferred_element_type=f32)                         # (S, H)
        p = p * jnp.dot(1.0 / denom, hexp_ref[...], preferred_element_type=f32)
        attn = jnp.dot(p, v_big, preferred_element_type=f32)                                  # heads merged
        attn = jnp.dot(attn, wo_ref[l], preferred_element_type=f32) + bo_ref[l]
        x = x + attn
        hh2 = layernorm(x, ln2g_ref[l], ln2b_ref[l], 1e-6)
        mlp = gelu(jnp.dot(hh2, w1_ref[l], preferred_element_type=f32) + b1_ref[l])
        mlp = jnp.dot(mlp, w2_ref[l], preferred_element_type=f32) + b2_ref[l]
        x = x + mlp
        # Feature-pyramid taps (static lane offsets); the last level is stored after the loop.
        for pos_i, lvl in enumerate(feature_levels[:-1]):
            @pl.when(l == lvl)
            def _(x=x, pos_i=pos_i):
                o_ref[:, pos_i * e:(pos_i + 1) * e] = x
        return x

    x_final = lax.fori_loop(0, num_layers, enc_layer, y)
    o_ref[:, (num_levels - 1) * e:num_levels * e] = x_final


# --------------------- compile-time scatter / mask constants ----------------
def _build_constants(B, T, P, E):
    """0/1 numpy matrices (baked as constants) for token assembly, temporal pairing
    and the batched (all sequences x all heads) encoder attention."""
    assert T == 2  # TODO(synk): temporal pairing below hard-codes T=2 (as does the module's use).
    N = P + 1
    S = B * T * N
    BP = B * P
    a0 = np.zeros((S, BP), np.float32)
    a1 = np.zeros((S, BP), np.float32)
    selpos = np.zeros((S, N), np.float32)
    seltmp = np.zeros((S, T), np.float32)
    selcls = np.zeros((S, 1), np.float32)
    permq = np.zeros((S, S), np.float32)
    permp = np.zeros((S, S), np.float32)
    for i in range(S):
        b, t, n = i // (T * N), (i // N) % T, i % N
        selpos[i, n] = 1.0
        seltmp[i, t] = 1.0
        if n == 0:
            selcls[i, 0] = 1.0
        elif t == 0:
            a0[i, b * P + n - 1] = 1.0
        else:
            a1[i, b * P + n - 1] = 1.0
        # torch's x.view(B*N, T, C) pairs CONSECUTIVE rows of the (B,T,N,C) flattening;
        # encoder row (b, t, n) is the attention output of pair (b*N + n) at time t.
        permq[i, b * T * N + 2 * n + t] = 1.0
        permp[i, b * T * N + 2 * n + (1 - t)] = 1.0
    d = np.arange(E)
    mtemp = (d[:, None] // T_HEAD_DIM == d[None, :] // T_HEAD_DIM).astype(np.float32)   # (E, E)
    HS = ENC_HEADS * S
    r = np.arange(HS)
    tile = (r[:, None] % S == np.arange(S)[None, :]).astype(np.float32)                 # (H*S, S)
    headmask = ((r // S)[:, None] == d[None, :] // HEAD_DIM).astype(np.float32)         # (H*S, E)
    rows = np.arange(S)
    seqmask = np.where((rows[:, None] // N) == ((r % S)[None, :] // N),
                       0.0, -1e30).astype(np.float32)                                   # (S, H*S)
    hsum = ((r // S)[:, None] == np.arange(ENC_HEADS)[None, :]).astype(np.float32)      # (H*S, H)
    hexp = np.ascontiguousarray(hsum.T)                                                 # (H, H*S)
    return dict(a0=a0, a1=a1, selpos=selpos, seltmp=seltmp, selcls=selcls,
                permq=permq, permp=permp, mtemp=mtemp, tile=tile,
                headmask=headmask, seqmask=seqmask, hsum=hsum, hexp=hexp)


# ------------------------------ forward pass --------------------------------
def forward(params, x):
    """ViTMotionEmbedding.forward (eval mode) for [B, T, 3, H, W] or [B, T*3, H, W]."""
    if x.ndim == 4:
        b_, c_, h_, w_ = x.shape
        x = x.reshape(b_, NUM_FRAMES, 3, h_, w_)
    B, T, C, H, W = x.shape
    assert T == NUM_FRAMES == 2  # TODO(synk): fused kernel hard-codes the T=2 motion/temporal chain.
    assert FEATURE_LEVELS[-1] == ENC_LAYERS - 1
    gh, gw = H // PATCH, W // PATCH
    P = gh * gw
    N = P + 1
    E = EMBED_DIM
    S = B * T * N

    # Patch extraction is pure layout work (one XLA transpose); rows (t, b, p), features (c, u, v).
    patches = (x.reshape(B, T, 3, gh, PATCH, gw, PATCH)
                .transpose(1, 0, 3, 5, 2, 4, 6)
                .reshape(T * B * P, 3 * PATCH * PATCH))

    c = _build_constants(B, T, P, E)
    enc = params["enc"]
    kernel = functools.partial(
        _vit_motion_kernel, bp=B * P, e=E, num_layers=ENC_LAYERS,
        head_dim=HEAD_DIM, t_head_dim=T_HEAD_DIM, feature_levels=FEATURE_LEVELS)

    # One fused, grid-less pallas_call: all weights + activations (~0.7 MB) stay in VMEM.
    out = pl.pallas_call(
        kernel,
        out_shape=jax.ShapeDtypeStruct((S, NUM_LEVELS * E), jnp.float32),
    )(
        patches, params["patch_w"], params["patch_b"],
        params["m_w1a"], params["m_w1b"], params["m_b1"], params["m_w2"], params["m_b2"],
        params["cls"], params["pos"], params["temporal"],
        c["a0"], c["a1"], c["selpos"], c["seltmp"], c["selcls"],
        params["tln_g"], params["tln_b"], params["t_win"], params["t_bin"],
        params["t_wo"], params["t_bo"],
        c["mtemp"], c["permq"], c["permp"],
        enc["ln1_g"], enc["ln1_b"], enc["w_qkv"], enc["b_qkv"], enc["wo"], enc["bo"],
        enc["ln2_g"], enc["ln2_b"], enc["w1"], enc["b1"], enc["w2"], enc["b2"],
        c["tile"], c["headmask"], c["seqmask"], c["hsum"], c["hexp"],
    )

    # Output glue: drop cls rows, split the lane-dense (S, 4E) slab into 4 NCHW levels.
    out = out.reshape(B, T, N, NUM_LEVELS, E)[:, :, 1:, :, :]          # (B, T, P, 4, E)
    # Bilinear resize inside the pyramid is identity here (all levels share (gh, gw)).
    # TODO(synk): general bilinear resize between differing level sizes not implemented.
    final = []
    for k in range(NUM_LEVELS):
        f = out[:, :, :, k, :].transpose(0, 1, 3, 2).reshape(B, T * E, gh, gw)
        final.append(f)
    return final


# ------------------------------ parameter init -----------------------------
def init_params(key):
    keys = iter(jax.random.split(key, 64))

    def nrm(shape, scale=0.02):
        return scale * jax.random.normal(next(keys), shape, dtype=jnp.float32)

    E, L = EMBED_DIM, ENC_LAYERS
    # TODO(synk): pretrained vit_b_16 weights + bicubic pos-embed resize are init-time only;
    # deterministic synthetic inits are used instead (shapes/layout are faithful).
    p = {
        "patch_w": nrm((3 * PATCH * PATCH, E)),          # Conv2d(3,E,16,16) flattened (c,u,v)
        "patch_b": nrm((1, E)),
        "m_w1a": nrm((E, MOTION_DIM)),                   # Conv1x1(2E->motion), split over [f0|f1]
        "m_w1b": nrm((E, MOTION_DIM)),
        "m_b1": nrm((1, MOTION_DIM)),
        "m_w2": nrm((MOTION_DIM, E)),                    # Conv1x1(motion->E)
        "m_b2": nrm((1, E)),
        "cls": nrm((1, E)),
        "pos": nrm((SEQ, E)),
        "temporal": nrm((NUM_FRAMES, E)),
        "tln_g": jnp.ones((1, E), jnp.float32),
        "tln_b": jnp.zeros((1, E), jnp.float32),
        "t_win": nrm((E, 3 * E)),                        # fused MHA in-proj (x @ Win)
        "t_bin": nrm((1, 3 * E)),
        "t_wo": nrm((E, E)),
        "t_bo": nrm((1, E)),
        "enc": {
            "ln1_g": jnp.ones((L, 1, E), jnp.float32),
            "ln1_b": jnp.zeros((L, 1, E), jnp.float32),
            "w_qkv": nrm((L, E, 3 * E)),
            "b_qkv": nrm((L, 1, 3 * E)),
            "wo": nrm((L, E, E)),
            "bo": nrm((L, 1, E)),
            "ln2_g": jnp.ones((L, 1, E), jnp.float32),
            "ln2_b": jnp.zeros((L, 1, E), jnp.float32),
            "w1": nrm((L, E, MLP_DIM)),
            "b1": nrm((L, 1, MLP_DIM)),
            "w2": nrm((L, MLP_DIM, E)),
            "b2": nrm((L, 1, E)),
        },
    }
    return p


# ---------------------------------- main ------------------------------------
if __name__ == "__main__":
    key = jax.random.PRNGKey(0)
    k_params, k_x = jax.random.split(key)
    params = init_params(k_params)
    x = jax.random.normal(k_x, (BATCH, NUM_FRAMES, 3, IMG_H, IMG_W), dtype=jnp.float32)

    fwd = jax.jit(forward)
    pyramid = fwd(params, x)
    jax.block_until_ready(pyramid)

    expected = (BATCH, NUM_FRAMES * EMBED_DIM, GRID_H, GRID_W)
    assert len(pyramid) == NUM_LEVELS
    assert all(lvl.shape == expected for lvl in pyramid), [lvl.shape for lvl in pyramid]
    assert all(bool(jnp.isfinite(lvl).all()) for lvl in pyramid)
    print("KERNEL_OK")
</pallas_src>

<mosaic_0001>
module attributes {stable_mosaic.version = 11 : i64} {
  func.func @_vit_motion_kernel(%arg0: memref<32x768xf32, #tpu.memory_space<vmem>>, %arg1: memref<768x32xf32, #tpu.memory_space<vmem>>, %arg2: memref<1x32xf32, #tpu.memory_space<vmem>>, %arg3: memref<32x16xf32, #tpu.memory_space<vmem>>, %arg4: memref<32x16xf32, #tpu.memory_space<vmem>>, %arg5: memref<1x16xf32, #tpu.memory_space<vmem>>, %arg6: memref<16x32xf32, #tpu.memory_space<vmem>>, %arg7: memref<1x32xf32, #tpu.memory_space<vmem>>, %arg8: memref<1x32xf32, #tpu.memory_space<vmem>>, %arg9: memref<9x32xf32, #tpu.memory_space<vmem>>, %arg10: memref<2x32xf32, #tpu.memory_space<vmem>>, %arg11: memref<36x16xf32, #tpu.memory_space<vmem>>, %arg12: memref<36x16xf32, #tpu.memory_space<vmem>>, %arg13: memref<36x9xf32, #tpu.memory_space<vmem>>, %arg14: memref<36x2xf32, #tpu.memory_space<vmem>>, %arg15: memref<36x1xf32, #tpu.memory_space<vmem>>, %arg16: memref<1x32xf32, #tpu.memory_space<vmem>>, %arg17: memref<1x32xf32, #tpu.memory_space<vmem>>, %arg18: memref<32x96xf32, #tpu.memory_space<vmem>>, %arg19: memref<1x96xf32, #tpu.memory_space<vmem>>, %arg20: memref<32x32xf32, #tpu.memory_space<vmem>>, %arg21: memref<1x32xf32, #tpu.memory_space<vmem>>, %arg22: memref<32x32xf32, #tpu.memory_space<vmem>>, %arg23: memref<36x36xf32, #tpu.memory_space<vmem>>, %arg24: memref<36x36xf32, #tpu.memory_space<vmem>>, %arg25: memref<12x1x32xf32, #tpu.memory_space<vmem>>, %arg26: memref<12x1x32xf32, #tpu.memory_space<vmem>>, %arg27: memref<12x32x96xf32, #tpu.memory_space<vmem>>, %arg28: memref<12x1x96xf32, #tpu.memory_space<vmem>>, %arg29: memref<12x32x32xf32, #tpu.memory_space<vmem>>, %arg30: memref<12x1x32xf32, #tpu.memory_space<vmem>>, %arg31: memref<12x1x32xf32, #tpu.memory_space<vmem>>, %arg32: memref<12x1x32xf32, #tpu.memory_space<vmem>>, %arg33: memref<12x32x64xf32, #tpu.memory_space<vmem>>, %arg34: memref<12x1x64xf32, #tpu.memory_space<vmem>>, %arg35: memref<12x64x32xf32, #tpu.memory_space<vmem>>, %arg36: memref<12x1x32xf32, #tpu.memory_space<vmem>>, %arg37: memref<144x36xf32, #tpu.memory_space<vmem>>, %arg38: memref<144x32xf32, #tpu.memory_space<vmem>>, %arg39: memref<36x144xf32, #tpu.memory_space<vmem>>, %arg40: memref<144x4xf32, #tpu.memory_space<vmem>>, %arg41: memref<4x144xf32, #tpu.memory_space<vmem>>, %arg42: memref<36x128xf32, #tpu.memory_space<vmem>>) attributes {dimension_semantics = [], scalar_prefetch = 0 : i64, scratch_operands = 0 : i64, tpu.core_type = #tpu.core_type<tc>} {
    %c0 = arith.constant 0 : index
    %c0_0 = arith.constant 0 : index
    %0 = vector.load %arg0[%c0, %c0_0] : memref<32x768xf32, #tpu.memory_space<vmem>>, vector<32x768xf32>
    %c0_1 = arith.constant 0 : index
    %c0_2 = arith.constant 0 : index
    %1 = vector.load %arg1[%c0_1, %c0_2] : memref<768x32xf32, #tpu.memory_space<vmem>>, vector<768x32xf32>
    %cst = arith.constant dense<0.000000e+00> : vector<32x32xf32>
    %2 = tpu.matmul %0, %1, %cst {dimension_numbers = #tpu.dot_dimension_numbers<[1], [0], [0], [1], [0, 0, 1, 1], [], []>} : vector<32x768xf32>, vector<768x32xf32>, vector<32x32xf32> -> vector<32x32xf32>
    %c0_3 = arith.constant 0 : index
    %c0_4 = arith.constant 0 : index
    %3 = vector.load %arg2[%c0_3, %c0_4] : memref<1x32xf32, #tpu.memory_space<vmem>>, vector<1x32xf32>
    %4 = vector.broadcast %3 : vector<1x32xf32> to vector<32x32xf32>
    %5 = arith.addf %2, %4 : vector<32x32xf32>
    %6 = vector.extract_strided_slice %5 {offsets = [0, 0], sizes = [16, 32], strides = [1, 1]} : vector<32x32xf32> to vector<16x32xf32>
    %7 = vector.extract_strided_slice %5 {offsets = [16, 0], sizes = [16, 32], strides = [1, 1]} : vector<32x32xf32> to vector<16x32xf32>
    %c0_5 = arith.constant 0 : index
    %c0_6 = arith.constant 0 : index
    %8 = vector.load %arg3[%c0_5, %c0_6] : memref<32x16xf32, #tpu.memory_space<vmem>>, vector<32x16xf32>
    %cst_7 = arith.constant dense<0.000000e+00> : vector<16x16xf32>
    %9 = tpu.matmul %6, %8, %cst_7 {dimension_numbers = #tpu.dot_dimension_numbers<[1], [0], [0], [1], [0, 0, 1, 1], [], []>} : vector<16x32xf32>, vector<32x16xf32>, vector<16x16xf32> -> vector<16x16xf32>
    %c0_8 = arith.constant 0 : index
    %c0_9 = arith.constant 0 : index
    %10 = vector.load %arg4[%c0_8, %c0_9] : memref<32x16xf32, #tpu.memory_space<vmem>>, vector<32x16xf32>
    %cst_10 = arith.constant dense<0.000000e+00> : vector<16x16xf32>
    %11 = tpu.matmul %7, %10, %cst_10 {dimension_numbers = #tpu.dot_dimension_numbers<[1], [0], [0], [1], [0, 0, 1, 1], [], []>} : vector<16x32xf32>, vector<32x16xf32>, vector<16x16xf32> -> vector<16x16xf32>
    %12 = arith.addf %9, %11 : vector<16x16xf32>
    %c0_11 = arith.constant 0 : index
    %c0_12 = arith.constant 0 : index
    %13 = vector.load %arg5[%c0_11, %c0_12] : memref<1x16xf32, #tpu.memory_space<vmem>>, vector<1x16xf32>
    %14 = vector.broadcast %13 : vector<1x16xf32> to vector<16x16xf32>
    %15 = arith.addf %12, %14 : vector<16x16xf32>
    %16 = arith.mulf %15, %15 : vector<16x16xf32>
    %17 = arith.mulf %15, %16 : vector<16x16xf32>
    %cst_13 = arith.constant 4.471500e-02 : f32
    %18 = vector.broadcast %cst_13 : f32 to vector<16x16xf32>
    %19 = arith.mulf %18, %17 : vector<16x16xf32>
    %20 = arith.addf %15, %19 : vector<16x16xf32>
    %cst_14 = arith.constant 0.797884583 : f32
    %21 = vector.broadcast %cst_14 : f32 to vector<16x16xf32>
    %22 = arith.mulf %21, %20 : vector<16x16xf32>
    %23 = math.tanh %22 : vector<16x16xf32>
    %cst_15 = arith.constant 1.000000e+00 : f32
    %24 = vector.broadcast %cst_15 : f32 to vector<16x16xf32>
    %25 = arith.addf %24, %23 : vector<16x16xf32>
    %cst_16 = arith.constant 5.000000e-01 : f32
    %26 = vector.broadcast %cst_16 : f32 to vector<16x16xf32>
    %27 = arith.mulf %26, %25 : vector<16x16xf32>
    %28 = arith.mulf %15, %27 : vector<16x16xf32>
    %c0_17 = arith.constant 0 : index
    %c0_18 = arith.constant 0 : index
    %29 = vector.load %arg6[%c0_17, %c0_18] : memref<16x32xf32, #tpu.memory_space<vmem>>, vector<16x32xf32>
    %cst_19 = arith.constant dense<0.000000e+00> : vector<16x32xf32>
    %30 = tpu.matmul %28, %29, %cst_19 {dimension_numbers = #tpu.dot_dimension_numbers<[1], [0], [0], [1], [0, 0, 1, 1], [], []>} : vector<16x16xf32>, vector<16x32xf32>, vector<16x32xf32> -> vector<16x32xf32>
    %c0_20 = arith.constant 0 : index
    %c0_21 = arith.constant 0 : index
    %31 = vector.load %arg7[%c0_20, %c0_21] : memref<1x32xf32, #tpu.memory_space<vmem>>, vector<1x32xf32>
    %32 = vector.broadcast %31 : vector<1x32xf32> to vector<16x32xf32>
    %33 = arith.addf %30, %32 : vector<16x32xf32>
    %34 = arith.addf %7, %33 : vector<16x32xf32>
    %c0_22 = arith.constant 0 : index
    %c0_23 = arith.constant 0 : index
    %35 = vector.load %arg11[%c0_22, %c0_23] : memref<36x16xf32, #tpu.memory_space<vmem>>, vector<36x16xf32>
    %cst_24 = arith.constant dense<0.000000e+00> : vector<36x32xf32>
    %36 = tpu.matmul %35, %6, %cst_24 {dimension_numbers = #tpu.dot_dimension_numbers<[1], [0], [0], [1], [0, 0, 1, 1], [], []>} : vector<36x16xf32>, vector<16x32xf32>, vector<36x32xf32> -> vector<36x32xf32>
    %c0_25 = arith.constant 0 : index
    %c0_26 = arith.constant 0 : index
    %37 = vector.load %arg12[%c0_25, %c0_26] : memref<36x16xf32, #tpu.memory_space<vmem>>, vector<36x16xf32>
    %cst_27 = arith.constant dense<0.000000e+00> : vector<36x32xf32>
    %38 = tpu.matmul %37, %34, %cst_27 {dimension_numbers = #tpu.dot_dimension_numbers<[1], [0], [0], [1], [0, 0, 1, 1], [], []>} : vector<36x16xf32>, vector<16x32xf32>, vector<36x32xf32> -> vector<36x32xf32>
    %39 = arith.addf %36, %38 : vector<36x32xf32>
    %c0_28 = arith.constant 0 : index
    %c0_29 = arith.constant 0 : index
    %40 = vector.load %arg13[%c0_28, %c0_29] : memref<36x9xf32, #tpu.memory_space<vmem>>, vector<36x9xf32>
    %c0_30 = arith.constant 0 : index
    %c0_31 = arith.constant 0 : index
    %41 = vector.load %arg9[%c0_30, %c0_31] : memref<9x32xf32, #tpu.memory_space<vmem>>, vector<9x32xf32>
    %cst_32 = arith.constant dense<0.000000e+00> : vector<36x32xf32>
    %42 = tpu.matmul %40, %41, %cst_32 {dimension_numbers = #tpu.dot_dimension_numbers<[1], [0], [0], [1], [0, 0, 1, 1], [], []>} : vector<36x9xf32>, vector<9x32xf32>, vector<36x32xf32> -> vector<36x32xf32>
    %43 = arith.addf %39, %42 : vector<36x32xf32>
    %c0_33 = arith.constant 0 : index
    %c0_34 = arith.constant 0 : index
    %44 = vector.load %arg14[%c0_33, %c0_34] : memref<36x2xf32, #tpu.memory_space<vmem>>, vector<36x2xf32>
    %c0_35 = arith.constant 0 : index
    %c0_36 = arith.constant 0 : index
    %45 = vector.load %arg10[%c0_35, %c0_36] : memref<2x32xf32, #tpu.memory_space<vmem>>, vector<2x32xf32>
    %cst_37 = arith.constant dense<0.000000e+00> : vector<36x32xf32>
    %46 = tpu.matmul %44, %45, %cst_37 {dimension_numbers = #tpu.dot_dimension_numbers<[1], [0], [0], [1], [0, 0, 1, 1], [], []>} : vector<36x2xf32>, vector<2x32xf32>, vector<36x32xf32> -> vector<36x32xf32>
    %47 = arith.addf %43, %46 : vector<36x32xf32>
    %c0_38 = arith.constant 0 : index
    %c0_39 = arith.constant 0 : index
    %48 = vector.load %arg15[%c0_38, %c0_39] : memref<36x1xf32, #tpu.memory_space<vmem>>, vector<36x1xf32>
    %c0_40 = arith.constant 0 : index
    %c0_41 = arith.constant 0 : index
    %49 = vector.load %arg8[%c0_40, %c0_41] : memref<1x32xf32, #tpu.memory_space<vmem>>, vector<1x32xf32>
    %50 = vector.broadcast %48 : vector<36x1xf32> to vector<36x32xf32>
    %51 = vector.broadcast %49 : vector<1x32xf32> to vector<36x32xf32>
    %52 = arith.mulf %50, %51 : vector<36x32xf32>
    %53 = arith.addf %47, %52 : vector<36x32xf32>
    %c0_42 = arith.constant 0 : index
    %c0_43 = arith.constant 0 : index
    %54 = vector.load %arg16[%c0_42, %c0_43] : memref<1x32xf32, #tpu.memory_space<vmem>>, vector<1x32xf32>
    %c0_44 = arith.constant 0 : index
    %c0_45 = arith.constant 0 : index
    %55 = vector.load %arg17[%c0_44, %c0_45] : memref<1x32xf32, #tpu.memory_space<vmem>>, vector<1x32xf32>
    %cst_46 = arith.constant dense<0.000000e+00> : vector<36xf32>
    %56 = vector.multi_reduction <add>, %53, %cst_46 [1] : vector<36x32xf32> to vector<36xf32>
    %57 = vector.shape_cast %56 : vector<36xf32> to vector<36x1xf32>
    %cst_47 = arith.constant 3.200000e+01 : f32
    %58 = vector.broadcast %cst_47 : f32 to vector<36x1xf32>
    %59 = arith.divf %57, %58 : vector<36x1xf32>
    %60 = vector.broadcast %59 : vector<36x1xf32> to vector<36x32xf32>
    %61 = arith.subf %53, %60 : vector<36x32xf32>
    %62 = arith.mulf %61, %61 : vector<36x32xf32>
    %cst_48 = arith.constant dense<0.000000e+00> : vector<36xf32>
    %63 = vector.multi_reduction <add>, %62, %cst_48 [1] : vector<36x32xf32> to vector<36xf32>
    %64 = vector.shape_cast %63 : vector<36xf32> to vector<36x1xf32>
    %cst_49 = arith.constant 3.200000e+01 : f32
    %65 = vector.broadcast %cst_49 : f32 to vector<36x1xf32>
    %66 = arith.divf %64, %65 : vector<36x1xf32>
    %67 = vector.broadcast %59 : vector<36x1xf32> to vector<36x32xf32>
    %68 = arith.subf %53, %67 : vector<36x32xf32>
    %cst_50 = arith.constant 9.99999974E-6 : f32
    %69 = vector.broadcast %cst_50 : f32 to vector<36x1xf32>
    %70 = arith.addf %66, %69 : vector<36x1xf32>
    %71 = math.rsqrt %70 : vector<36x1xf32>
    %72 = vector.broadcast %71 : vector<36x1xf32> to vector<36x32xf32>
    %73 = arith.mulf %68, %72 : vector<36x32xf32>
    %74 = vector.broadcast %54 : vector<1x32xf32> to vector<36x32xf32>
    %75 = arith.mulf %73, %74 : vector<36x32xf32>
    %76 = vector.broadcast %55 : vector<1x32xf32> to vector<36x32xf32>
    %77 = arith.addf %75, %76 : vector<36x32xf32>
    %c0_51 = arith.constant 0 : index
    %c0_52 = arith.constant 0 : index
    %78 = vector.load %arg18[%c0_51, %c0_52] : memref<32x96xf32, #tpu.memory_space<vmem>>, vector<32x96xf32>
    %cst_53 = arith.constant dense<0.000000e+00> : vector<36x96xf32>
    %79 = tpu.matmul %77, %78, %cst_53 {dimension_numbers = #tpu.dot_dimension_numbers<[1], [0], [0], [1], [0, 0, 1, 1], [], []>} : vector<36x32xf32>, vector<32x96xf32>, vector<36x96xf32> -> vector<36x96xf32>
    %c0_54 = arith.constant 0 : index
    %c0_55 = arith.constant 0 : index
    %80 = vector.load %arg19[%c0_54, %c0_55] : memref<1x96xf32, #tpu.memory_space<vmem>>, vector<1x96xf32>
    %81 = vector.broadcast %80 : vector<1x96xf32> to vector<36x96xf32>
    %82 = arith.addf %79, %81 : vector<36x96xf32>
    %c0_56 = arith.constant 0 : index
    %c0_57 = arith.constant 0 : index
    %83 = vector.load %arg23[%c0_56, %c0_57] : memref<36x36xf32, #tpu.memory_space<vmem>>, vector<36x36xf32>
    %cst_58 = arith.constant dense<0.000000e+00> : vector<36x96xf32>
    %84 = tpu.matmul %83, %82, %cst_58 {dimension_numbers = #tpu.dot_dimension_numbers<[1], [0], [0], [1], [0, 0, 1, 1], [], []>} : vector<36x36xf32>, vector<36x96xf32>, vector<36x96xf32> -> vector<36x96xf32>
    %c0_59 = arith.constant 0 : index
    %c0_60 = arith.constant 0 : index
    %85 = vector.load %arg24[%c0_59, %c0_60] : memref<36x36xf32, #tpu.memory_space<vmem>>, vector<36x36xf32>
    %cst_61 = arith.constant dense<0.000000e+00> : vector<36x96xf32>
    %86 = tpu.matmul %85, %82, %cst_61 {dimension_numbers = #tpu.dot_dimension_numbers<[1], [0], [0], [1], [0, 0, 1, 1], [], []>} : vector<36x36xf32>, vector<36x96xf32>, vector<36x96xf32> -> vector<36x96xf32>
    %87 = vector.extract_strided_slice %84 {offsets = [0, 0], sizes = [36, 32], strides = [1, 1]} : vector<36x96xf32> to vector<36x32xf32>
    %88 = vector.extract_strided_slice %84 {offsets = [0, 32], sizes = [36, 32], strides = [1, 1]} : vector<36x96xf32> to vector<36x32xf32>
    %89 = vector.extract_strided_slice %84 {offsets = [0, 64], sizes = [36, 32], strides = [1, 1]} : vector<36x96xf32> to vector<36x32xf32>
    %90 = vector.extract_strided_slice %86 {offsets = [0, 32], sizes = [36, 32], strides = [1, 1]} : vector<36x96xf32> to vector<36x32xf32>
    %91 = vector.extract_strided_slice %86 {offsets = [0, 64], sizes = [36, 32], strides = [1, 1]} : vector<36x96xf32> to vector<36x32xf32>
    %c0_62 = arith.constant 0 : index
    %c0_63 = arith.constant 0 : index
    %92 = vector.load %arg22[%c0_62, %c0_63] : memref<32x32xf32, #tpu.memory_space<vmem>>, vector<32x32xf32>
    %93 = arith.mulf %87, %88 : vector<36x32xf32>
    %cst_64 = arith.constant dense<0.000000e+00> : vector<36x32xf32>
    %94 = tpu.matmul %93, %92, %cst_64 {dimension_numbers = #tpu.dot_dimension_numbers<[1], [0], [0], [1], [0, 0, 1, 1], [], []>} : vector<36x32xf32>, vector<32x32xf32>, vector<36x32xf32> -> vector<36x32xf32>
    %cst_65 = arith.constant 5.000000e-01 : f32
    %95 = vector.broadcast %cst_65 : f32 to vector<36x32xf32>
    %96 = arith.mulf %94, %95 : vector<36x32xf32>
    %97 = arith.mulf %87, %90 : vector<36x32xf32>
    %cst_66 = arith.constant dense<0.000000e+00> : vector<36x32xf32>
    %98 = tpu.matmul %97, %92, %cst_66 {dimension_numbers = #tpu.dot_dimension_numbers<[1], [0], [0], [1], [0, 0, 1, 1], [], []>} : vector<36x32xf32>, vector<32x32xf32>, vector<36x32xf32> -> vector<36x32xf32>
    %cst_67 = arith.constant 5.000000e-01 : f32
    %99 = vector.broadcast %cst_67 : f32 to vector<36x32xf32>
    %100 = arith.mulf %98, %99 : vector<36x32xf32>
    %101 = arith.maximumf %96, %100 : vector<36x32xf32>
    %102 = arith.subf %96, %101 : vector<36x32xf32>
    %103 = math.exp %102 : vector<36x32xf32>
    %104 = arith.subf %100, %101 : vector<36x32xf32>
    %105 = math.exp %104 : vector<36x32xf32>
    %106 = arith.mulf %103, %89 : vector<36x32xf32>
    %107 = arith.mulf %105, %91 : vector<36x32xf32>
    %108 = arith.addf %106, %107 : vector<36x32xf32>
    %109 = arith.addf %103, %105 : vector<36x32xf32>
    %110 = arith.divf %108, %109 : vector<36x32xf32>
    %c0_68 = arith.constant 0 : index
    %c0_69 = arith.constant 0 : index
    %111 = vector.load %arg20[%c0_68, %c0_69] : memref<32x32xf32, #tpu.memory_space<vmem>>, vector<32x32xf32>
    %cst_70 = arith.constant dense<0.000000e+00> : vector<36x32xf32>
    %112 = tpu.matmul %110, %111, %cst_70 {dimension_numbers = #tpu.dot_dimension_numbers<[1], [0], [0], [1], [0, 0, 1, 1], [], []>} : vector<36x32xf32>, vector<32x32xf32>, vector<36x32xf32> -> vector<36x32xf32>
    %c0_71 = arith.constant 0 : index
    %c0_72 = arith.constant 0 : index
    %113 = vector.load %arg21[%c0_71, %c0_72] : memref<1x32xf32, #tpu.memory_space<vmem>>, vector<1x32xf32>
    %114 = vector.broadcast %113 : vector<1x32xf32> to vector<36x32xf32>
    %115 = arith.addf %112, %114 : vector<36x32xf32>
    %c0_i32 = arith.constant 0 : i32
    %c12_i32 = arith.constant 12 : i32
    %116 = arith.addi %c0_i32, %c12_i32 : i32
    %c1_i32 = arith.constant 1 : i32
    %117 = scf.for %arg43 = %c0_i32 to %116 step %c1_i32 iter_args(%arg44 = %115) -> (vector<36x32xf32>)  : i32 {
      %119 = arith.index_cast %arg43 : i32 to index
      %c0_75 = arith.constant 0 : index
      %c0_76 = arith.constant 0 : index
      %120 = vector.load %arg25[%119, %c0_75, %c0_76] : memref<12x1x32xf32, #tpu.memory_space<vmem>>, vector<1x1x32xf32>
      %121 = vector.shape_cast %120 : vector<1x1x32xf32> to vector<1x32xf32>
      %122 = arith.index_cast %arg43 : i32 to index
      %c0_77 = arith.constant 0 : index
      %c0_78 = arith.constant 0 : index
      %123 = vector.load %arg26[%122, %c0_77, %c0_78] : memref<12x1x32xf32, #tpu.memory_space<vmem>>, vector<1x1x32xf32>
      %124 = vector.shape_cast %123 : vector<1x1x32xf32> to vector<1x32xf32>
      %cst_79 = arith.constant dense<0.000000e+00> : vector<36xf32>
      %125 = vector.multi_reduction <add>, %arg44, %cst_79 [1] : vector<36x32xf32> to vector<36xf32>
      %126 = vector.shape_cast %125 : vector<36xf32> to vector<36x1xf32>
      %cst_80 = arith.constant 3.200000e+01 : f32
      %127 = vector.broadcast %cst_80 : f32 to vector<36x1xf32>
      %128 = arith.divf %126, %127 : vector<36x1xf32>
      %129 = vector.broadcast %128 : vector<36x1xf32> to vector<36x32xf32>
      %130 = arith.subf %arg44, %129 : vector<36x32xf32>
      %131 = arith.mulf %130, %130 : vector<36x32xf32>
      %cst_81 = arith.constant dense<0.000000e+00> : vector<36xf32>
      %132 = vector.multi_reduction <add>, %131, %cst_81 [1] : vector<36x32xf32> to vector<36xf32>
      %133 = vector.shape_cast %132 : vector<36xf32> to vector<36x1xf32>
      %cst_82 = arith.constant 3.200000e+01 : f32
      %134 = vector.broadcast %cst_82 : f32 to vector<36x1xf32>
      %135 = arith.divf %133, %134 : vector<36x1xf32>
      %136 = vector.broadcast %128 : vector<36x1xf32> to vector<36x32xf32>
      %137 = arith.subf %arg44, %136 : vector<36x32xf32>
      %cst_83 = arith.constant 9.99999997E-7 : f32
      %138 = vector.broadcast %cst_83 : f32 to vector<36x1xf32>
      %139 = arith.addf %135, %138 : vector<36x1xf32>
      %140 = math.rsqrt %139 : vector<36x1xf32>
      %141 = vector.broadcast %140 : vector<36x1xf32> to vector<36x32xf32>
      %142 = arith.mulf %137, %141 : vector<36x32xf32>
      %143 = vector.broadcast %121 : vector<1x32xf32> to vector<36x32xf32>
      %144 = arith.mulf %142, %143 : vector<36x32xf32>
      %145 = vector.broadcast %124 : vector<1x32xf32> to vector<36x32xf32>
      %146 = arith.addf %144, %145 : vector<36x32xf32>
      %147 = arith.index_cast %arg43 : i32 to index
      %c0_84 = arith.constant 0 : index
      %c0_85 = arith.constant 0 : index
      %148 = vector.load %arg27[%147, %c0_84, %c0_85] : memref<12x32x96xf32, #tpu.memory_space<vmem>>, vector<1x32x96xf32>
      %149 = vector.shape_cast %148 : vector<1x32x96xf32> to vector<32x96xf32>
      %cst_86 = arith.constant dense<0.000000e+00> : vector<36x96xf32>
      %150 = tpu.matmul %146, %149, %cst_86 {dimension_numbers = #tpu.dot_dimension_numbers<[1], [0], [0], [1], [0, 0, 1, 1], [], []>} : vector<36x32xf32>, vector<32x96xf32>, vector<36x96xf32> -> vector<36x96xf32>
      %151 = arith.index_cast %arg43 : i32 to index
      %c0_87 = arith.constant 0 : index
      %c0_88 = arith.constant 0 : index
      %152 = vector.load %arg28[%151, %c0_87, %c0_88] : memref<12x1x96xf32, #tpu.memory_space<vmem>>, vector<1x1x96xf32>
      %153 = vector.shape_cast %152 : vector<1x1x96xf32> to vector<1x96xf32>
      %154 = vector.broadcast %153 : vector<1x96xf32> to vector<36x96xf32>
      %155 = arith.addf %150, %154 : vector<36x96xf32>
      %156 = vector.extract_strided_slice %155 {offsets = [0, 0], sizes = [36, 32], strides = [1, 1]} : vector<36x96xf32> to vector<36x32xf32>
      %157 = vector.extract_strided_slice %155 {offsets = [0, 32], sizes = [36, 32], strides = [1, 1]} : vector<36x96xf32> to vector<36x32xf32>
      %158 = vector.extract_strided_slice %155 {offsets = [0, 64], sizes = [36, 32], strides = [1, 1]} : vector<36x96xf32> to vector<36x32xf32>
      %c0_89 = arith.constant 0 : index
      %c0_90 = arith.constant 0 : index
      %159 = vector.load %arg37[%c0_89, %c0_90] : memref<144x36xf32, #tpu.memory_space<vmem>>, vector<144x36xf32>
      %cst_91 = arith.constant dense<0.000000e+00> : vector<144x32xf32>
      %160 = tpu.matmul %159, %157, %cst_91 {dimension_numbers = #tpu.dot_dimension_numbers<[1], [0], [0], [1], [0, 0, 1, 1], [], []>} : vector<144x36xf32>, vector<36x32xf32>, vector<144x32xf32> -> vector<144x32xf32>
      %c0_92 = arith.constant 0 : index
      %c0_93 = arith.constant 0 : index
      %161 = vector.load %arg38[%c0_92, %c0_93] : memref<144x32xf32, #tpu.memory_space<vmem>>, vector<144x32xf32>
      %162 = arith.mulf %160, %161 : vector<144x32xf32>
      %c0_94 = arith.constant 0 : index
      %c0_95 = arith.constant 0 : index
      %163 = vector.load %arg37[%c0_94, %c0_95] : memref<144x36xf32, #tpu.memory_space<vmem>>, vector<144x36xf32>
      %cst_96 = arith.constant dense<0.000000e+00> : vector<144x32xf32>
      %164 = tpu.matmul %163, %158, %cst_96 {dimension_numbers = #tpu.dot_dimension_numbers<[1], [0], [0], [1], [0, 0, 1, 1], [], []>} : vector<144x36xf32>, vector<36x32xf32>, vector<144x32xf32> -> vector<144x32xf32>
      %c0_97 = arith.constant 0 : index
      %c0_98 = arith.constant 0 : index
      %165 = vector.load %arg38[%c0_97, %c0_98] : memref<144x32xf32, #tpu.memory_space<vmem>>, vector<144x32xf32>
      %166 = arith.mulf %164, %165 : vector<144x32xf32>
      %cst_99 = arith.constant dense<0.000000e+00> : vector<36x144xf32>
      %167 = tpu.matmul %156, %162, %cst_99 {dimension_numbers = #tpu.dot_dimension_numbers<[1], [1], [0], [0], [0, 0, 1, 0], [], []>} : vector<36x32xf32>, vector<144x32xf32>, vector<36x144xf32> -> vector<36x144xf32>
      %cst_100 = arith.constant 0.353553385 : f32
      %168 = vector.broadcast %cst_100 : f32 to vector<36x144xf32>
      %169 = arith.mulf %167, %168 : vector<36x144xf32>
      %c0_101 = arith.constant 0 : index
      %c0_102 = arith.constant 0 : index
      %170 = vector.load %arg39[%c0_101, %c0_102] : memref<36x144xf32, #tpu.memory_space<vmem>>, vector<36x144xf32>
      %171 = arith.addf %169, %170 : vector<36x144xf32>
      %cst_103 = arith.constant dense<0xFF800000> : vector<36xf32>
      %172 = vector.multi_reduction <maximumf>, %171, %cst_103 [1] : vector<36x144xf32> to vector<36xf32>
      %173 = vector.shape_cast %172 : vector<36xf32> to vector<36x1xf32>
      %174 = vector.broadcast %173 : vector<36x1xf32> to vector<36x144xf32>
      %175 = arith.subf %171, %174 : vector<36x144xf32>
      %176 = math.exp %175 : vector<36x144xf32>
      %c0_104 = arith.constant 0 : index
      %c0_105 = arith.constant 0 : index
      %177 = vector.load %arg40[%c0_104, %c0_105] : memref<144x4xf32, #tpu.memory_space<vmem>>, vector<144x4xf32>
      %cst_106 = arith.constant dense<0.000000e+00> : vector<36x4xf32>
      %178 = tpu.matmul %176, %177, %cst_106 {dimension_numbers = #tpu.dot_dimension_numbers<[1], [0], [0], [1], [0, 0, 1, 1], [], []>} : vector<36x144xf32>, vector<144x4xf32>, vector<36x4xf32> -> vector<36x4xf32>
      %cst_107 = arith.constant 1.000000e+00 : f32
      %179 = vector.broadcast %cst_107 : f32 to vector<36x4xf32>
      %180 = arith.divf %179, %178 : vector<36x4xf32>
      %c0_108 = arith.constant 0 : index
      %c0_109 = arith.constant 0 : index
      %181 = vector.load %arg41[%c0_108, %c0_109] : memref<4x144xf32, #tpu.memory_space<vmem>>, vector<4x144xf32>
      %cst_110 = arith.constant dense<0.000000e+00> : vector<36x144xf32>
      %182 = tpu.matmul %180, %181, %cst_110 {dimension_numbers = #tpu.dot_dimension_numbers<[1], [0], [0], [1], [0, 0, 1, 1], [], []>} : vector<36x4xf32>, vector<4x144xf32>, vector<36x144xf32> -> vector<36x144xf32>
      %183 = arith.mulf %176, %182 : vector<36x144xf32>
      %cst_111 = arith.constant dense<0.000000e+00> : vector<36x32xf32>
      %184 = tpu.matmul %183, %166, %cst_111 {dimension_numbers = #tpu.dot_dimension_numbers<[1], [0], [0], [1], [0, 0, 1, 1], [], []>} : vector<36x144xf32>, vector<144x32xf32>, vector<36x32xf32> -> vector<36x32xf32>
      %185 = arith.index_cast %arg43 : i32 to index
      %c0_112 = arith.constant 0 : index
      %c0_113 = arith.constant 0 : index
      %186 = vector.load %arg29[%185, %c0_112, %c0_113] : memref<12x32x32xf32, #tpu.memory_space<vmem>>, vector<1x32x32xf32>
      %187 = vector.shape_cast %186 : vector<1x32x32xf32> to vector<32x32xf32>
      %cst_114 = arith.constant dense<0.000000e+00> : vector<36x32xf32>
      %188 = tpu.matmul %184, %187, %cst_114 {dimension_numbers = #tpu.dot_dimension_numbers<[1], [0], [0], [1], [0, 0, 1, 1], [], []>} : vector<36x32xf32>, vector<32x32xf32>, vector<36x32xf32> -> vector<36x32xf32>
      %189 = arith.index_cast %arg43 : i32 to index
      %c0_115 = arith.constant 0 : index
      %c0_116 = arith.constant 0 : index
      %190 = vector.load %arg30[%189, %c0_115, %c0_116] : memref<12x1x32xf32, #tpu.memory_space<vmem>>, vector<1x1x32xf32>
      %191 = vector.shape_cast %190 : vector<1x1x32xf32> to vector<1x32xf32>
      %192 = vector.broadcast %191 : vector<1x32xf32> to vector<36x32xf32>
      %193 = arith.addf %188, %192 : vector<36x32xf32>
      %194 = arith.addf %arg44, %193 : vector<36x32xf32>
      %195 = arith.index_cast %arg43 : i32 to index
      %c0_117 = arith.constant 0 : index
      %c0_118 = arith.constant 0 : index
      %196 = vector.load %arg31[%195, %c0_117, %c0_118] : memref<12x1x32xf32, #tpu.memory_space<vmem>>, vector<1x1x32xf32>
      %197 = vector.shape_cast %196 : vector<1x1x32xf32> to vector<1x32xf32>
      %198 = arith.index_cast %arg43 : i32 to index
      %c0_119 = arith.constant 0 : index
      %c0_120 = arith.constant 0 : index
      %199 = vector.load %arg32[%198, %c0_119, %c0_120] : memref<12x1x32xf32, #tpu.memory_space<vmem>>, vector<1x1x32xf32>
      %200 = vector.shape_cast %199 : vector<1x1x32xf32> to vector<1x32xf32>
      %cst_121 = arith.constant dense<0.000000e+00> : vector<36xf32>
      %201 = vector.multi_reduction <add>, %194, %cst_121 [1] : vector<36x32xf32> to vector<36xf32>
      %202 = vector.shape_cast %201 : vector<36xf32> to vector<36x1xf32>
      %cst_122 = arith.constant 3.200000e+01 : f32
      %203 = vector.broadcast %cst_122 : f32 to vector<36x1xf32>
      %204 = arith.divf %202, %203 : vector<36x1xf32>
      %205 = vector.broadcast %204 : vector<36x1xf32> to vector<36x32xf32>
      %206 = arith.subf %194, %205 : vector<36x32xf32>
      %207 = arith.mulf %206, %206 : vector<36x32xf32>
      %cst_123 = arith.constant dense<0.000000e+00> : vector<36xf32>
      %208 = vector.multi_reduction <add>, %207, %cst_123 [1] : vector<36x32xf32> to vector<36xf32>
      %209 = vector.shape_cast %208 : vector<36xf32> to vector<36x1xf32>
      %cst_124 = arith.constant 3.200000e+01 : f32
      %210 = vector.broadcast %cst_124 : f32 to vector<36x1xf32>
      %211 = arith.divf %209, %210 : vector<36x1xf32>
      %212 = vector.broadcast %204 : vector<36x1xf32> to vector<36x32xf32>
      %213 = arith.subf %194, %212 : vector<36x32xf32>
      %cst_125 = arith.constant 9.99999997E-7 : f32
      %214 = vector.broadcast %cst_125 : f32 to vector<36x1xf32>
      %215 = arith.addf %211, %214 : vector<36x1xf32>
      %216 = math.rsqrt %215 : vector<36x1xf32>
      %217 = vector.broadcast %216 : vector<36x1xf32> to vector<36x32xf32>
      %218 = arith.mulf %213, %217 : vector<36x32xf32>
      %219 = vector.broadcast %197 : vector<1x32xf32> to vector<36x32xf32>
      %220 = arith.mulf %218, %219 : vector<36x32xf32>
      %221 = vector.broadcast %200 : vector<1x32xf32> to vector<36x32xf32>
      %222 = arith.addf %220, %221 : vector<36x32xf32>
      %223 = arith.index_cast %arg43 : i32 to index
      %c0_126 = arith.constant 0 : index
      %c0_127 = arith.constant 0 : index
      %224 = vector.load %arg33[%223, %c0_126, %c0_127] : memref<12x32x64xf32, #tpu.memory_space<vmem>>, vector<1x32x64xf32>
      %225 = vector.shape_cast %224 : vector<1x32x64xf32> to vector<32x64xf32>
      %cst_128 = arith.constant dense<0.000000e+00> : vector<36x64xf32>
      %226 = tpu.matmul %222, %225, %cst_128 {dimension_numbers = #tpu.dot_dimension_numbers<[1], [0], [0], [1], [0, 0, 1, 1], [], []>} : vector<36x32xf32>, vector<32x64xf32>, vector<36x64xf32> -> vector<36x64xf32>
      %227 = arith.index_cast %arg43 : i32 to index
      %c0_129 = arith.constant 0 : index
      %c0_130 = arith.constant 0 : index
      %228 = vector.load %arg34[%227, %c0_129, %c0_130] : memref<12x1x64xf32, #tpu.memory_space<vmem>>, vector<1x1x64xf32>
      %229 = vector.shape_cast %228 : vector<1x1x64xf32> to vector<1x64xf32>
      %230 = vector.broadcast %229 : vector<1x64xf32> to vector<36x64xf32>
      %231 = arith.addf %226, %230 : vector<36x64xf32>
      %232 = arith.mulf %231, %231 : vector<36x64xf32>
      %233 = arith.mulf %231, %232 : vector<36x64xf32>
      %cst_131 = arith.constant 4.471500e-02 : f32
      %234 = vector.broadcast %cst_131 : f32 to vector<36x64xf32>
      %235 = arith.mulf %234, %233 : vector<36x64xf32>
      %236 = arith.addf %231, %235 : vector<36x64xf32>
      %cst_132 = arith.constant 0.797884583 : f32
      %237 = vector.broadcast %cst_132 : f32 to vector<36x64xf32>
      %238 = arith.mulf %237, %236 : vector<36x64xf32>
      %239 = math.tanh %238 : vector<36x64xf32>
      %cst_133 = arith.constant 1.000000e+00 : f32
      %240 = vector.broadcast %cst_133 : f32 to vector<36x64xf32>
      %241 = arith.addf %240, %239 : vector<36x64xf32>
      %cst_134 = arith.constant 5.000000e-01 : f32
      %242 = vector.broadcast %cst_134 : f32 to vector<36x64xf32>
      %243 = arith.mulf %242, %241 : vector<36x64xf32>
      %244 = arith.mulf %231, %243 : vector<36x64xf32>
      %245 = arith.index_cast %arg43 : i32 to index
      %c0_135 = arith.constant 0 : index
      %c0_136 = arith.constant 0 : index
      %246 = vector.load %arg35[%245, %c0_135, %c0_136] : memref<12x64x32xf32, #tpu.memory_space<vmem>>, vector<1x64x32xf32>
      %247 = vector.shape_cast %246 : vector<1x64x32xf32> to vector<64x32xf32>
      %cst_137 = arith.constant dense<0.000000e+00> : vector<36x32xf32>
      %248 = tpu.matmul %244, %247, %cst_137 {dimension_numbers = #tpu.dot_dimension_numbers<[1], [0], [0], [1], [0, 0, 1, 1], [], []>} : vector<36x64xf32>, vector<64x32xf32>, vector<36x32xf32> -> vector<36x32xf32>
      %249 = arith.index_cast %arg43 : i32 to index
      %c0_138 = arith.constant 0 : index
      %c0_139 = arith.constant 0 : index
      %250 = vector.load %arg36[%249, %c0_138, %c0_139] : memref<12x1x32xf32, #tpu.memory_space<vmem>>, vector<1x1x32xf32>
      %251 = vector.shape_cast %250 : vector<1x1x32xf32> to vector<1x32xf32>
      %252 = vector.broadcast %251 : vector<1x32xf32> to vector<36x32xf32>
      %253 = arith.addf %248, %252 : vector<36x32xf32>
      %254 = arith.addf %194, %253 : vector<36x32xf32>
      %c3_i32 = arith.constant 3 : i32
      %255 = arith.cmpi eq, %arg43, %c3_i32 : i32
      %256 = arith.extui %255 : i1 to i32
      %c0_i32_140 = arith.constant 0 : i32
      %257 = arith.cmpi ne, %256, %c0_i32_140 : i32
      scf.if %257 {
        %c0_143 = arith.constant 0 : index
        %c0_144 = arith.constant 0 : index
        %264 = vector.load %arg42[%c0_143, %c0_144] : memref<36x128xf32, #tpu.memory_space<vmem>>, vector<36x32xf32>
        tpu.vector_store %arg42[%c0_143, %c0_144], %254 {strides = array<i32>} : memref<36x128xf32, #tpu.memory_space<vmem>>, vector<36x32xf32>,
      } else {
      }
      %c6_i32 = arith.constant 6 : i32
      %258 = arith.cmpi eq, %arg43, %c6_i32 : i32
      %259 = arith.extui %258 : i1 to i32
      %c0_i32_141 = arith.constant 0 : i32
      %260 = arith.cmpi ne, %259, %c0_i32_141 : i32
      scf.if %260 {
        %c0_143 = arith.constant 0 : index
        %c32 = arith.constant 32 : index
        %264 = vector.load %arg42[%c0_143, %c32] : memref<36x128xf32, #tpu.memory_space<vmem>>, vector<36x32xf32>
        tpu.vector_store %arg42[%c0_143, %c32], %254 {strides = array<i32>} : memref<36x128xf32, #tpu.memory_space<vmem>>, vector<36x32xf32>,
      } else {
      }
      %c9_i32 = arith.constant 9 : i32
      %261 = arith.cmpi eq, %arg43, %c9_i32 : i32
      %262 = arith.extui %261 : i1 to i32
      %c0_i32_142 = arith.constant 0 : i32
      %263 = arith.cmpi ne, %262, %c0_i32_142 : i32
      scf.if %263 {
        %c0_143 = arith.constant 0 : index
        %c64 = arith.constant 64 : index
        %264 = vector.load %arg42[%c0_143, %c64] : memref<36x128xf32, #tpu.memory_space<vmem>>, vector<36x32xf32>
        tpu.vector_store %arg42[%c0_143, %c64], %254 {strides = array<i32>} : memref<36x128xf32, #tpu.memory_space<vmem>>, vector<36x32xf32>,
      } else {
      }
      scf.yield %254 : vector<36x32xf32>
    }
    %c12_i32_73 = arith.constant 12 : i32
    %c0_74 = arith.constant 0 : index
    %c96 = arith.constant 96 : index
    %118 = vector.load %arg42[%c0_74, %c96] : memref<36x128xf32, #tpu.memory_space<vmem>>, vector<36x32xf32>
    tpu.vector_store %arg42[%c0_74, %c96], %117 {strides = array<i32>} : memref<36x128xf32, #tpu.memory_space<vmem>>, vector<36x32xf32>,
    return
  }
}

</mosaic_0001>

<bundles_post_ra>
// kernel: forward.1
= control target key start
LH: loop header
LB: loop body
LE: loop exit
PB: predicated region body
PF: predicated region fallthrough
CT: control target
= control target key end

     0   :  { %s5803_s6 = smov 1   ;;  %s5804_s10 = smov 2   ;;  %s7158_s0 = inlined_call_operand.smem [shape: u32[43], index: -1, kind: input, shape index: {}] }
   0x1   :  { %s5868_s5 = sld [smem:[%s7158_s0]]   ;;  %s5805_s14 = smov 3  }
   0x2   :  { %s5873_s9 = sld [smem:[%s7158_s0 + %s5803_s6]]   ;;  %s5806_s18 = smov 4  }
   0x3   :  { %s5878_s13 = sld [smem:[%s7158_s0 + %s5804_s10]]   ;;  %s5807_s22 = smov 5  }
   0x4   :  { %s5883_s17 = sld [smem:[%s7158_s0 + %s5805_s14]]   ;;  %s5808_s26 = smov 6  }
   0x5   :  { %s5888_s21 = sld [smem:[%s7158_s0 + %s5806_s18]]   ;;  %s5809_s30 = smov 7  }
   0x6   :  { %s5893_s25 = sld [smem:[%s7158_s0 + %s5807_s22]]   ;;  %s5810_s4 = smov 8  }
   0x7   :  { %s5898_s29 = sld [smem:[%s7158_s0 + %s5808_s26]]   ;;  %s5811_s10 = smov 9  }
   0x8   :  { %s5903_s3 = sld [smem:[%s7158_s0 + %s5809_s30]]   ;;  %s5812_s15 = smov 10  }
   0x9   :  { %s5908_s8 = sld [smem:[%s7158_s0 + %s5810_s4]]   ;;  %s5813_s20 = smov 11  }
   0xa   :  { %s5913_s14 = sld [smem:[%s7158_s0 + %s5811_s10]]   ;;  %s5814_s26 = smov 12  }
   0xb   :  { %s5918_s19 = sld [smem:[%s7158_s0 + %s5812_s15]]   ;;  %s5815_s1 = smov 13  }
   0xc   :  { %s5923_s24 = sld [smem:[%s7158_s0 + %s5813_s20]]   ;;  %s5816_s7 = smov 14  }
   0xd   :  { %s5928_s30 = sld [smem:[%s7158_s0 + %s5814_s26]]   ;;  %s5817_s15 = smov 15  }
   0xe   :  { %s5933_s6 = sld [smem:[%s7158_s0 + %s5815_s1]]   ;;  %s5818_s22 = smov 16  }
   0xf   :  { %7168 = sst [smem:[#allocation5_spill]] %s5908_s8  ;;  %s5819_s28 = smov 17  }
  0x10   :  { %7169 = sst [smem:[#allocation6_spill]] %s5913_s14 }
  0x11   :  { %s5938_s12 = sld [smem:[%s7158_s0 + %s5816_s7]]   ;;  %s5820_s7 = smov 18  }
  0x12   :  { %s5943_s20 = sld [smem:[%s7158_s0 + %s5817_s15]]   ;;  %s5821_s15 = smov 19  }
  0x13   :  { %s5948_s27 = sld [smem:[%s7158_s0 + %s5818_s22]]   ;;  %s5822_s22 = smov 20  }
  0x14   :  { %7170 = sst [smem:[#allocation7_spill]] %s5933_s6 }
  0x15   :  { %s5953_s4 = sld [smem:[%s7158_s0 + %s5819_s28]]   ;;  %s5823_s28 = smov 21  }
  0x16   :  { %s5958_s8 = sld [smem:[%s7158_s0 + %s5820_s7]]   ;;  %s5824_s7 = smov 22  }
  0x17   :  { %s5963_s6 = sld [smem:[%s7158_s0 + %s5821_s15]]   ;;  %s5825_s15 = smov 23  }
  0x19   :  { %7171 = sst [smem:[#allocation8_spill]] %s5948_s27 }
  0x1a   :  { %s5968_s27 = sld [smem:[%s7158_s0 + %s5822_s22]]   ;;  %s5826_s22 = smov 24  }
  0x1b   :  { %7172 = sst [smem:[#allocation9_spill]] %s5953_s4 }
  0x1c   :  { %7173 = sst [smem:[#allocation10_spill]] %s5958_s8 }
  0x1d   :  { %7174 = sst [smem:[#allocation11_spill]] %s5963_s6 }
  0x1e   :  { %s5973_s4 = sld [smem:[%s7158_s0 + %s5823_s28]]   ;;  %s5827_s28 = smov 25  }
  0x1f   :  { %s5978_s8 = sld [smem:[%s7158_s0 + %s5824_s7]]   ;;  %s5828_s7 = smov 26  }
  0x20   :  { %7175 = sst [smem:[#allocation12_spill]] %s5968_s27 }
  0x21   :  { %s5983_s6 = sld [smem:[%s7158_s0 + %s5825_s15]]   ;;  %s5829_s15 = smov 27  }
  0x22   :  { %s5988_s27 = sld [smem:[%s7158_s0 + %s5826_s22]]   ;;  %s5830_s22 = smov 28  }
  0x23   :  { %s5993_s14 = sld [smem:[%s7158_s0 + %s5827_s28]]   ;;  %s5831_s28 = smov 29  }
  0x25   :  { %7176 = sst [smem:[#allocation13_spill]] %s5978_s8 }
  0x26   :  { %s5998_s8 = sld [smem:[%s7158_s0 + %s5828_s7]]   ;;  %s5832_s7 = smov 30  }
  0x27   :  { %7177 = sst [smem:[#allocation14_spill]] %s5983_s6 }
  0x28   :  { %7178 = sst [smem:[#allocation15_spill]] %s5988_s27 }
  0x29   :  { %7179 = sst [smem:[#allocation16_spill]] %s5993_s14 }
  0x2a   :  { %s6003_s6 = sld [smem:[%s7158_s0 + %s5829_s15]]   ;;  %s5833_s15 = smov 31  }
  0x2b   :  { %s6008_s27 = sld [smem:[%s7158_s0 + %s5830_s22]]   ;;  %s5834_s22 = smov 32  }
  0x2c   :  { %7180 = sst [smem:[#allocation17_spill]] %s5998_s8 }
  0x2d   :  { %s6013_s14 = sld [smem:[%s7158_s0 + %s5831_s28]]   ;;  %s5835_s28 = smov 33  }
  0x2e   :  { %s6018_s8 = sld [smem:[%s7158_s0 + %s5832_s7]]   ;;  %s5836_s7 = smov 34  }
  0x30   :  { %7181 = sst [smem:[#allocation18_spill]] %s6003_s6 }
  0x31   :  { %7182 = sst [smem:[#allocation19_spill]] %s6008_s27 }
  0x32   :  { %s6023_s6 = sld [smem:[%s7158_s0 + %s5833_s15]]   ;;  %s5837_s15 = smov 35  }
  0x33   :  { %7183 = sst [smem:[#allocation20_spill]] %s6013_s14 }
  0x34   :  { %7184 = sst [smem:[#allocation21_spill]] %s6018_s8 }
  0x35   :  { %s6028_s27 = sld [smem:[%s7158_s0 + %s5834_s22]]   ;;  %s5838_s22 = smov 36  }
  0x36   :  { %s6033_s14 = sld [smem:[%s7158_s0 + %s5835_s28]]   ;;  %s5839_s28 = smov 37  }
  0x37   :  { %s6038_s8 = sld [smem:[%s7158_s0 + %s5836_s7]]   ;;  %s5840_s7 = smov 38  }
  0x38   :  { %7185 = sst [smem:[#allocation22_spill]] %s6023_s6 }
  0x39   :  { %s6043_s6 = sld [smem:[%s7158_s0 + %s5837_s15]]   ;;  %s5841_s15 = smov 39  }
  0x3b   :  { %7186 = sst [smem:[#allocation23_spill]] %s6028_s27 }
  0x3c   :  { %7187 = sst [smem:[#allocation24_spill]] %s6033_s14 }
  0x3d   :  { %7188 = sst [smem:[#allocation25_spill]] %s6038_s8 }
  0x3e   :  { %s6048_s27 = sld [smem:[%s7158_s0 + %s5838_s22]]   ;;  %s5842_s22 = smov 40  }
  0x3f   :  { %7189 = sst [smem:[#allocation26_spill]] %s6043_s6 }
  0x40   :  { %s6053_s14 = sld [smem:[%s7158_s0 + %s5839_s28]]   ;;  %s5843_s28 = smov 41  }
  0x41   :  { %s6058_s8 = sld [smem:[%s7158_s0 + %s5840_s7]]   ;;  %s5844_s7 = smov 42  }
  0x42   :  { %s6063_s6 = sld [smem:[%s7158_s0 + %s5841_s15]]  }
  0x44   :  { %7190 = sst [smem:[#allocation27_spill]] %s6048_s27 }
  0x45   :  { %s6068_s27 = sld [smem:[%s7158_s0 + %s5842_s22]]  }
  0x46   :  { %7191 = sst [smem:[#allocation28_spill]] %s6053_s14 }
  0x47   :  { %7192 = sst [smem:[#allocation29_spill]] %s6058_s8 }
  0x48   :  { %s6073_s14 = sld [smem:[%s7158_s0 + %s5843_s28]]  }
  0x49   :  { %s6078_s8 = sld [smem:[%s7158_s0 + %s5844_s7]]  }
  0x4a   :  { %90 = vsyncpa [#allocation3], 0  ;;  %s5845_s15 = smov [#allocation2]   ;;  %s5731_s18 = scalar_lea.hbm %s5973_s4, 16 }
  0x4b   :  { %s139_s16 = sshll.u32 %s5845_s15, 4  ;;  %p5732_p0 = scmp.ne.s32.totalorder %s5973_s4, %s5731_s18  ;;  %s140_s16 = int_to_ptr.vmem [resolvable:$true] %s139_s16 }
  0x4c   :  { %p5735_p1 = scmp.lt.u32.totalorder %s5731_s18, %s5973_s4 }
  0x4e   :  { %p5737_p2 = pnand %p5735_p1, %p5732_p0 }
  0x50   :  { %5740 = shalt.err (!%p5737_p2)
}
  0x51   :  { %s5741_s22 = scalar_lea.vmem %s140_s16, 16  ;;  %s5745_s23 = scalar_lea.vmem %s140_s16, 32 }
  0x52   :  { %p5742_p3 = scmp.ne.s32.totalorder %s140_s16, %s5741_s22  ;;  %p5746_p4 = scmp.lt.s32.totalorder %s140_s16, %s140_s16 }
  0x53   :  { %p5747_p5 = scmp.lt.s32.totalorder %s5745_s23, %s5741_s22 }
  0x55   :  { %p5748_p6 = por %p5747_p5, %p5746_p4 }
  0x57   :  { %p5749_p7 = pnand %p5748_p6, %p5742_p3 }
  0x59   :  { %5752 = shalt.err (!%p5749_p7)
}
  0x5a   :  { %142 = dma.hbm_to_vmem [thread:$0]  %s5973_s4, 16, %s140_s16, [#allocation3]  }
  0x5b   :  { %5777 = dma.done.wait [#allocation3], 16  }
  0x5c   :  { %5778 = vsyncadd [#allocation3], 4294967280  ;;  %v226_v0 = vld [vmem:[%s5873_s9 + $0x80] sm:$0xff]  ;;  %v227_v1 = vld [vmem:[%s5873_s9 + $0x88] sm:$0xff]  ;;  %vm576_vm0 = vcmask 261120   ;;  %vm775_vm1 = vcmask 130048  }
  0x5d   :  { %v210_v2 = vld [vmem:[%s5873_s9] sm:$0xff]  ;;  %v5189_v3 = vpack.c.bf16 %v227_v1, %v226_v0  ;;  %v211_v4 = vld [vmem:[%s5873_s9 + $0x8] sm:$0xff]  ;;  %v228_v11 = vld [vmem:[%s5873_s9 + $0x90] sm:$0xff]  ;;  %vm5847_vm2 = vmmov 0   ;;  %vm1223_vm3 = vcmask 1041408   ;;  %vm1207_vm4 = vcmask 15360  }
  0x5e   :  { %v258_v5 = vld [vmem:[%s5873_s9 + $0x180] sm:$0xff]  ;;  %v259_v6 = vld [vmem:[%s5873_s9 + $0x188] sm:$0xff]  ;;  %v5191_v7 = vpack.c.bf16 %v211_v4, %v210_v2  ;;  %v229_v13 = vld [vmem:[%s5873_s9 + $0x98] sm:$0xff]  ;;  %s7193_s0 = sld [smem:[#allocation6_spill]]  ;;  %vm1102_vm5 = vcmask 1040384   ;;  %vm5850_vm6 = vmmov 1  }
  0x5f   :  { %v5221_v8 = vpack.c.bf16 %v259_v6, %v258_v5  ;;  %v242_v9 = vld [vmem:[%s5873_s9 + $0x100] sm:$0xff]  ;;  %v243_v10 = vld [vmem:[%s5873_s9 + $0x108] sm:$0xff]  ;;  %5190 = vmatprep.subr.bf16.mxu0 %v5189_v3  ;;  %v212_v14 = vld [vmem:[%s5873_s9 + $0x10] sm:$0xff]  ;;  %v5193_v16 = vpack.c.bf16 %v229_v13, %v228_v11  ;;  %vm1086_vm8 = vcmask 72704   ;;  %vm1383_vm9 = vcmask 257024  }
  0x60   :  { %v5223_v12 = vpack.c.bf16 %v243_v10, %v242_v9  ;;  %v213_v15 = vld [vmem:[%s5873_s9 + $0x18] sm:$0xff]  ;;  %5192 = vmatpush3.bf16.msra.mxu0 %v5191_v7  ;;  %v260_v18 = vld [vmem:[%s5873_s9 + $0x190] sm:$0xff]  ;;  %v230_v23 = vld [vmem:[%s5873_s9 + $0xa0] sm:$0xff]  ;;  %vm1597_vm10 = vcmask 1043456   ;;  %vm1581_vm11 = vcmask 293888  }
  0x61   :  { %5222 = vmatprep.subr.bf16.mxu1 %v5221_v8  ;;  %v5195_v17 = vpack.c.bf16 %v213_v15, %v212_v14  ;;  %v261_v19 = vld [vmem:[%s5873_s9 + $0x198] sm:$0xff]  ;;  %v244_v20 = vld [vmem:[%s5873_s9 + $0x110] sm:$0xff]  ;;  %v231_v24 = vld [vmem:[%s5873_s9 + $0xa8] sm:$0xff]  ;;  %5194 = vmatprep.subr.bf16.mxu0 %v5193_v16 }
  0x62   :  { %5224 = vmatpush3.bf16.msra.mxu1 %v5223_v12  ;;  %v5225_v21 = vpack.c.bf16 %v261_v19, %v260_v18  ;;  %v245_v22 = vld [vmem:[%s5873_s9 + $0x118] sm:$0xff]  ;;  %v5197_v26 = vpack.c.bf16 %v231_v24, %v230_v23  ;;  %v214_v27 = vld [vmem:[%s5873_s9 + $0x20] sm:$0xff]  ;;  %v215_v28 = vld [vmem:[%s5873_s9 + $0x28] sm:$0xff] }
  0x63   :  { %v5227_v25 = vpack.c.bf16 %v245_v22, %v244_v20  ;;  %v262_v29 = vld [vmem:[%s5873_s9 + $0x1a0] sm:$0xff]  ;;  %v263_v30 = vld [vmem:[%s5873_s9 + $0x1a8] sm:$0xff]  ;;  %v5199_v33 = vpack.c.bf16 %v215_v28, %v214_v27  ;;  %v232_v35 = vld [vmem:[%s5873_s9 + $0xb0] sm:$0xff] }
  0x64   :  { %5226 = vmatprep.subr.bf16.mxu1 %v5225_v21  ;;  %v246_v31 = vld [vmem:[%s5873_s9 + $0x120] sm:$0xff]  ;;  %v247_v32 = vld [vmem:[%s5873_s9 + $0x128] sm:$0xff]  ;;  %5196 = vmatpush3.bf16.msra.mxu0 %v5195_v17  ;;  %v5229_v34 = vpack.c.bf16 %v263_v30, %v262_v29  ;;  %v233_v36 = vld [vmem:[%s5873_s9 + $0xb8] sm:$0xff] }
  0x65   :  { %v216_v37 = vld [vmem:[%s5873_s9 + $0x30] sm:$0xff]  ;;  %5198 = vmatprep.subr.bf16.mxu0 %v5197_v26  ;;  %v5231_v38 = vpack.c.bf16 %v247_v32, %v246_v31  ;;  %v5201_v39 = vpack.c.bf16 %v233_v36, %v232_v35  ;;  %v217_v40 = vld [vmem:[%s5873_s9 + $0x38] sm:$0xff]  ;;  %v234_v46 = vld [vmem:[%s5873_s9 + $0xc0] sm:$0xff] }
  0x66   :  { %5228 = vmatpush3.bf16.msra.mxu1 %v5227_v25  ;;  %v264_v41 = vld [vmem:[%s5873_s9 + $0x1b0] sm:$0xff]  ;;  %v265_v42 = vld [vmem:[%s5873_s9 + $0x1b8] sm:$0xff]  ;;  %v235_v47 = vld [vmem:[%s5873_s9 + $0xc8] sm:$0xff]  ;;  %v5203_v48 = vpack.c.bf16 %v217_v40, %v216_v37 }
  0x67   :  { %5230 = vmatprep.subr.bf16.mxu1 %v5229_v34  ;;  %v5233_v43 = vpack.c.bf16 %v265_v42, %v264_v41  ;;  %v248_v44 = vld [vmem:[%s5873_s9 + $0x130] sm:$0xff]  ;;  %v249_v45 = vld [vmem:[%s5873_s9 + $0x138] sm:$0xff]  ;;  %v266_v49 = vld [vmem:[%s5873_s9 + $0x1c0] sm:$0xff]  ;;  %v5205_v52 = vpack.c.bf16 %v235_v47, %v234_v46 }
  0x68   :  { %5200 = vmatpush3.bf16.msra.mxu0 %v5199_v33  ;;  %v267_v50 = vld [vmem:[%s5873_s9 + $0x1c8] sm:$0xff]  ;;  %v5235_v51 = vpack.c.bf16 %v249_v45, %v248_v44  ;;  %v218_v53 = vld [vmem:[%s5873_s9 + $0x40] sm:$0xff]  ;;  %v236_v58 = vld [vmem:[%s5873_s9 + $0xd0] sm:$0xff] }
  0x69   :  { %5202 = vmatprep.subr.bf16.mxu0 %v5201_v39  ;;  %v219_v54 = vld [vmem:[%s5873_s9 + $0x48] sm:$0xff]  ;;  %v250_v55 = vld [vmem:[%s5873_s9 + $0x140] sm:$0xff]  ;;  %v5237_v56 = vpack.c.bf16 %v267_v50, %v266_v49  ;;  %v237_v59 = vld [vmem:[%s5873_s9 + $0xd8] sm:$0xff] }
  0x6a   :  { %5232 = vmatpush3.bf16.msra.mxu1 %v5231_v38  ;;  %v251_v57 = vld [vmem:[%s5873_s9 + $0x148] sm:$0xff]  ;;  %v268_v60 = vld [vmem:[%s5873_s9 + $0x1d0] sm:$0xff]  ;;  %v269_v61 = vld [vmem:[%s5873_s9 + $0x1d8] sm:$0xff]  ;;  %v5207_v62 = vpack.c.bf16 %v219_v54, %v218_v53  ;;  %v5209_v0 = vpack.c.bf16 %v237_v59, %v236_v58 }
  0x6b   :  { %5234 = vmatprep.subr.bf16.mxu1 %v5233_v43  ;;  %v5239_v63 = vpack.c.bf16 %v251_v57, %v250_v55  ;;  %v220_v1 = vld [vmem:[%s5873_s9 + $0x50] sm:$0xff]  ;;  %v221_v2 = vld [vmem:[%s5873_s9 + $0x58] sm:$0xff]  ;;  %v5241_v4 = vpack.c.bf16 %v269_v61, %v268_v60  ;;  %v238_v6 = vld [vmem:[%s5873_s9 + $0xe0] sm:$0xff] }
  0x6c   :  { %5204 = vmatpush3.bf16.msra.mxu0 %v5203_v48  ;;  %v252_v3 = vld [vmem:[%s5873_s9 + $0x150] sm:$0xff]  ;;  %v253_v5 = vld [vmem:[%s5873_s9 + $0x158] sm:$0xff]  ;;  %v239_v7 = vld [vmem:[%s5873_s9 + $0xe8] sm:$0xff]  ;;  %v5211_v10 = vpack.c.bf16 %v221_v2, %v220_v1 }
  0x6d   :  { %5206 = vmatprep.subr.bf16.mxu0 %v5205_v52  ;;  %v270_v8 = vld [vmem:[%s5873_s9 + $0x1e0] sm:$0xff]  ;;  %v271_v9 = vld [vmem:[%s5873_s9 + $0x1e8] sm:$0xff]  ;;  %v5243_v13 = vpack.c.bf16 %v253_v5, %v252_v3  ;;  %v5213_v14 = vpack.c.bf16 %v239_v7, %v238_v6  ;;  %v240_v19 = vld [vmem:[%s5873_s9 + $0xf0] sm:$0xff] }
  0x6e   :  { %5236 = vmatpush3.bf16.msra.mxu1 %v5235_v51  ;;  %v222_v11 = vld [vmem:[%s5873_s9 + $0x60] sm:$0xff]  ;;  %v187_v12 = vld [vmem:[%s5868_s5 + $0x8] sm:$0xff]  ;;  %v5245_v18 = vpack.c.bf16 %v271_v9, %v270_v8  ;;  %v241_v20 = vld [vmem:[%s5873_s9 + $0xf8] sm:$0xff] }
  0x6f   :  { %5238 = vmatprep.subr.bf16.mxu1 %v5237_v56  ;;  %v223_v15 = vld [vmem:[%s5873_s9 + $0x68] sm:$0xff]  ;;  %v254_v16 = vld [vmem:[%s5873_s9 + $0x160] sm:$0xff]  ;;  %377 = vmatprep.mubr.f32.mxu0 %v187_v12  ;;  %v189_v21 = vld [vmem:[%s5868_s5 + $0x18] sm:$0xff]  ;;  %v5217_v26 = vpack.c.bf16 %v241_v20, %v240_v19 }
  0x70   :  { %5208 = vmatpush3.bf16.msra.mxu0 %v5207_v62  ;;  %v255_v17 = vld [vmem:[%s5873_s9 + $0x168] sm:$0xff]  ;;  %v272_v22 = vld [vmem:[%s5873_s9 + $0x1f0] sm:$0xff]  ;;  %v273_v23 = vld [vmem:[%s5873_s9 + $0x1f8] sm:$0xff]  ;;  %462 = vmatprep.mubr.f32.mxu1 %v189_v21  ;;  %v5215_v24 = vpack.c.bf16 %v223_v15, %v222_v11 }
  0x71   :  { %5210 = vmatprep.subr.bf16.mxu0 %v5209_v0  ;;  %v5247_v25 = vpack.c.bf16 %v255_v17, %v254_v16  ;;  %v224_v27 = vld [vmem:[%s5873_s9 + $0x70] sm:$0xff]  ;;  %v225_v28 = vld [vmem:[%s5873_s9 + $0x78] sm:$0xff]  ;;  %v5249_v30 = vpack.c.bf16 %v273_v23, %v272_v22  ;;  %v290_v32 = vld [vmem:[%s5873_s9 + $0x280] sm:$0xff] }
  0x72   :  { %5240 = vmatpush3.bf16.msra.mxu1 %v5239_v63  ;;  %v256_v29 = vld [vmem:[%s5873_s9 + $0x170] sm:$0xff]  ;;  %v257_v31 = vld [vmem:[%s5873_s9 + $0x178] sm:$0xff]  ;;  %v291_v33 = vld [vmem:[%s5873_s9 + $0x288] sm:$0xff]  ;;  %v5219_v34 = vpack.c.bf16 %v225_v28, %v224_v27 }
  0x73   :  { %5242 = vmatprep.subr.bf16.mxu1 %v5241_v4  ;;  %v5251_v35 = vpack.c.bf16 %v257_v31, %v256_v29  ;;  %v5253_v36 = vpack.c.bf16 %v291_v33, %v290_v32  ;;  %v274_v37 = vld [vmem:[%s5873_s9 + $0x200] sm:$0xff]  ;;  %v275_v38 = vld [vmem:[%s5873_s9 + $0x208] sm:$0xff]  ;;  %v292_v39 = vld [vmem:[%s5873_s9 + $0x290] sm:$0xff] }
  0x74   :  { %5212 = vmatpush3.bf16.msra.mxu0 %v5211_v10  ;;  %v293_v40 = vld [vmem:[%s5873_s9 + $0x298] sm:$0xff]  ;;  %v186_v41 = vld [vmem:[%s5868_s5] sm:$0xff]  ;;  %v5255_v42 = vpack.c.bf16 %v275_v38, %v274_v37  ;;  %v188_v43 = vld [vmem:[%s5868_s5 + $0x10] sm:$0xff] }
  0x75   :  { %5214 = vmatprep.subr.bf16.mxu0 %v5213_v14  ;;  %v5257_v44 = vpack.c.bf16 %v293_v40, %v292_v39  ;;  %v276_v45 = vld [vmem:[%s5873_s9 + $0x210] sm:$0xff]  ;;  %v277_v46 = vld [vmem:[%s5873_s9 + $0x218] sm:$0xff]  ;;  %v294_v47 = vld [vmem:[%s5873_s9 + $0x2a0] sm:$0xff] }
  0x76   :  { %5244 = vmatpush3.bf16.msra.mxu1 %v5243_v13  ;;  %v295_v48 = vld [vmem:[%s5873_s9 + $0x2a8] sm:$0xff]  ;;  %v193_v49 = vld [vmem:[%s5868_s5 + $0x38] sm:$0xff]  ;;  %v5259_v51 = vpack.c.bf16 %v277_v46, %v276_v45  ;;  %v192_v52 = vld [vmem:[%s5868_s5 + $0x30] sm:$0xff] }
  0x77   :  { %5246 = vmatprep.subr.bf16.mxu1 %v5245_v18  ;;  %v195_v50 = vld [vmem:[%s5868_s5 + $0x48] sm:$0xff]  ;;  %v5261_v53 = vpack.c.bf16 %v295_v48, %v294_v47  ;;  %v278_v54 = vld [vmem:[%s5873_s9 + $0x220] sm:$0xff]  ;;  %v296_v57 = vld [vmem:[%s5873_s9 + $0x2b0] sm:$0xff] }
  0x78   :  { %5216 = vmatpush3.bf16.msra.mxu0 %v5215_v24  ;;  %v279_v55 = vld [vmem:[%s5873_s9 + $0x228] sm:$0xff]  ;;  %v194_v56 = vld [vmem:[%s5868_s5 + $0x40] sm:$0xff]  ;;  %v297_v58 = vld [vmem:[%s5873_s9 + $0x2b8] sm:$0xff] }
  0x79   :  { %5218 = vmatprep.subr.bf16.mxu0 %v5217_v26  ;;  %v199_v59 = vld [vmem:[%s5868_s5 + $0x68] sm:$0xff]  ;;  %v201_v60 = vld [vmem:[%s5868_s5 + $0x78] sm:$0xff]  ;;  %v5263_v61 = vpack.c.bf16 %v279_v55, %v278_v54  ;;  %v198_v62 = vld [vmem:[%s5868_s5 + $0x60] sm:$0xff]  ;;  %v5265_v63 = vpack.c.bf16 %v297_v58, %v296_v57 }
  0x7a   :  { %5248 = vmatpush3.bf16.msra.mxu1 %v5247_v25  ;;  %v280_v0 = vld [vmem:[%s5873_s9 + $0x230] sm:$0xff]  ;;  %v281_v1 = vld [vmem:[%s5873_s9 + $0x238] sm:$0xff]  ;;  %v298_v3 = vld [vmem:[%s5873_s9 + $0x2c0] sm:$0xff] }
  0x7b   :  { %5250 = vmatprep.subr.bf16.mxu1 %v5249_v30  ;;  %v200_v2 = vld [vmem:[%s5868_s5 + $0x70] sm:$0xff]  ;;  %v299_v4 = vld [vmem:[%s5873_s9 + $0x2c8] sm:$0xff]  ;;  %v205_v5 = vld [vmem:[%s5868_s5 + $0x98] sm:$0xff]  ;;  %v5267_v7 = vpack.c.bf16 %v281_v1, %v280_v0 }
  0x7c   :  { %5220 = vmatpush3.bf16.msra.mxu0 %v5219_v34  ;;  %v207_v6 = vld [vmem:[%s5868_s5 + $0xa8] sm:$0xff]  ;;  %v204_v8 = vld [vmem:[%s5868_s5 + $0x90] sm:$0xff]  ;;  %v5269_v9 = vpack.c.bf16 %v299_v4, %v298_v3  ;;  %v282_v10 = vld [vmem:[%s5873_s9 + $0x240] sm:$0xff] }
  0x7d   :  { %5254 = vmatprep.subr.bf16.mxu0 %v5253_v36  ;;  %v283_v11 = vld [vmem:[%s5873_s9 + $0x248] sm:$0xff]  ;;  %v206_v12 = vld [vmem:[%s5868_s5 + $0xa0] sm:$0xff]  ;;  %v300_v13 = vld [vmem:[%s5873_s9 + $0x2d0] sm:$0xff] }
  0x7e   :  { %5252 = vmatpush3.bf16.msra.mxu1 %v5251_v35  ;;  %v301_v14 = vld [vmem:[%s5873_s9 + $0x2d8] sm:$0xff]  ;;  %v191_v15 = vld [vmem:[%s5868_s5 + $0x28] sm:$0xff]  ;;  %v5271_v16 = vpack.c.bf16 %v283_v11, %v282_v10  ;;  %v284_v18 = vld [vmem:[%s5873_s9 + $0x250] sm:$0xff] }
  0x7f   :  { %378 = vmatmul.mubr.f32.vlgmr.msra.gmra.mrb[0].mxu0 %v186_v41  ;;  %v5273_v17 = vpack.c.bf16 %v301_v14, %v300_v13  ;;  %v285_v19 = vld [vmem:[%s5873_s9 + $0x258] sm:$0xff]  ;;  %v302_v20 = vld [vmem:[%s5873_s9 + $0x2e0] sm:$0xff]  ;;  %v303_v21 = vld [vmem:[%s5873_s9 + $0x2e8] sm:$0xff] }
  0x80   :  { %5256 = vmatpush3.bf16.msra.mxu0 %v5255_v42  ;;  %382 = vmatprep.mubr.f32.mxu0 %v193_v49  ;;  %v5275_v22 = vpack.c.bf16 %v285_v19, %v284_v18  ;;  %v5277_v23 = vpack.c.bf16 %v303_v21, %v302_v20  ;;  %v286_v24 = vld [vmem:[%s5873_s9 + $0x260] sm:$0xff]  ;;  %v287_v25 = vld [vmem:[%s5873_s9 + $0x268] sm:$0xff]  ;;  %v304_v26 = vld [vmem:[%s5873_s9 + $0x2f0] sm:$0xff] }
  0x81   :  { %463 = vmatmul.mubr.f32.vlgmr.msra.gmra.mrb[0].mxu1 %v188_v43  ;;  %5258 = vmatprep.subr.bf16.mxu0 %v5257_v44  ;;  %v305_v27 = vld [vmem:[%s5873_s9 + $0x2f8] sm:$0xff]  ;;  %v5279_v28 = vpack.c.bf16 %v287_v25, %v286_v24  ;;  %v288_v30 = vld [vmem:[%s5873_s9 + $0x270] sm:$0xff]  ;;  %v190_v33 = vld [vmem:[%s5868_s5 + $0x20] sm:$0xff]  ;;  %v5846_v43 = vmov 0.0|0.0  }
  0x82   :  { %467 = vmatprep.mubr.f32.mxu1 %v195_v50  ;;  %v5281_v29 = vpack.c.bf16 %v305_v27, %v304_v26  ;;  %v289_v31 = vld [vmem:[%s5873_s9 + $0x278] sm:$0xff]  ;;  %v196_v35 = vld [vmem:[%s5868_s5 + $0x50] sm:$0xff]  ;;  %v203_v36 = vld [vmem:[%s5868_s5 + $0x88] sm:$0xff]  ;;  %s7195_s9 = sld [smem:[#allocation5_spill]] }
  0x83   :  { %383 = vmatmul.mubr.f32.gmra.mrb[2].mxu0 %v192_v52  ;;  %v5283_v32 = vpack.c.bf16 %v289_v31, %v288_v30  ;;  %v197_v34 = vld [vmem:[%s5868_s5 + $0x58] sm:$0xff]  ;;  %v202_v37 = vld [vmem:[%s5868_s5 + $0x80] sm:$0xff]  ;;  %v208_v39 = vld [vmem:[%s5868_s5 + $0xb0] sm:$0xff] }
  0x84   :  { %5260 = vmatpush3.bf16.msra.mxu0 %v5259_v51  ;;  %387 = vmatprep.mubr.f32.mxu0 %v199_v59  ;;  %v209_v38 = vld [vmem:[%s5868_s5 + $0xb8] sm:$0xff]  ;;  %v572_v40 = vld [vmem:[%s5888_s21] sm:$0xff]  ;;  %v573_v41 = vld [vmem:[%s5888_s21 + $0x8] sm:$0xff]  ;;  %s7194_s5 = sld [smem:[#allocation7_spill]] }
  0x85   :  { %468 = vmatmul.mubr.f32.gmra.mrb[2].mxu1 %v194_v56  ;;  %5262 = vmatprep.subr.bf16.mxu0 %v5261_v53  ;;  %v5285_v42 = vpack.c.bf16 %v573_v41, %v572_v40  ;;  %v574_v44 = vld [vmem:[%s5888_s21 + $0x10] sm:$0xff]  ;;  %v575_v45 = vld [vmem:[%s5888_s21 + $0x18] sm:$0xff]  ;;  %v568_v47 = vld [vmem:[%s5883_s17] sm:$0xff]  ;;  %s7198_s21 = sld [smem:[#allocation9_spill]] }
  0x86   :  { %472 = vmatprep.mubr.f32.mxu1 %v201_v60  ;;  %v5289_v46 = vpack.c.bf16 %v575_v45, %v574_v44  ;;  %v569_v48 = vld [vmem:[%s5883_s17 + $0x8] sm:$0xff]  ;;  %v4274_v51 = vld [vmem:[%s5878_s13] ss:$0 sm:$0xff]  ;;  %vm5313_vm7 = vmpackc.low %vm1102_vm5, %vm5850_vm6  ;;  %s7196_s13 = sld [smem:[#allocation10_spill]] }
  0x87   :  { %388 = vmatmul.mubr.f32.gmra.mrb[4].mxu0 %v198_v62  ;;  %5286 = vmatprep.subr.bf16.mxu1 %v5285_v42  ;;  %v5293_v49 = vpack.c.bf16 %v569_v48, %v568_v47  ;;  %v767_v40 = vld [vmem:[%s5898_s29 + $0x8] sm:$0xff] }
  0x88   :  { %5264 = vmatpush3.bf16.msra.mxu0 %v5263_v61  ;;  %392 = vmatprep.mubr.f32.mxu0 %v205_v5 }
  0x89   :  { %473 = vmatmul.mubr.f32.gmra.mrb[4].mxu1 %v200_v2  ;;  %5266 = vmatprep.subr.bf16.mxu0 %v5265_v63 }
  0x8a   :  { %477 = vmatprep.mubr.f32.mxu1 %v207_v6  ;;  %5288 = vmatpush3.bf16.msra.mxu1 %v5285_v42  ;;  %v4279_v42 = vld [vmem:[%s5893_s25] ss:$0 sm:$0xff]  ;;  %s7199_s25 = sld [smem:[#allocation11_spill]] }
  0x8b   :  { %393 = vmatmul.mubr.f32.gmra.mrb[6].mxu0 %v204_v8  ;;  %5290 = vmatprep.subr.bf16.mxu1 %v5289_v46 }
  0x8c   :  { %5268 = vmatpush3.bf16.msra.mxu0 %v5267_v7  ;;  %547 = vmatprep.mubr.f32.mxu0 %v191_v15 }
  0x8d   :  { %478 = vmatmul.mubr.f32.gmra.mrb[6].mxu1 %v206_v12  ;;  %5270 = vmatprep.subr.bf16.mxu0 %v5269_v9 }
  0x8e   :  { %5292 = vmatpush3.bf16.msra.mxu1 %v5289_v46 }
  0x8f   :  { %5294 = vmatprep.subr.bf16.mxu1 %v5293_v49 }
  0x90   :  { %5272 = vmatpush3.bf16.msra.mxu0 %v5271_v16 }
  0x91   :  { %5274 = vmatprep.subr.bf16.mxu0 %v5273_v17 }
  0x94   :  { %5276 = vmatpush3.bf16.msra.mxu0 %v5275_v22 }
  0x95   :  { %5278 = vmatprep.subr.bf16.mxu0 %v5277_v23 }
  0x98   :  { %5280 = vmatpush3.bf16.msra.mxu0 %v5279_v28 }
  0x99   :  { %5282 = vmatprep.subr.bf16.mxu0 %v5281_v29 }
  0x9c   :  { %5284 = vmatpush3.bf16.msra.mxu0 %v5283_v32 }
  0x9d   :  { %5308 = vmatprep.subr.bf16.mxu0 %v5846_v43 }
  0x9f   :  { %548 = vmatmul.mubr.f32.vlgmr.msra.gmra.mrb[8].mxu0 %v190_v33 }
  0xa0   :  { %552 = vmatprep.mubr.f32.mxu0 %v197_v34  ;;  %v570_v34 = vld [vmem:[%s5883_s17 + $0x10] sm:$0xff] }
  0xa3   :  { %553 = vmatmul.mubr.f32.gmra.mrb[10].mxu0 %v196_v35  ;;  %v571_v35 = vld [vmem:[%s5883_s17 + $0x18] sm:$0xff]  ;;  %s7197_s17 = sld [smem:[#allocation8_spill]] }
  0xa4   :  { %557 = vmatprep.mubr.f32.mxu0 %v203_v36 }
  0xa7   :  { %558 = vmatmul.mubr.f32.gmra.mrb[12].mxu0 %v202_v37 }
  0xa8   :  { %562 = vmatprep.mubr.f32.mxu0 %v209_v38  ;;  %v5297_v38 = vpack.c.bf16 %v571_v35, %v570_v34  ;;  %v863_v35 = vld [vmem:[%s5923_s24 + $0x20] sm:$0xf] }
  0xab   :  { %563 = vmatmul.mubr.f32.gmra.mrb[14].mxu0 %v208_v39  ;;  %v766_v39 = vld [vmem:[%s5898_s29] sm:$0xff]  ;;  %s7200_s29 = sld [smem:[#allocation14_spill]] }
  0xac   :  { %v5301_v41 = vpack.c.bf16 %v767_v40, %v766_v39  ;;  %v1082_v39 = vld [vmem:[%s7194_s5 + $0x18] sm:$0xff]  ;;  %v1083_v40 = vld [vmem:[%s7194_s5 + $0x20] sm:$0xf] }
 0x152   :  { %v4485_v50 = vpop.f32.mrb[0].mxu0 }
 0x153   :  { %v4486_v52 = vpop.f32.mrb[1].mxu0 }
 0x154   :  { %v4529_v53 = vpop.f32.mrb[0].mxu1  ;;  %v4487_v54 = vadd.f32 %v4486_v52, %v4485_v50 }
 0x155   :  { %v4530_v55 = vpop.f32.mrb[1].mxu1 }
 0x156   :  { %v4531_v56 = vadd.f32 %v4530_v55, %v4529_v53  ;;  %v380_v57 = vadd.f32 %v4487_v54, %v4274_v51  ;;  %v4488_v58 = vpop.f32.mrb[2].mxu0 }
 0x157   :  { %v4489_v59 = vpop.f32.mrb[3].mxu0 }
 0x158   :  { %v4532_v60 = vpop.f32.mrb[2].mxu1  ;;  %v465_v61 = vadd.f32 %v4531_v56, %v380_v57  ;;  %v4490_v62 = vadd.f32 %v4489_v59, %v4488_v58 }
 0x159   :  { %v4533_v63 = vpop.f32.mrb[3].mxu1 }
 0x15a   :  { %v4534_v0 = vadd.f32 %v4533_v63, %v4532_v60  ;;  %v385_v1 = vadd.f32 %v4490_v62, %v4274_v51  ;;  %v4491_v2 = vpop.f32.mrb[4].mxu0 }
 0x15b   :  { %v4492_v3 = vpop.f32.mrb[5].mxu0 }
 0x15c   :  { %v4535_v4 = vpop.f32.mrb[4].mxu1  ;;  %v470_v5 = vadd.f32 %v4534_v0, %v385_v1  ;;  %v4493_v6 = vadd.f32 %v4492_v3, %v4491_v2  ;;  %v5848_v2 = vmov 0.0   ;;  %v859_v3 = vld [vmem:[%s5923_s24] sm:$0xff] }
 0x15d   :  { %v4536_v7 = vpop.f32.mrb[5].mxu1  ;;  %4822 = vmatprep.mubr.msk.f32.mxu0 %vm5847_vm2, %v5848_v2 }
 0x15e   :  { %v4537_v8 = vadd.f32 %v4536_v7, %v4535_v4  ;;  %v390_v9 = vadd.f32 %v4493_v6, %v4274_v51  ;;  %v4494_v10 = vpop.f32.mrb[6].mxu0  ;;  %v860_v4 = vld [vmem:[%s5923_s24 + $0x8] sm:$0xff]  ;;  %v1206_v6 = vld [vmem:[%s5918_s19] sm:$0x3]  ;;  %s7202_s19 = sld [smem:[#allocation13_spill]] }
 0x15f   :  { %v4495_v11 = vpop.f32.mrb[7].mxu0  ;;  %v1201_v7 = vld [vmem:[%s5938_s12] sm:$0xff] }
 0x160   :  { %v4538_v12 = vpop.f32.mrb[6].mxu1  ;;  %v475_v13 = vadd.f32 %v4537_v8, %v390_v9  ;;  %v4496_v14 = vadd.f32 %v4495_v11, %v4494_v10  ;;  %v1202_v8 = vld [vmem:[%s5938_s12 + $0x8] sm:$0xff]  ;;  %v1203_v9 = vld [vmem:[%s5938_s12 + $0x10] sm:$0xff]  ;;  %v1204_v10 = vld [vmem:[%s5938_s12 + $0x18] sm:$0xff] }
 0x161   :  { %v4539_v15 = vpop.f32.mrb[7].mxu1  ;;  %v1205_v11 = vld [vmem:[%s5938_s12 + $0x20] sm:$0xf]  ;;  %s7203_s12 = sld [smem:[#allocation12_spill]] }
 0x162   :  { %v4540_v16 = vadd.f32 %v4539_v15, %v4538_v12  ;;  %v395_v17 = vadd.f32 %v4496_v14, %v4274_v51  ;;  %v1322_v12 = vld [vmem:[%s5943_s20] sm:$0xff]  ;;  %v1324_v14 = vld [vmem:[%s5943_s20 + $0x10] sm:$0xff]  ;;  %v1323_v15 = vld [vmem:[%s5943_s20 + $0x8] sm:$0xff] }
 0x164   :  { %v480_v18 = vadd.f32 %v4540_v16, %v395_v17  ;;  %v1325_v16 = vld [vmem:[%s5943_s20 + $0x18] sm:$0xff]  ;;  %v1326_v17 = vld [vmem:[%s5943_s20 + $0x20] sm:$0xf]  ;;  %s6480_s20 = smov 0  }
 0x172   :  { %v4573_v19 = vpop.f32.mrb[8].mxu0 }
 0x173   :  { %v4574_v20 = vpop.f32.mrb[9].mxu0 }
 0x174   :  { %v4575_v21 = vadd.f32 %v4574_v20, %v4573_v19 }
 0x176   :  { %v550_v22 = vadd.f32 %v4575_v21, %v465_v61  ;;  %v4576_v23 = vpop.f32.mrb[10].mxu0 }
 0x177   :  { %v4577_v24 = vpop.f32.mrb[11].mxu0 }
 0x178   :  { %v4578_v25 = vadd.f32 %v4577_v24, %v4576_v23 }
 0x17a   :  { %v555_v26 = vadd.f32 %v4578_v25, %v470_v5  ;;  %v4579_v27 = vpop.f32.mrb[12].mxu0  ;;  %v861_v5 = vld [vmem:[%s5923_s24 + $0x10] sm:$0xff] }
 0x17b   :  { %v4580_v28 = vpop.f32.mrb[13].mxu0 }
 0x17c   :  { %v6212_v29 = vpack.c.bf16 %v555_v26, %v550_v22  ;;  %v4581_v30 = vadd.f32 %v4580_v28, %v4579_v27  ;;  %v865_v27 = vld [vmem:[%s5928_s30 + $0x8] sm:$0xff]  ;;  %v866_v28 = vld [vmem:[%s5928_s30 + $0x10] sm:$0xff] }
 0x17e   :  { %v6214_v31 = vadd.f32 %v4581_v30, %v475_v13  ;;  %v4582_v32 = vpop.f32.mrb[14].mxu0  ;;  %5310 = vmatpush3.bf16.msra.mxu0 %v6212_v29  ;;  %v5849_v13 = vmov 0   ;;  %v868_v30 = vld [vmem:[%s5928_s30 + $0x20] sm:$0xf] }
 0x17f   :  { %v4583_v33 = vpop.f32.mrb[15].mxu0  ;;  %4856 = vmatprep.subr.mxu0 %v5848_v2  ;;  %5604 = vset.pattern.permute.xlu0 %v5849_v13 }
 0x180   :  { %v4584_v36 = vadd.f32 %v4583_v33, %v4582_v32  ;;  %4778 = vmatprep.mubr.msk.f32.mxu1 %vm576_vm0, %v6214_v31  ;;  %1330 = vperm.xlu0 %5604, %v1322_v12   ;;  %v1085_v32 = vld [vmem:[%s7193_s0 + $0x8] sm:$0x1]  ;;  %v862_v33 = vld [vmem:[%s5923_s24 + $0x18] sm:$0xff]  ;;  %s5851_s24 = smov 96  }
 0x181   :  { %4823 = vmatmul.mubr.msk.f32.vlgmr.msra.gmra.mrb[16].mxu0 %vm775_vm1, %v859_v3  ;;  %5605 = vset.pattern.permute.xlu1 %v5849_v13 }
 0x182   :  { %v6221_v37 = vadd.f32 %v4584_v36, %v480_v18  ;;  %4825 = vmatprep.mubr.msk.f32.mxu0 %vm5847_vm2, %v5848_v2  ;;  %4857 = vmatpush3.msk.msra.mxu0 %vm1223_vm3, %v1206_v6  ;;  %v4280_v18 = vld [vmem:[%s5903_s3] ss:$0 sm:$0xff]  ;;  %s7201_s3 = sld [smem:[#allocation15_spill]] }
 0x183   :  { %5321 = vmatprep.subr.bf16.mxu0 %v5846_v43  ;;  %1340 = vperm.xlu1 %5605, %v1324_v14   ;;  %v1079_v36 = vld [vmem:[%s7194_s5] sm:$0xff] }
 0x184   :  { %4779 = vmatmul.mubr.msk.f32.vlgmr.msra.gmra.mrb[8].mxu1 %vm576_vm0, %v6221_v37  ;;  %1335 = vperm.xlu0 %5604, %v1323_v15   ;;  %v4305_v14 = vld [vmem:[%s7195_s9] ss:$0 sm:$0xff] }
 0x185   :  { %5296 = vmatpush3.bf16.msra.mxu1 %v5293_v49  ;;  %4789 = vmatprep.mubr.msk.f32.mxu1 %vm576_vm0, %v550_v22 }
 0x186   :  { %5298 = vmatprep.subr.bf16.mxu1 %v5297_v38  ;;  %4826 = vmatmul.mubr.msk.f32.gmra.mrb[18].mxu0 %vm775_vm1, %v860_v4 }
 0x187   :  { %4828 = vmatprep.mubr.msk.f32.mxu0 %vm5847_vm2, %v5848_v2  ;;  %1345 = vperm.xlu1 %5605, %v1325_v16  }
 0x188   :  { %1350 = vperm.xlu0 %5604, %v1326_v17  }
 0x189   :  { %5300 = vmatpush3.bf16.msra.mxu1 %v5297_v38  ;;  %v1081_v38 = vld [vmem:[%s7194_s5 + $0x10] sm:$0xff] }
 0x18a   :  { %5302 = vmatprep.subr.bf16.mxu1 %v5301_v41  ;;  %4829 = vmatmul.mubr.msk.f32.gmra.mrb[20].mxu0 %vm775_vm1, %v861_v5 }
 0x18b   :  { %4858 = vmatprep.mubr.msk.f32.mxu0 %vm5847_vm2, %v5848_v2 }
 0x18c   :  { %4790 = vmatmul.mubr.msk.f32.vlgmr.msra.gmra.mrb[8].mxu1 %vm576_vm0, %v555_v26  ;;  %v864_v26 = vld [vmem:[%s5928_s30] sm:$0xff] }
 0x18d   :  { %5304 = vmatpush3.bf16.msra.mxu1 %v5301_v41 }
 0x18e   :  { %5305 = vmatprep.subr.bf16.mxu1 %v5846_v43  ;;  %4859 = vmatmul.mubr.msk.f32.vlgmr.msra.gmra.mrb[22].mxu0 %vm1207_vm4, %v1201_v7 }
 0x18f   :  { %4861 = vmatprep.mubr.msk.f32.mxu0 %vm5847_vm2, %v5848_v2 }
 0x192   :  { %4862 = vmatmul.mubr.msk.f32.gmra.mrb[24].mxu0 %vm1207_vm4, %v1202_v8 }
 0x193   :  { %4864 = vmatprep.mubr.msk.f32.mxu0 %vm5847_vm2, %v5848_v2 }
 0x196   :  { %4865 = vmatmul.mubr.msk.f32.gmra.mrb[26].mxu0 %vm1207_vm4, %v1203_v9 }
 0x197   :  { %4867 = vmatprep.mubr.msk.f32.mxu0 %vm5847_vm2, %v5848_v2 }
 0x19a   :  { %4868 = vmatmul.mubr.msk.f32.gmra.mrb[28].mxu0 %vm1207_vm4, %v1204_v10 }
 0x19b   :  { %4870 = vmatprep.mubr.msk.f32.mxu0 %vm5847_vm2, %v5848_v2 }
 0x19e   :  { %4871 = vmatmul.mubr.msk.f32.gmra.mrb[30].mxu0 %vm1207_vm4, %v1205_v11 }
 0x19f   :  { %4906 = vmatprep.mubr.msk.f32.mxu0 %vm5847_vm2, %v5848_v2 }
 0x1ff   :  { %v1331_v15 = vpop.permute.xlu0 %1330 }
 0x200   :  { %v1359_v17 = vmul.f32 %v4305_v14, %v1331_v15 }
 0x254   :  { %v1055_v41 = vpop.f32.mrb[16].mxu0 }
 0x25f   :  { %v4791_v44 = vpop.f32.mrb[8].mxu1 }
 0x260   :  { %v747_v45 = vadd.f32 %v4791_v44, %v4279_v42  ;;  %v730_v46 = vpop.f32.mrb[9].mxu1 }
 0x261   :  { %v746_v47 = vadd.f32 %v4279_v42, %v730_v46  ;;  %v4824_v42 = vpop.f32.mrb[17].mxu0 }
 0x262   :  { %v749_v48 = vmul.f32 %v747_v45, %v747_v45  ;;  %v1060_v44 = vpop.f32.mrb[18].mxu0 }
 0x263   :  { %v748_v49 = vmul.f32 %v746_v47, %v746_v47 }
 0x264   :  { %v751_v50 = vmul.f32 %v749_v48, %v747_v45 }
 0x265   :  { %v750_v51 = vmul.f32 %v748_v49, %v746_v47 }
 0x266   :  { %v753_v52 = vmul.f32 0.044715, %v751_v50 }
 0x267   :  { %v752_v53 = vmul.f32 0.044715, %v750_v51 }
 0x268   :  { %v755_v54 = vadd.f32 %v753_v52, %v747_v45 }
 0x269   :  { %v754_v55 = vadd.f32 %v752_v53, %v746_v47 }
 0x26a   :  { %v757_v56 = vmul.f32 0.7978846, %v755_v54 }
 0x26b   :  { %v756_v57 = vmul.f32 0.7978846, %v754_v55 }
 0x26c   :  { %5606 = vtanh.f32 %v757_v56 }
 0x26d   :  { %5608 = vtanh.f32 %v756_v57 }
 0x276   :  { %v5607_v58 = vpop.eup %5606 }
 0x277   :  { %v5609_v59 = vpop.eup %5608  ;;  %v761_v60 = vadd.f32 1.0, %v5607_v58 }
 0x278   :  { %v760_v61 = vadd.f32 1.0, %v5609_v59 }
 0x279   :  { %v763_v62 = vmul.f32 0.5, %v761_v60 }
 0x27a   :  { %v762_v63 = vmul.f32 0.5, %v760_v61 }
 0x27b   :  { %v765_v1 = vmul.f32 %v763_v62, %v747_v45  ;;  %v4827_v45 = vpop.f32.mrb[19].mxu0 }
 0x27c   :  { %v764_v0 = vmul.f32 %v762_v63, %v746_v47  ;;  %v1065_v46 = vpop.f32.mrb[20].mxu0 }
 0x27d   :  { %v4830_v47 = vpop.f32.mrb[21].mxu0 }
 0x27e   :  { %4796 = vmatprep.mubr.msk.f32.mxu1 %vm775_vm1, %v764_v0  ;;  %v1293_v48 = vpop.f32.mrb[22].mxu0 }
 0x27f   :  { %4797 = vmatmul.mubr.msk.f32.vlgmr.msra.gmra.mrb[10].mxu1 %vm775_vm1, %v765_v1  ;;  %v4860_v49 = vpop.f32.mrb[23].mxu0 }
 0x280   :  { %4803 = vmatprep.mubr.msk.f32.mxu1 %vm5847_vm2, %v5848_v2  ;;  %v1298_v50 = vpop.f32.mrb[24].mxu0 }
 0x281   :  { %v4863_v51 = vpop.f32.mrb[25].mxu0 }
 0x282   :  { %v1303_v52 = vpop.f32.mrb[26].mxu0 }
 0x283   :  { %v4866_v53 = vpop.f32.mrb[27].mxu0 }
 0x284   :  { %v1308_v54 = vpop.f32.mrb[28].mxu0 }
 0x285   :  { %v4869_v55 = vpop.f32.mrb[29].mxu0 }
 0x286   :  { %v1313_v56 = vpop.f32.mrb[30].mxu0 }
 0x287   :  { %v4872_v57 = vpop.f32.mrb[31].mxu0 }
 0x352   :  { %v4798_v19 = vpop.f32.mrb[10].mxu1 }
 0x353   :  { %v854_v20 = vadd.f32 %v4798_v19, %v4280_v18  ;;  %v848_v21 = vpop.f32.mrb[11].mxu1 }
 0x354   :  { %v849_v22 = vadd.f32 %v4280_v18, %v848_v21 }
 0x355   :  { %v858_v23 = vadd.f32 %v854_v20, %v6221_v37  ;;  %v1080_v37 = vld [vmem:[%s7194_s5 + $0x8] sm:$0xff] }
 0x356   :  { %v857_v24 = vadd.f32 %v849_v22, %v6214_v31  ;;  %v1084_v31 = vld [vmem:[%s7193_s0] sm:$0xff] }
 0x357   :  { %v5312_v34 = vpack.c.bf16 %v1085_v32, %v1084_v31 }
 0x358   :  { %v5306_v25 = vpack.c.bf16 %v858_v23, %v857_v24 }
 0x35a   :  { %5307 = vmatpush3.bf16.msra.mxu1 %v5306_v25  ;;  %v1336_v25 = vpop.permute.xlu0 %1335 }
 0x35b   :  { %5487 = vmatprep.subr.bf16.mxu1 %v5846_v43 }
 0x35d   :  { %4804 = vmatmul.mubr.msk.f32.vlgmr.msra.gmra.mrb[12].mxu1 %vm775_vm1, %v864_v26  ;;  %v1341_v26 = vpop.permute.xlu1 %1340 }
 0x35e   :  { %5488 = vmatpush3.bf16.msra.mxu1 %v6212_v29  ;;  %4806 = vmatprep.mubr.msk.f32.mxu1 %vm5847_vm2, %v5848_v2  ;;  %v867_v29 = vld [vmem:[%s5928_s30 + $0x18] sm:$0xff]  ;;  %v1361_v31 = vmul.f32 %v4305_v14, %v1341_v26  ;;  %s5852_s30 = smov 64  }
 0x35f   :  { %5311 = vmatprep.subr.bf16.mxu1 %v5846_v43 }
 0x361   :  { %4807 = vmatmul.mubr.msk.f32.gmra.mrb[14].mxu1 %vm775_vm1, %v865_v27  ;;  %v1360_v27 = vmul.f32 %v4305_v14, %v1336_v25 }
 0x362   :  { %4809 = vmatprep.mubr.msk.f32.mxu1 %vm5847_vm2, %v5848_v2 }
 0x365   :  { %4810 = vmatmul.mubr.msk.f32.gmra.mrb[16].mxu1 %vm775_vm1, %v866_v28 }
 0x366   :  { %4812 = vmatprep.mubr.msk.f32.mxu1 %vm5847_vm2, %v5848_v2 }
 0x369   :  { %4813 = vmatmul.mubr.msk.f32.gmra.mrb[18].mxu1 %vm775_vm1, %v867_v29 }
 0x36a   :  { %4815 = vmatprep.mubr.msk.f32.mxu1 %vm5847_vm2, %v5848_v2 }
 0x36d   :  { %4816 = vmatmul.mubr.msk.f32.gmra.mrb[20].mxu1 %vm775_vm1, %v868_v30 }
 0x36e   :  { %4831 = vmatprep.mubr.msk.f32.mxu1 %vm5847_vm2, %v5848_v2 }
 0x371   :  { %4832 = vmatmul.mubr.msk.f32.vlgmr.msra.gmra.mrb[22].mxu1 %vm775_vm1, %v862_v33 }
 0x372   :  { %4834 = vmatprep.mubr.msk.f32.mxu1 %vm5847_vm2, %v5848_v2  ;;  %5314 = vmatpush3.bf16.msk.msra.mxu1 %vm5313_vm7, %v5312_v34 }
 0x373   :  { %5315 = vmatprep.subr.bf16.mxu1 %v5846_v43 }
 0x375   :  { %4835 = vmatmul.mubr.msk.f32.gmra.mrb[24].mxu1 %vm775_vm1, %v863_v35 }
 0x376   :  { %4841 = vmatprep.mubr.msk.f32.mxu1 %vm5847_vm2, %v5848_v2 }
 0x379   :  { %4842 = vmatmul.mubr.msk.f32.vlgmr.msra.gmra.mrb[26].mxu1 %vm1086_vm8, %v1079_v36 }
 0x37a   :  { %4844 = vmatprep.mubr.msk.f32.mxu1 %vm5847_vm2, %v5848_v2 }
 0x37d   :  { %4845 = vmatmul.mubr.msk.f32.gmra.mrb[28].mxu1 %vm1086_vm8, %v1080_v37  ;;  %v1346_v37 = vpop.permute.xlu1 %1345 }
 0x37e   :  { %4847 = vmatprep.mubr.msk.f32.mxu1 %vm5847_vm2, %v5848_v2  ;;  %v1362_v42 = vmul.f32 %v4305_v14, %v1346_v37 }
 0x381   :  { %4848 = vmatmul.mubr.msk.f32.gmra.mrb[30].mxu1 %vm1086_vm8, %v1081_v38 }
 0x382   :  { %4850 = vmatprep.mubr.msk.f32.mxu1 %vm5847_vm2, %v5848_v2 }
 0x385   :  { %4851 = vmatmul.mubr.msk.f32.gmra.mrb[32].mxu1 %vm1086_vm8, %v1082_v39 }
 0x386   :  { %4853 = vmatprep.mubr.msk.f32.mxu1 %vm5847_vm2, %v5848_v2 }
 0x389   :  { %4854 = vmatmul.mubr.msk.f32.gmra.mrb[34].mxu1 %vm1086_vm8, %v1083_v40 }
 0x38a   :  { %4881 = vmatprep.mubr.msk.f32.mxu1 %vm5847_vm2, %v5848_v2 }
 0x430   :  { %v950_v58 = vpop.f32.mrb[12].mxu1 }
 0x431   :  { %v1056_v59 = vadd.f32 %v1055_v41, %v950_v58  ;;  %v4805_v60 = vpop.f32.mrb[13].mxu1 }
 0x434   :  { %v955_v61 = vpop.f32.mrb[14].mxu1 }
 0x435   :  { %v1061_v62 = vadd.f32 %v1060_v44, %v955_v61  ;;  %v4808_v63 = vpop.f32.mrb[15].mxu1 }
 0x438   :  { %v960_v0 = vpop.f32.mrb[16].mxu1 }
 0x439   :  { %v1066_v1 = vadd.f32 %v1065_v46, %v960_v0  ;;  %v4811_v3 = vpop.f32.mrb[17].mxu1  ;;  %v1351_v46 = vpop.permute.xlu0 %1350 }
 0x43a   :  { %v1363_v51 = vmul.f32 %v4305_v14, %v1351_v46 }
 0x43c   :  { %v965_v4 = vpop.f32.mrb[18].mxu1 }
 0x43d   :  { %v4814_v5 = vpop.f32.mrb[19].mxu1 }
 0x440   :  { %v970_v6 = vpop.f32.mrb[20].mxu1 }
 0x441   :  { %v4817_v7 = vpop.f32.mrb[21].mxu1 }
 0x444   :  { %v1070_v8 = vpop.f32.mrb[22].mxu1 }
 0x445   :  { %v1071_v9 = vadd.f32 %v1070_v8, %v965_v4  ;;  %v4833_v10 = vpop.f32.mrb[23].mxu1 }
 0x448   :  { %v1075_v11 = vpop.f32.mrb[24].mxu1 }
 0x449   :  { %v1076_v12 = vadd.f32 %v1075_v11, %v970_v6  ;;  %v4836_v13 = vpop.f32.mrb[25].mxu1 }
 0x44c   :  { %v1172_v16 = vpop.f32.mrb[26].mxu1 }
 0x44d   :  { %v1196_v18 = vadd.f32 %v1172_v16, %v1056_v59  ;;  %v4843_v19 = vpop.f32.mrb[27].mxu1 }
 0x44e   :  { %v1461_v19 = vld [vmem:[%s7196_s13 + $0x8] sm:$0xff] }
 0x44f   :  { %v1317_v20 = vadd.f32 %v1293_v48, %v1196_v18  ;;  %v1460_v18 = vld [vmem:[%s7196_s13] sm:$0xff] }
 0x450   :  { %v1177_v21 = vpop.f32.mrb[28].mxu1 }
 0x451   :  { %v1197_v22 = vadd.f32 %v1177_v21, %v1061_v62  ;;  %v4846_v23 = vpop.f32.mrb[29].mxu1  ;;  %v1364_v24 = vadd.f32 %v1359_v17, %v1317_v20  ;;  %v5316_v20 = vpack.c.bf16 %v1461_v19, %v1460_v18  ;;  %v1462_v21 = vld [vmem:[%s7196_s13 + $0x10] sm:$0xff]  ;;  %v1691_v18 = vld [vmem:[%s7201_s3] sm:$0xff]  ;;  %v1577_v19 = vld [vmem:[%s7200_s29 + $0x8] sm:$0xff] }
 0x453   :  { %v1318_v28 = vadd.f32 %v1298_v50, %v1197_v22  ;;  %v1371_v29 = vsel %vm576_vm0, %v1364_v24, 0.0  ;;  %5317 = vmatpush3.bf16.msra.mxu1 %v5316_v20  ;;  %v1463_v22 = vld [vmem:[%s7196_s13 + $0x18] sm:$0xff]  ;;  %v1692_v20 = vld [vmem:[%s7201_s3 + $0x8] sm:$0xff] }
 0x454   :  { %1372 = vadd.xlane.f32.xlu1 %v1371_v29  ;;  %v1182_v30 = vpop.f32.mrb[30].mxu1  ;;  %5318 = vmatprep.subr.bf16.mxu1 %v5846_v43  ;;  %v5319_v23 = vpack.c.bf16 %v1463_v22, %v1462_v21  ;;  %v1578_v21 = vld [vmem:[%s7200_s29 + $0x10] sm:$0xff] }
 0x455   :  { %v1198_v32 = vadd.f32 %v1182_v30, %v1066_v1  ;;  %v4849_v33 = vpop.f32.mrb[31].mxu1  ;;  %v1365_v34 = vadd.f32 %v1360_v27, %v1318_v28  ;;  %v1693_v22 = vld [vmem:[%s7201_s3 + $0x10] sm:$0xff] }
 0x457   :  { %v1319_v35 = vadd.f32 %v1303_v52, %v1198_v32  ;;  %v1374_v36 = vsel %vm576_vm0, %v1365_v34, 0.0  ;;  %5320 = vmatpush3.bf16.msra.mxu1 %v5319_v23  ;;  %v1579_v23 = vld [vmem:[%s7200_s29 + $0x18] sm:$0xff] }
 0x458   :  { %1375 = vadd.xlane.f32.xlu0 %v1374_v36  ;;  %v1187_v38 = vpop.f32.mrb[32].mxu1  ;;  %5327 = vmatprep.subr.bf16.mxu1 %v5846_v43  ;;  %v4306_v36 = vld [vmem:[%s7197_s17] ss:$0 sm:$0xff] }
 0x459   :  { %v1199_v39 = vadd.f32 %v1187_v38, %v1071_v9  ;;  %v4852_v40 = vpop.f32.mrb[33].mxu1  ;;  %v1366_v41 = vadd.f32 %v1361_v31, %v1319_v35 }
 0x45a   :  { %v4307_v40 = vld [vmem:[%s7198_s21] ss:$0 sm:$0xff] }
 0x45b   :  { %v1320_v44 = vadd.f32 %v1308_v54, %v1199_v39  ;;  %v1377_v45 = vsel %vm576_vm0, %v1366_v41, 0.0 }
 0x45c   :  { %1378 = vadd.xlane.f32.xlu0 %v1377_v45  ;;  %v1192_v47 = vpop.f32.mrb[34].mxu1 }
 0x45d   :  { %v1200_v48 = vadd.f32 %v1192_v47, %v1076_v12  ;;  %v1367_v49 = vadd.f32 %v1362_v42, %v1320_v44  ;;  %v4855_v50 = vpop.f32.mrb[35].mxu1 }
 0x45f   :  { %v1321_v52 = vadd.f32 %v1313_v56, %v1200_v48  ;;  %v1380_v53 = vsel %vm576_vm0, %v1367_v49, 0.0 }
 0x460   :  { %1381 = vadd.xlane.f32.xlu1 %v1380_v53 }
 0x461   :  { %v1368_v55 = vadd.f32 %v1363_v51, %v1321_v52 }
 0x463   :  { %v1384_v57 = vsel %vm1383_vm9, %v1368_v55, 0.0 }
 0x464   :  { %1385 = vadd.xlane.f32.xlu0 %v1384_v57 }
 0x4e1   :  { %v1373_v58 = vpop.xlane.xlu1 %1372 }
 0x4e2   :  { %v1388_v54 = vmul.f32 0.03125, %v1373_v58 }
 0x4e4   :  { %v1393_v59 = vsub.f32 %v1364_v24, %v1388_v54 }
 0x4e5   :  { %v1376_v60 = vpop.xlane.xlu0 %1375 }
 0x4e6   :  { %v1389_v61 = vmul.f32 0.03125, %v1376_v60  ;;  %v1398_v62 = vmul.f32 %v1393_v59, %v1393_v59 }
 0x4e8   :  { %v1394_v63 = vsub.f32 %v1365_v34, %v1389_v61  ;;  %v1403_v0 = vsel %vm576_vm0, %v1398_v62, 0.0 }
 0x4e9   :  { %v1379_v1 = vpop.xlane.xlu0 %1378  ;;  %1404 = vadd.xlane.f32.xlu1 %v1403_v0 }
 0x4ea   :  { %v1390_v56 = vmul.f32 0.03125, %v1379_v1  ;;  %v1399_v3 = vmul.f32 %v1394_v63, %v1394_v63  ;;  %v4308_v1 = vld [vmem:[%s7199_s25] ss:$0 sm:$0xff] }
 0x4ec   :  { %v1395_v4 = vsub.f32 %v1366_v41, %v1390_v56  ;;  %v1406_v5 = vsel %vm576_vm0, %v1399_v3, 0.0 }
 0x4ed   :  { %v1382_v6 = vpop.xlane.xlu1 %1381  ;;  %1407 = vadd.xlane.f32.xlu0 %v1406_v5 }
 0x4ee   :  { %v1391_v7 = vmul.f32 0.03125, %v1382_v6  ;;  %v1400_v8 = vmul.f32 %v1395_v4, %v1395_v4 }
 0x4f0   :  { %v1396_v9 = vsub.f32 %v1367_v49, %v1391_v7  ;;  %v1409_v10 = vsel %vm576_vm0, %v1400_v8, 0.0 }
 0x4f1   :  { %1410 = vadd.xlane.f32.xlu1 %v1409_v10  ;;  %v1386_v11 = vpop.xlane.xlu0 %1385 }
 0x4f2   :  { %v1392_v12 = vmul.f32 0.03125, %v1386_v11  ;;  %v1401_v13 = vmul.f32 %v1396_v9, %v1396_v9 }
 0x4f4   :  { %v1397_v14 = vsub.f32 %v1368_v55, %v1392_v12  ;;  %v1412_v15 = vsel %vm576_vm0, %v1401_v13, 0.0 }
 0x4f5   :  { %1413 = vadd.xlane.f32.xlu0 %v1412_v15 }
 0x4f6   :  { %v1402_v16 = vmul.f32 %v1397_v14, %v1397_v14 }
 0x4f8   :  { %v1415_v17 = vsel %vm1383_vm9, %v1402_v16, 0.0 }
 0x4f9   :  { %1416 = vadd.xlane.f32.xlu1 %v1415_v17  ;;  %v1576_v17 = vld [vmem:[%s7200_s29] sm:$0xff] }
 0x576   :  { %v1405_v24 = vpop.xlane.xlu1 %1404 }
 0x577   :  { %v1418_v25 = vmul.f32 0.03125, %v1405_v24  ;;  %v1694_v24 = vld [vmem:[%s7201_s3 + $0x18] sm:$0xff] }
 0x579   :  { %v1423_v26 = vadd.f32 1e-05, %v1418_v25  ;;  %v1580_v25 = vld [vmem:[%s7200_s29 + $0x20] sm:$0xf] }
 0x57a   :  { %v1408_v27 = vpop.xlane.xlu0 %1407 }
 0x57b   :  { %5610 = vrsqrt.f32 %v1423_v26  ;;  %v1419_v28 = vmul.f32 0.03125, %v1408_v27  ;;  %v1695_v26 = vld [vmem:[%s7201_s3 + $0x20] sm:$0xf] }
 0x57c   :  { %v1801_v27 = vld [vmem:[%s7202_s19] sm:$0xff] }
 0x57d   :  { %v1424_v29 = vadd.f32 1e-05, %v1419_v28  ;;  %v1802_v28 = vld [vmem:[%s7202_s19 + $0x8] sm:$0xff] }
 0x57e   :  { %v1411_v30 = vpop.xlane.xlu1 %1410 }
 0x57f   :  { %5612 = vrsqrt.f32 %v1424_v29  ;;  %v1420_v31 = vmul.f32 0.03125, %v1411_v30  ;;  %v1803_v29 = vld [vmem:[%s7202_s19 + $0x10] sm:$0xff]  ;;  %v5334_v30 = vpack.c.bf16 %v1802_v28, %v1801_v27 }
 0x581   :  { %v1425_v32 = vadd.f32 1e-05, %v1420_v31  ;;  %v1804_v31 = vld [vmem:[%s7202_s19 + $0x18] sm:$0xff] }
 0x582   :  { %v1414_v33 = vpop.xlane.xlu0 %1413 }
 0x583   :  { %5614 = vrsqrt.f32 %v1425_v32  ;;  %v1421_v34 = vmul.f32 0.03125, %v1414_v33  ;;  %v5337_v32 = vpack.c.bf16 %v1804_v31, %v1803_v29 }
 0x585   :  { %v5611_v35 = vpop.eup %5610  ;;  %v1426_v37 = vadd.f32 1e-05, %v1421_v34 }
 0x586   :  { %v1433_v38 = vmul.f32 %v5611_v35, %v1393_v59  ;;  %v1417_v39 = vpop.xlane.xlu1 %1416 }
 0x587   :  { %5616 = vrsqrt.f32 %v1426_v37  ;;  %v1422_v41 = vmul.f32 0.03125, %v1417_v39 }
 0x588   :  { %v1444_v42 = vmul.f32 %v4306_v36, %v1433_v38 }
 0x589   :  { %v5613_v44 = vpop.eup %5612  ;;  %v1427_v45 = vadd.f32 1e-05, %v1422_v41 }
 0x58a   :  { %v1455_v46 = vadd.f32 %v4307_v40, %v1444_v42  ;;  %v1434_v47 = vmul.f32 %v5613_v44, %v1394_v63 }
 0x58b   :  { %5618 = vrsqrt.f32 %v1427_v45 }
 0x58c   :  { %4882 = vmatmul.mubr.msk.f32.vlgmr.msra.gmra.mrb[36].mxu1 %vm576_vm0, %v1455_v46  ;;  %v1445_v48 = vmul.f32 %v4306_v36, %v1434_v47 }
 0x58d   :  { %v5615_v49 = vpop.eup %5614  ;;  %4884 = vmatprep.mubr.msk.f32.mxu1 %vm5847_vm2, %v5848_v2 }
 0x58e   :  { %v1456_v50 = vadd.f32 %v4307_v40, %v1445_v48  ;;  %v1435_v51 = vmul.f32 %v5615_v49, %v1395_v4 }
 0x590   :  { %4885 = vmatmul.mubr.msk.f32.gmra.mrb[38].mxu1 %vm576_vm0, %v1456_v50  ;;  %v1446_v52 = vmul.f32 %v4306_v36, %v1435_v51 }
 0x591   :  { %v5617_v53 = vpop.eup %5616  ;;  %4887 = vmatprep.mubr.msk.f32.mxu1 %vm5847_vm2, %v5848_v2 }
 0x592   :  { %v1457_v55 = vadd.f32 %v4307_v40, %v1446_v52  ;;  %v1436_v57 = vmul.f32 %v5617_v53, %v1396_v9 }
 0x594   :  { %4888 = vmatmul.mubr.msk.f32.gmra.mrb[40].mxu1 %vm576_vm0, %v1457_v55  ;;  %v1447_v58 = vmul.f32 %v4306_v36, %v1436_v57 }
 0x595   :  { %v5619_v54 = vpop.eup %5618  ;;  %4890 = vmatprep.mubr.msk.f32.mxu1 %vm5847_vm2, %v5848_v2 }
 0x596   :  { %v1458_v59 = vadd.f32 %v4307_v40, %v1447_v58  ;;  %v1437_v60 = vmul.f32 %v5619_v54, %v1397_v14 }
 0x598   :  { %4891 = vmatmul.mubr.msk.f32.gmra.mrb[42].mxu1 %vm576_vm0, %v1458_v59  ;;  %v1448_v61 = vmul.f32 %v4306_v36, %v1437_v60 }
 0x599   :  { %4893 = vmatprep.mubr.msk.f32.mxu1 %vm5847_vm2, %v5848_v2 }
 0x59a   :  { %v1459_v62 = vadd.f32 %v4307_v40, %v1448_v61 }
 0x59c   :  { %4894 = vmatmul.mubr.msk.f32.gmra.mrb[44].mxu1 %vm576_vm0, %v1459_v62 }
 0x59d   :  { %4931 = vmatprep.mubr.msk.f32.mxu1 %vm5847_vm2, %v5848_v2 }
 0x65f   :  { %v1552_v63 = vpop.f32.mrb[36].mxu1 }
 0x660   :  { %v4883_v0 = vpop.f32.mrb[37].mxu1  ;;  %v1553_v3 = vadd.f32 %v4308_v1, %v1552_v63 }
 0x663   :  { %v1557_v56 = vpop.f32.mrb[38].mxu1 }
 0x664   :  { %v1558_v4 = vadd.f32 %v4308_v1, %v1557_v56  ;;  %v4886_v5 = vpop.f32.mrb[39].mxu1 }
 0x666   :  { %v5322_v6 = vpack.c.bf16 %v1558_v4, %v1553_v3 }
 0x667   :  { %v1562_v7 = vpop.f32.mrb[40].mxu1 }
 0x668   :  { %v4889_v8 = vpop.f32.mrb[41].mxu1  ;;  %5323 = vmatpush3.bf16.msra.mxu0 %v5322_v6  ;;  %5329 = vmatpush3.bf16.msra.mxu1 %v5322_v6  ;;  %v1563_v10 = vadd.f32 %v4308_v1, %v1562_v7 }
 0x669   :  { %5324 = vmatprep.subr.bf16.mxu0 %v5846_v43  ;;  %5330 = vmatprep.subr.bf16.mxu1 %v5846_v43 }
 0x66b   :  { %v1567_v9 = vpop.f32.mrb[42].mxu1 }
 0x66c   :  { %v1568_v11 = vadd.f32 %v4308_v1, %v1567_v9  ;;  %v4892_v12 = vpop.f32.mrb[43].mxu1 }
 0x66d   :  { %v2171_v12 = vld [vmem:[%s7203_s12 + $0x8] sm:$0xff] }
 0x66e   :  { %v5325_v13 = vpack.c.bf16 %v1568_v11, %v1563_v10  ;;  %v2170_v11 = vld [vmem:[%s7203_s12] sm:$0xff] }
 0x66f   :  { %v1572_v14 = vpop.f32.mrb[44].mxu1 }
 0x670   :  { %v4895_v15 = vpop.f32.mrb[45].mxu1  ;;  %5326 = vmatpush3.bf16.msra.mxu0 %v5325_v13  ;;  %5332 = vmatpush3.bf16.msra.mxu1 %v5325_v13  ;;  %v1573_v16 = vadd.f32 %v4308_v1, %v1572_v14  ;;  %v5346_v13 = vpack.c.bf16 %v2171_v12, %v2170_v11  ;;  %v2172_v14 = vld [vmem:[%s7203_s12 + $0x10] sm:$0xff] }
 0x671   :  { %4904 = vmatprep.subr.mxu0 %v5848_v2  ;;  %4929 = vmatprep.subr.mxu1 %v5848_v2  ;;  %v2173_v15 = vld [vmem:[%s7203_s12 + $0x18] sm:$0xff] }
 0x674   :  { %4905 = vmatpush3.msk.msra.mxu0 %vm1597_vm10, %v1573_v16  ;;  %4930 = vmatpush3.msk.msra.mxu1 %vm1597_vm10, %v1573_v16  ;;  %v5349_v16 = vpack.c.bf16 %v2173_v15, %v2172_v14 }
 0x675   :  { %4907 = vmatmul.mubr.msk.f32.vlgmr.msra.gmra.mrb[32].mxu0 %vm1581_vm11, %v1576_v17  ;;  %4932 = vmatmul.mubr.msk.f32.vlgmr.msra.gmra.mrb[46].mxu1 %vm1581_vm11, %v1691_v18 }
 0x676   :  { %4909 = vmatprep.mubr.msk.f32.mxu0 %vm5847_vm2, %v5848_v2  ;;  %4934 = vmatprep.mubr.msk.f32.mxu1 %vm5847_vm2, %v5848_v2 }
 0x677   :  { %5333 = vmatprep.subr.bf16.mxu0 %v5846_v43  ;;  %5339 = vmatprep.subr.bf16.mxu1 %v5846_v43 }
 0x678   :  { %5335 = vmatpush3.bf16.msra.mxu0 %v5334_v30  ;;  %5341 = vmatpush3.bf16.msra.mxu1 %v5334_v30 }
 0x679   :  { %4910 = vmatmul.mubr.msk.f32.gmra.mrb[34].mxu0 %vm1581_vm11, %v1577_v19  ;;  %4935 = vmatmul.mubr.msk.f32.gmra.mrb[48].mxu1 %vm1581_vm11, %v1692_v20 }
 0x67a   :  { %4912 = vmatprep.mubr.msk.f32.mxu0 %vm5847_vm2, %v5848_v2  ;;  %4937 = vmatprep.mubr.msk.f32.mxu1 %vm5847_vm2, %v5848_v2 }
 0x67b   :  { %5336 = vmatprep.subr.bf16.mxu0 %v5846_v43  ;;  %5342 = vmatprep.subr.bf16.mxu1 %v5846_v43 }
 0x67c   :  { %5338 = vmatpush3.bf16.msra.mxu0 %v5337_v32  ;;  %5344 = vmatpush3.bf16.msra.mxu1 %v5337_v32 }
 0x67d   :  { %4913 = vmatmul.mubr.msk.f32.gmra.mrb[36].mxu0 %vm1581_vm11, %v1578_v21  ;;  %4938 = vmatmul.mubr.msk.f32.gmra.mrb[50].mxu1 %vm1581_vm11, %v1693_v22 }
 0x67e   :  { %4915 = vmatprep.mubr.msk.f32.mxu0 %vm5847_vm2, %v5848_v2  ;;  %4940 = vmatprep.mubr.msk.f32.mxu1 %vm5847_vm2, %v5848_v2 }
 0x67f   :  { %5345 = vmatprep.subr.bf16.mxu0 %v5846_v43 }
 0x681   :  { %4916 = vmatmul.mubr.msk.f32.gmra.mrb[38].mxu0 %vm1581_vm11, %v1579_v23  ;;  %4941 = vmatmul.mubr.msk.f32.gmra.mrb[52].mxu1 %vm1581_vm11, %v1694_v24 }
 0x682   :  { %4918 = vmatprep.mubr.msk.f32.mxu0 %vm5847_vm2, %v5848_v2  ;;  %4943 = vmatprep.mubr.msk.f32.mxu1 %vm5847_vm2, %v5848_v2 }
 0x685   :  { %4919 = vmatmul.mubr.msk.f32.gmra.mrb[40].mxu0 %vm1581_vm11, %v1580_v25  ;;  %4944 = vmatmul.mubr.msk.f32.gmra.mrb[54].mxu1 %vm1581_vm11, %v1695_v26 }
 0x686   :  { %4954 = vmatprep.mubr.msk.f32.mxu0 %vm5847_vm2, %v5848_v2  ;;  %4977 = vmatprep.mubr.msk.f32.mxu1 %vm5847_vm2, %v5848_v2 }
 0x748   :  { %v1667_v33 = vpop.f32.mrb[32].mxu0  ;;  %v1777_v34 = vpop.f32.mrb[46].mxu1 }
 0x749   :  { %1810 = vrot.lane.b32.xlu0 %v1667_v33, %s5851_s24  ;;  %1945 = vrot.lane.b32.xlu1 %v1777_v34, %s5851_s24  ;;  %v4908_v35 = vpop.f32.mrb[33].mxu0  ;;  %v4933_v36 = vpop.f32.mrb[47].mxu1 }
 0x74c   :  { %v1672_v37 = vpop.f32.mrb[34].mxu0  ;;  %v1782_v38 = vpop.f32.mrb[48].mxu1 }
 0x74d   :  { %1812 = vrot.lane.b32.xlu1 %v1672_v37, %s5851_s24  ;;  %1947 = vrot.lane.b32.xlu0 %v1782_v38, %s5851_s24  ;;  %v4911_v39 = vpop.f32.mrb[35].mxu0  ;;  %v4936_v40 = vpop.f32.mrb[49].mxu1 }
 0x750   :  { %v1677_v41 = vpop.f32.mrb[36].mxu0  ;;  %v1787_v42 = vpop.f32.mrb[50].mxu1 }
 0x751   :  { %1814 = vrot.lane.b32.xlu1 %v1677_v41, %s5851_s24  ;;  %1949 = vrot.lane.b32.xlu0 %v1787_v42, %s5851_s24  ;;  %v4914_v44 = vpop.f32.mrb[37].mxu0  ;;  %v4939_v45 = vpop.f32.mrb[51].mxu1 }
 0x754   :  { %v1682_v46 = vpop.f32.mrb[38].mxu0  ;;  %v1792_v47 = vpop.f32.mrb[52].mxu1 }
 0x755   :  { %1816 = vrot.lane.b32.xlu1 %v1682_v46, %s5851_s24  ;;  %1951 = vrot.lane.b32.xlu0 %v1792_v47, %s5851_s24  ;;  %v4917_v48 = vpop.f32.mrb[39].mxu0  ;;  %v4942_v49 = vpop.f32.mrb[53].mxu1 }
 0x758   :  { %v1687_v50 = vpop.f32.mrb[40].mxu0  ;;  %v1797_v51 = vpop.f32.mrb[54].mxu1 }
 0x759   :  { %1818 = vrot.lane.b32.xlu1 %v1687_v50, %s5851_s24  ;;  %1953 = vrot.lane.b32.xlu0 %v1797_v51, %s5851_s24  ;;  %v4920_v52 = vpop.f32.mrb[41].mxu0  ;;  %v4945_v53 = vpop.f32.mrb[55].mxu1 }
 0x75d   :  { %2110 = vrot.lane.b32.xlu1 %v1667_v33, %s5852_s30  ;;  %2130 = vrot.lane.b32.xlu0 %v1777_v34, %s5852_s30 }
 0x761   :  { %2112 = vrot.lane.b32.xlu1 %v1672_v37, %s5852_s30  ;;  %2132 = vrot.lane.b32.xlu0 %v1782_v38, %s5852_s30 }
 0x765   :  { %2114 = vrot.lane.b32.xlu1 %v1677_v41, %s5852_s30  ;;  %2134 = vrot.lane.b32.xlu0 %v1787_v42, %s5852_s30 }
 0x769   :  { %2116 = vrot.lane.b32.xlu1 %v1682_v46, %s5852_s30  ;;  %2136 = vrot.lane.b32.xlu0 %v1792_v47, %s5852_s30 }
 0x76d   :  { %2118 = vrot.lane.b32.xlu1 %v1687_v50, %s5852_s30  ;;  %2138 = vrot.lane.b32.xlu0 %v1797_v51, %s5852_s30 }
 0x7bb   :  { %v1811_v55 = vpop.permute.xlu0 %1810  ;;  %v1946_v57 = vpop.permute.xlu1 %1945 }
 0x7bc   :  { %v1825_v58 = vmul.f32 %v1811_v55, %v1667_v33  ;;  %v1960_v54 = vmul.f32 %v1946_v57, %v1667_v33 }
 0x7be   :  { %4955 = vmatmul.mubr.msk.f32.vlgmr.msra.gmra.mrb[42].mxu0 %vm576_vm0, %v1825_v58  ;;  %4978 = vmatmul.mubr.msk.f32.vlgmr.msra.gmra.mrb[56].mxu1 %vm576_vm0, %v1960_v54 }
 0x7bf   :  { %v1813_v59 = vpop.permute.xlu1 %1812  ;;  %v1948_v60 = vpop.permute.xlu0 %1947  ;;  %4957 = vmatprep.mubr.msk.f32.mxu0 %vm5847_vm2, %v5848_v2  ;;  %4980 = vmatprep.mubr.msk.f32.mxu1 %vm5847_vm2, %v5848_v2 }
 0x7c0   :  { %v1826_v61 = vmul.f32 %v1813_v59, %v1672_v37  ;;  %v1961_v62 = vmul.f32 %v1948_v60, %v1672_v37  ;;  %5347 = vmatpush3.bf16.msra.mxu0 %v5346_v13 }
 0x7c1   :  { %5348 = vmatprep.subr.bf16.mxu0 %v5846_v43 }
 0x7c2   :  { %4958 = vmatmul.mubr.msk.f32.gmra.mrb[44].mxu0 %vm576_vm0, %v1826_v61  ;;  %4981 = vmatmul.mubr.msk.f32.gmra.mrb[58].mxu1 %vm576_vm0, %v1961_v62 }
 0x7c3   :  { %v1815_v63 = vpop.permute.xlu1 %1814  ;;  %v1950_v0 = vpop.permute.xlu0 %1949  ;;  %4960 = vmatprep.mubr.msk.f32.mxu0 %vm5847_vm2, %v5848_v2  ;;  %4983 = vmatprep.mubr.msk.f32.mxu1 %vm5847_vm2, %v5848_v2 }
 0x7c4   :  { %v1827_v1 = vmul.f32 %v1815_v63, %v1677_v41  ;;  %v1962_v56 = vmul.f32 %v1950_v0, %v1677_v41  ;;  %5350 = vmatpush3.bf16.msra.mxu0 %v5349_v16 }
 0x7c6   :  { %4961 = vmatmul.mubr.msk.f32.gmra.mrb[46].mxu0 %vm576_vm0, %v1827_v1  ;;  %4984 = vmatmul.mubr.msk.f32.gmra.mrb[60].mxu1 %vm576_vm0, %v1962_v56 }
 0x7c7   :  { %v1817_v3 = vpop.permute.xlu1 %1816  ;;  %v1952_v4 = vpop.permute.xlu0 %1951  ;;  %4963 = vmatprep.mubr.msk.f32.mxu0 %vm5847_vm2, %v5848_v2  ;;  %4986 = vmatprep.mubr.msk.f32.mxu1 %vm5847_vm2, %v5848_v2 }
 0x7c8   :  { %v1828_v5 = vmul.f32 %v1817_v3, %v1682_v46  ;;  %v1963_v6 = vmul.f32 %v1952_v4, %v1682_v46 }
 0x7ca   :  { %4964 = vmatmul.mubr.msk.f32.gmra.mrb[48].mxu0 %vm576_vm0, %v1828_v5  ;;  %4987 = vmatmul.mubr.msk.f32.gmra.mrb[62].mxu1 %vm576_vm0, %v1963_v6 }
 0x7cb   :  { %v1819_v7 = vpop.permute.xlu1 %1818  ;;  %v1954_v8 = vpop.permute.xlu0 %1953  ;;  %4966 = vmatprep.mubr.msk.f32.mxu0 %vm5847_vm2, %v5848_v2  ;;  %4989 = vmatprep.mubr.msk.f32.mxu1 %vm5847_vm2, %v5848_v2 }
 0x7cc   :  { %v1829_v9 = vmul.f32 %v1819_v7, %v1687_v50  ;;  %v1964_v10 = vmul.f32 %v1954_v8, %v1687_v50 }
 0x7ce   :  { %4967 = vmatmul.mubr.msk.f32.gmra.mrb[50].mxu0 %vm576_vm0, %v1829_v9  ;;  %4990 = vmatmul.mubr.msk.f32.gmra.mrb[64].mxu1 %vm576_vm0, %v1964_v10 }
 0x7cf   :  { %5000 = vmatprep.mubr.msk.f32.mxu0 %vm5847_vm2, %v5848_v2  ;;  %v2111_v43 = vpop.permute.xlu1 %2110  ;;  %v2131_v44 = vpop.permute.xlu0 %2130 }
 0x7d3   :  { %v2113_v58 = vpop.permute.xlu1 %2112  ;;  %v2133_v5 = vpop.permute.xlu0 %2132 }
 0x891   :  { %v1911_v17 = vpop.f32.mrb[42].mxu0  ;;  %v2046_v18 = vpop.f32.mrb[56].mxu1 }
 0x892   :  { %v1935_v19 = vmul.f32 0.5, %v1911_v17  ;;  %v2070_v20 = vmul.f32 0.5, %v2046_v18  ;;  %v4956_v21 = vpop.f32.mrb[43].mxu0  ;;  %v4979_v22 = vpop.f32.mrb[57].mxu1 }
 0x893   :  { %v2115_v17 = vpop.permute.xlu1 %2114  ;;  %v2135_v21 = vpop.permute.xlu0 %2134 }
 0x894   :  { %v2075_v23 = vmax.f32 %v1935_v19, %v2070_v20 }
 0x895   :  { %v1916_v24 = vpop.f32.mrb[44].mxu0  ;;  %v2051_v25 = vpop.f32.mrb[58].mxu1 }
 0x896   :  { %v2080_v26 = vsub.f32 %v1935_v19, %v2075_v23  ;;  %v2095_v27 = vsub.f32 %v2070_v20, %v2075_v23  ;;  %v1936_v28 = vmul.f32 0.5, %v1916_v24  ;;  %v2071_v29 = vmul.f32 0.5, %v2051_v25  ;;  %v4959_v30 = vpop.f32.mrb[45].mxu0  ;;  %v4982_v31 = vpop.f32.mrb[59].mxu1 }
 0x897   :  { %v2137_v31 = vpop.permute.xlu0 %2136 }
 0x898   :  { %v2085_v32 = vmul.f32 1.442695, %v2080_v26  ;;  %v2100_v33 = vmul.f32 1.442695, %v2095_v27  ;;  %v2076_v34 = vmax.f32 %v1936_v28, %v2071_v29 }
 0x899   :  { %v1921_v35 = vpop.f32.mrb[46].mxu0  ;;  %v2056_v36 = vpop.f32.mrb[60].mxu1 }
 0x89a   :  { %5620 = vpow2.f32 %v2085_v32  ;;  %v2081_v37 = vsub.f32 %v1936_v28, %v2076_v34  ;;  %v2096_v38 = vsub.f32 %v2071_v29, %v2076_v34  ;;  %v1937_v39 = vmul.f32 0.5, %v1921_v35  ;;  %v4962_v40 = vpop.f32.mrb[47].mxu0  ;;  %v4985_v41 = vpop.f32.mrb[61].mxu1 }
 0x89b   :  { %5622 = vpow2.f32 %v2100_v33  ;;  %v2072_v42 = vmul.f32 0.5, %v2056_v36  ;;  %v2117_v29 = vpop.permute.xlu1 %2116 }
 0x89c   :  { %v2087_v45 = vmul.f32 1.442695, %v2081_v37  ;;  %v2102_v46 = vmul.f32 1.442695, %v2096_v38 }
 0x89d   :  { %v2077_v47 = vmax.f32 %v1937_v39, %v2072_v42  ;;  %v1926_v48 = vpop.f32.mrb[48].mxu0  ;;  %v2061_v49 = vpop.f32.mrb[62].mxu1 }
 0x89e   :  { %5624 = vpow2.f32 %v2087_v45  ;;  %v1938_v50 = vmul.f32 0.5, %v1926_v48  ;;  %v2073_v51 = vmul.f32 0.5, %v2061_v49  ;;  %v4965_v52 = vpop.f32.mrb[49].mxu0  ;;  %v4988_v53 = vpop.f32.mrb[63].mxu1 }
 0x89f   :  { %5626 = vpow2.f32 %v2102_v46  ;;  %v2082_v55 = vsub.f32 %v1937_v39, %v2077_v47  ;;  %v2097_v57 = vsub.f32 %v2072_v42, %v2077_v47  ;;  %v2119_v42 = vpop.permute.xlu1 %2118  ;;  %v2139_v46 = vpop.permute.xlu0 %2138 }
 0x8a0   :  { %v2078_v54 = vmax.f32 %v1938_v50, %v2073_v51 }
 0x8a1   :  { %v2089_v59 = vmul.f32 1.442695, %v2082_v55  ;;  %v2104_v60 = vmul.f32 1.442695, %v2097_v57  ;;  %v1931_v61 = vpop.f32.mrb[50].mxu0  ;;  %v2066_v62 = vpop.f32.mrb[64].mxu1 }
 0x8a2   :  { %v2083_v63 = vsub.f32 %v1938_v50, %v2078_v54  ;;  %v2098_v0 = vsub.f32 %v2073_v51, %v2078_v54  ;;  %v1939_v1 = vmul.f32 0.5, %v1931_v61  ;;  %v2074_v56 = vmul.f32 0.5, %v2066_v62  ;;  %v4968_v3 = vpop.f32.mrb[51].mxu0  ;;  %v4991_v4 = vpop.f32.mrb[65].mxu1 }
 0x8a3   :  { %5628 = vpow2.f32 %v2089_v59 }
 0x8a4   :  { %v5621_v6 = vpop.eup %5620  ;;  %5630 = vpow2.f32 %v2104_v60  ;;  %v2091_v7 = vmul.f32 1.442695, %v2083_v63  ;;  %v2106_v8 = vmul.f32 1.442695, %v2098_v0  ;;  %v2079_v9 = vmax.f32 %v1939_v1, %v2074_v56  ;;  %v4336_v60 = vld [vmem:[#allocation2] ss:$0 sm:$0xff] }
 0x8a5   :  { %v5623_v10 = vpop.eup %5622  ;;  %v2125_v11 = vmul.f32 %v5621_v6, %v2111_v43 }
 0x8a6   :  { %v2145_v12 = vmul.f32 %v5623_v10, %v2131_v44  ;;  %v2155_v13 = vadd.f32 %v5623_v10, %v5621_v6  ;;  %5632 = vpow2.f32 %v2091_v7  ;;  %v2084_v14 = vsub.f32 %v1939_v1, %v2079_v9 }
 0x8a7   :  { %5634 = vpow2.f32 %v2106_v8  ;;  %v2099_v15 = vsub.f32 %v2074_v56, %v2079_v9 }
 0x8a8   :  { %v5625_v16 = vpop.eup %5624  ;;  %v2150_v18 = vadd.f32 %v2145_v12, %v2125_v11  ;;  %5636 = vrcp.f32 %v2155_v13  ;;  %v2093_v19 = vmul.f32 1.442695, %v2084_v14 }
 0x8a9   :  { %v5627_v20 = vpop.eup %5626  ;;  %v2108_v22 = vmul.f32 1.442695, %v2099_v15  ;;  %v2126_v23 = vmul.f32 %v5625_v16, %v2113_v58 }
 0x8aa   :  { %v2156_v24 = vadd.f32 %v5627_v20, %v5625_v16  ;;  %5638 = vpow2.f32 %v2093_v19  ;;  %v2146_v25 = vmul.f32 %v5627_v20, %v2133_v5 }
 0x8ab   :  { %5640 = vpow2.f32 %v2108_v22 }
 0x8ac   :  { %5642 = vrcp.f32 %v2156_v24  ;;  %v2151_v26 = vadd.f32 %v2146_v25, %v2126_v23 }
 0x8ad   :  { %v5629_v27 = vpop.eup %5628 }
 0x8ae   :  { %v5631_v28 = vpop.eup %5630  ;;  %v2127_v30 = vmul.f32 %v5629_v27, %v2115_v17 }
 0x8af   :  { %v2157_v43 = vadd.f32 %v5631_v28, %v5629_v27  ;;  %v2147_v32 = vmul.f32 %v5631_v28, %v2135_v21 }
 0x8b0   :  { %v5633_v33 = vpop.eup %5632 }
 0x8b1   :  { %v5635_v34 = vpop.eup %5634  ;;  %5644 = vrcp.f32 %v2157_v43  ;;  %v2152_v35 = vadd.f32 %v2147_v32, %v2127_v30  ;;  %v2128_v36 = vmul.f32 %v5633_v33, %v2117_v29 }
 0x8b2   :  { %v5637_v37 = vpop.eup %5636  ;;  %v2158_v38 = vadd.f32 %v5635_v34, %v5633_v33  ;;  %v2148_v39 = vmul.f32 %v5635_v34, %v2137_v31 }
 0x8b3   :  { %v2161_v40 = vmul.f32 %v5637_v37, %v2150_v18 }
 0x8b4   :  { %v5639_v41 = vpop.eup %5638  ;;  %5646 = vrcp.f32 %v2158_v38  ;;  %v2153_v44 = vadd.f32 %v2148_v39, %v2128_v36 }
 0x8b5   :  { %v5641_v45 = vpop.eup %5640  ;;  %5001 = vmatmul.mubr.msk.f32.vlgmr.msra.gmra.mrb[52].mxu0 %vm576_vm0, %v2161_v40  ;;  %v2129_v47 = vmul.f32 %v5639_v41, %v2119_v42 }
 0x8b6   :  { %v5643_v48 = vpop.eup %5642  ;;  %v2159_v49 = vadd.f32 %v5641_v45, %v5639_v41  ;;  %5003 = vmatprep.mubr.msk.f32.mxu0 %vm5847_vm2, %v5848_v2  ;;  %v2149_v50 = vmul.f32 %v5641_v45, %v2139_v46 }
 0x8b7   :  { %v2163_v51 = vmul.f32 %v5643_v48, %v2151_v26 }
 0x8b8   :  { %5648 = vrcp.f32 %v2159_v49  ;;  %v2154_v52 = vadd.f32 %v2149_v50, %v2129_v47 }
 0x8b9   :  { %5004 = vmatmul.mubr.msk.f32.gmra.mrb[54].mxu0 %vm576_vm0, %v2163_v51 }
 0x8ba   :  { %5006 = vmatprep.mubr.msk.f32.mxu0 %vm5847_vm2, %v5848_v2 }
 0x8bb   :  { %v5645_v53 = vpop.eup %5644 }
 0x8bc   :  { %v2165_v55 = vmul.f32 %v5645_v53, %v2152_v35 }
 0x8be   :  { %v5647_v57 = vpop.eup %5646  ;;  %5007 = vmatmul.mubr.msk.f32.gmra.mrb[56].mxu0 %vm576_vm0, %v2165_v55 }
 0x8bf   :  { %5009 = vmatprep.mubr.msk.f32.mxu0 %vm5847_vm2, %v5848_v2  ;;  %v2167_v58 = vmul.f32 %v5647_v57, %v2153_v44 }
 0x8c2   :  { %v5649_v54 = vpop.eup %5648  ;;  %5010 = vmatmul.mubr.msk.f32.gmra.mrb[58].mxu0 %vm576_vm0, %v2167_v58 }
 0x8c3   :  { %5012 = vmatprep.mubr.msk.f32.mxu0 %vm5847_vm2, %v5848_v2  ;;  %v2169_v59 = vmul.f32 %v5649_v54, %v2154_v52 }
 0x8c6   :  { %5013 = vmatmul.mubr.msk.f32.gmra.mrb[60].mxu0 %vm576_vm0, %v2169_v59 }
 0x988   :  { %v2262_v61 = vpop.f32.mrb[52].mxu0 }
 0x989   :  { %v2263_v62 = vadd.f32 %v4336_v60, %v2262_v61   ;;  %v5002_v63 = vpop.f32.mrb[53].mxu0 }
 0x98c   :  { %v2267_v0 = vpop.f32.mrb[54].mxu0 }
 0x98d   :  { %v2268_v1 = vadd.f32 %v4336_v60, %v2267_v0   ;;  %v5005_v56 = vpop.f32.mrb[55].mxu0 }
 0x991   :  { %v2272_v3 = vpop.f32.mrb[56].mxu0 }
 0x992   :  { %v2273_v4 = vadd.f32 %v4336_v60, %v2272_v3   ;;  %v5008_v5 = vpop.f32.mrb[57].mxu0 }
 0x995   :  { %v2277_v6 = vpop.f32.mrb[58].mxu0 }
 0x996   :  { %v2278_v7 = vadd.f32 %v4336_v60, %v2277_v6   ;;  %v5011_v8 = vpop.f32.mrb[59].mxu0 }
 0x999   :  { %v2282_v9 = vpop.f32.mrb[60].mxu0 }
 0x99a   :  { %v2283_v10 = vadd.f32 %v4336_v60, %v2282_v9   ;;  %v5014_v11 = vpop.f32.mrb[61].mxu0 }
 0x99b LB: > { %v2301_v2 = vsel %vm576_vm0, %v5797_v62, 0.0  ;;  %v2307_v12 = vsel %vm576_vm0, %v5789_v4, 0.0  ;;  %v2304_v13 = vsel %vm576_vm0, %v5793_v1, 0.0  ;;  %v2310_v14 = vsel %vm576_vm0, %v5785_v7, 0.0  ;;  %s7204_s4 = sld [smem:[#allocation18_spill]]  ;;  %s6541_s26 = sshll.u32 %s5801_s20, 5  ;;  %vm6663_vm13 = vmpackc.low %vm576_vm0, %vm576_vm0  ;;  %s5801_s20 = sphi %s6480_s20, %s2291_s20   ;;  %v5797_v62 = vphi %v2263_v62, %v7226_v62   ;;  %v5793_v1 = vphi %v2268_v1, %v7225_v1   ;;  %v5789_v4 = vphi %v2273_v4, %v7224_v4   ;;  %v5785_v7 = vphi %v2278_v7, %v7223_v7   ;;  %v5781_v10 = vphi %v2283_v10, %v7222_v10  }
 0x99c   : > { %2302 = vadd.xlane.f32.xlu0 %v2301_v2  ;;  %2308 = vadd.xlane.f32.xlu1 %v2307_v12  ;;  %v2313_v15 = vsel %vm1383_vm9, %v5781_v10, 0.0  ;;  %v5853_v46 = vmov 0.0|0.0   ;;  %vm5854_vm12 = vmmov 0   ;;  %v5855_v47 = vmov 0.0   ;;  %s7205_s1 = sld [smem:[#allocation16_spill]]  ;;  %s7206_s2 = sld [smem:[#allocation17_spill]] }
 0x99d   : > { %5351 = vmatprep.subr.bf16.mxu0 %v5853_v46  ;;  %5023 = vmatprep.mubr.msk.f32.mxu0 %vm5854_vm12, %v5855_v47  ;;  %s7207_s11 = sld [smem:[#allocation19_spill]]  ;;  %s7208_s15 = sld [smem:[#allocation28_spill]]  ;;  %vm3186_vm14 = vcmask 125952   ;;  %vm3357_vm15 = vcmask 31744   ;;  %vm3982_vm2 = vcmask 523264  }
 0x99e   : > { %s5856_s18 = smov 96   ;;  %s5857_s22 = smov 64  }
 0x99f   : > { %s7209_s23 = sld [smem:[#allocation29_spill]]  ;;  %s7212_s0 = sld [smem:[#allocation20_spill]] }
 0x9a0   : > { %2305 = vadd.xlane.f32.xlu0 %v2304_v13  ;;  %2311 = vadd.xlane.f32.xlu1 %v2310_v14  ;;  %s7213_s9 = sld [smem:[#allocation21_spill]]  ;;  %s7214_s17 = sld [smem:[#allocation24_spill]] }
 0x9a1   : > { %s2389_s28 = scalar_lea.vmem %s7204_s4, %s6541_s26  ;;  %s7215_s25 = sld [smem:[#allocation22_spill]] }
 0x9a2   : > { %v2390_v40 = vld [vmem:[%s2389_s28] sm:$0xff]  ;;  %v2391_v41 = vld [vmem:[%s2389_s28 + $0x8] sm:$0xff]  ;;  %v2392_v44 = vld [vmem:[%s2389_s28 + $0x10] sm:$0xff]  ;;  %s2297_s7 = scalar_lea.vmem %s7205_s1, %s5801_s20  ;;  %s2299_s10 = scalar_lea.vmem %s7206_s2, %s5801_s20 }
 0x9a3   : > { %v5352_v42 = vpack.c.bf16 %v2391_v41, %v2390_v40  ;;  %v2393_v45 = vld [vmem:[%s2389_s28 + $0x18] sm:$0xff]  ;;  %v4342_v5 = vld [vmem:[%s2297_s7] ss:$0 sm:$0xff]  ;;  %s2394_s16 = scalar_lea.vmem %s7207_s11, %s5801_s20  ;;  %s7216_s29 = sld [smem:[#allocation23_spill]] }
 0x9a4   : > { %2314 = vadd.xlane.f32.xlu0 %v2313_v15  ;;  %v5355_v48 = vpack.c.bf16 %v2393_v45, %v2392_v44  ;;  %v4343_v8 = vld [vmem:[%s2299_s10] ss:$0 sm:$0xff]  ;;  %s7217_s30 = sld [smem:[#allocation26_spill]]  ;;  %s4443_s12 = sshll.u32 %s5801_s20, 6 }
 0x9a5   : > { %5353 = vmatpush3.bf16.msra.mxu0 %v5352_v42  ;;  %s3587_s5 = scalar_lea.vmem %s7212_s0, %s6541_s26  ;;  %s7219_s1 = sld [smem:[#allocation27_spill]] }
 0x9a6   : > { %5354 = vmatprep.subr.bf16.mxu0 %v5853_v46  ;;  %s3592_s13 = scalar_lea.vmem %s7213_s9, %s5801_s20  ;;  %s3801_s21 = scalar_lea.vmem %s7214_s17, %s6541_s26 }
 0x9a7   : > { %s3710_s3 = scalar_lea.vmem %s7215_s25, %s5801_s20  ;;  %s7218_s26 = sld [smem:[#allocation25_spill]] }
 0x9a8   : > { %p4450_p8 = scmp.ne.s32.totalorder %s5801_s20, 3 }
 0x9a9   : > { %5356 = vmatpush3.bf16.msra.mxu0 %v5355_v48  ;;  %s3712_s19 = scalar_lea.vmem %s7216_s29, %s5801_s20 }
 0x9aa   : > { %s3965_s4 = scalar_lea.vmem %s7217_s30, %s4443_s12 }
 0x9ab   : > { %s3974_s2 = scalar_lea.vmem %s7219_s1, %s5801_s20 }
 0x9ad   : > { %s3806_s28 = scalar_lea.vmem %s7218_s26, %s5801_s20 }
 0xa29   : > { %v2303_v16 = vpop.xlane.xlu0 %2302  ;;  %v2309_v17 = vpop.xlane.xlu1 %2308 }
 0xa2a   : > { %v2316_v18 = vmul.f32 0.03125, %v2303_v16  ;;  %v2318_v19 = vmul.f32 0.03125, %v2309_v17 }
 0xa2c   : > { %v6511_v20 = vsub.f32 %v5797_v62, %v2316_v18  ;;  %v6514_v21 = vsub.f32 %v5789_v4, %v2318_v19 }
 0xa2d   : > { %v2306_v22 = vpop.xlane.xlu0 %2305  ;;  %v2312_v23 = vpop.xlane.xlu1 %2311 }
 0xa2e   : > { %v2317_v24 = vmul.f32 0.03125, %v2306_v22  ;;  %v2326_v25 = vmul.f32 %v6511_v20, %v6511_v20  ;;  %v2319_v26 = vmul.f32 0.03125, %v2312_v23  ;;  %v2328_v27 = vmul.f32 %v6514_v21, %v6514_v21 }
 0xa30   : > { %v6521_v28 = vsub.f32 %v5793_v1, %v2317_v24  ;;  %v2331_v29 = vsel %vm576_vm0, %v2326_v25, 0.0  ;;  %v6525_v30 = vsub.f32 %v5785_v7, %v2319_v26  ;;  %v2337_v32 = vsel %vm576_vm0, %v2328_v27, 0.0 }
 0xa31   : > { %2332 = vadd.xlane.f32.xlu1 %v2331_v29  ;;  %v2315_v31 = vpop.xlane.xlu0 %2314  ;;  %v4345_v29 = vld [vmem:[%s2394_s16] ss:$0 sm:$0xff] }
 0xa32   : > { %v2320_v43 = vmul.f32 0.03125, %v2315_v31  ;;  %v2327_v33 = vmul.f32 %v6521_v28, %v6521_v28  ;;  %v2329_v34 = vmul.f32 %v6525_v30, %v6525_v30 }
 0xa34   : > { %v6533_v35 = vsub.f32 %v5781_v10, %v2320_v43  ;;  %v2334_v36 = vsel %vm576_vm0, %v2327_v33, 0.0  ;;  %v2340_v37 = vsel %vm576_vm0, %v2329_v34, 0.0 }
 0xa35   : > { %2338 = vadd.xlane.f32.xlu1 %v2337_v32  ;;  %2335 = vadd.xlane.f32.xlu0 %v2334_v36 }
 0xa36   : > { %v2330_v38 = vmul.f32 %v6533_v35, %v6533_v35 }
 0xa38   : > { %v2343_v39 = vsel %vm1383_vm9, %v2330_v38, 0.0 }
 0xa39   : > { %2341 = vadd.xlane.f32.xlu0 %v2340_v37  ;;  %2344 = vadd.xlane.f32.xlu1 %v2343_v39  ;;  %v2507_v37 = vld [vmem:[%s7208_s15] sm:$0xff] }
 0xa3a   : > { %5048 = vmatprep.mubr.msk.f32.mxu1 %vm1581_vm11, %v2507_v37 }
 0xabe   : > { %v2333_v49 = vpop.xlane.xlu1 %2332 }
 0xabf   : > { %v2346_v50 = vmul.f32 0.03125, %v2333_v49 }
 0xac1   : > { %v2351_v51 = vadd.f32 1e-06, %v2346_v50 }
 0xac2   : > { %v2339_v52 = vpop.xlane.xlu1 %2338  ;;  %v2336_v53 = vpop.xlane.xlu0 %2335 }
 0xac3   : > { %5671 = vrsqrt.f32 %v2351_v51  ;;  %v2348_v55 = vmul.f32 0.03125, %v2339_v52  ;;  %v2347_v57 = vmul.f32 0.03125, %v2336_v53 }
 0xac5   : > { %v2353_v58 = vadd.f32 1e-06, %v2348_v55  ;;  %v2352_v54 = vadd.f32 1e-06, %v2347_v57 }
 0xac6   : > { %v2345_v59 = vpop.xlane.xlu1 %2344  ;;  %v2342_v60 = vpop.xlane.xlu0 %2341 }
 0xac7   : > { %5673 = vrsqrt.f32 %v2353_v58  ;;  %v2350_v61 = vmul.f32 0.03125, %v2345_v59  ;;  %v2349_v63 = vmul.f32 0.03125, %v2342_v60  ;;  %v2508_v60 = vld [vmem:[%s7208_s15 + $0x8] sm:$0xff] }
 0xac8   : > { %5675 = vrsqrt.f32 %v2352_v54 }
 0xac9   : > { %v2354_v0 = vadd.f32 1e-06, %v2349_v63  ;;  %v2355_v56 = vadd.f32 1e-06, %v2350_v61 }
 0xacb   : > { %5677 = vrsqrt.f32 %v2354_v0 }
 0xacc   : > { %5679 = vrsqrt.f32 %v2355_v56 }
 0xacd   : > { %v5672_v3 = vpop.eup %5671 }
 0xace   : > { %v2361_v6 = vmul.f32 %v5672_v3, %v6511_v20  ;;  %v2509_v3 = vld [vmem:[%s7208_s15 + $0x10] sm:$0xff] }
 0xad0   : > { %v2372_v9 = vmul.f32 %v4342_v5, %v2361_v6  ;;  %v2510_v6 = vld [vmem:[%s7208_s15 + $0x18] sm:$0xff] }
 0xad1   : > { %v5674_v11 = vpop.eup %5673 }
 0xad2   : > { %v5676_v2 = vpop.eup %5675  ;;  %v2383_v12 = vadd.f32 %v4343_v8, %v2372_v9  ;;  %v2363_v14 = vmul.f32 %v5674_v11, %v6514_v21  ;;  %v2511_v9 = vld [vmem:[%s7208_s15 + $0x20] sm:$0xff]  ;;  %v2512_v11 = vld [vmem:[%s7208_s15 + $0x28] sm:$0xff] }
 0xad3   : > { %v2362_v13 = vmul.f32 %v5676_v2, %v6521_v28  ;;  %v2513_v2 = vld [vmem:[%s7208_s15 + $0x30] sm:$0xff] }
 0xad4   : > { %5024 = vmatmul.mubr.msk.f32.vlgmr.msra.gmra.mrb[0].mxu0 %vm576_vm0, %v2383_v12  ;;  %v2374_v18 = vmul.f32 %v4342_v5, %v2363_v14  ;;  %v2515_v14 = vld [vmem:[%s7208_s15 + $0x40] sm:$0xff] }
 0xad5   : > { %5026 = vmatprep.mubr.msk.f32.mxu0 %vm5854_vm12, %v5855_v47  ;;  %v2373_v15 = vmul.f32 %v4342_v5, %v2362_v13  ;;  %v5678_v16 = vpop.eup %5677  ;;  %v2514_v13 = vld [vmem:[%s7208_s15 + $0x38] sm:$0xff] }
 0xad6   : > { %v2364_v19 = vmul.f32 %v5678_v16, %v6525_v30  ;;  %v5680_v20 = vpop.eup %5679  ;;  %v2385_v21 = vadd.f32 %v4343_v8, %v2374_v18  ;;  %v2517_v16 = vld [vmem:[%s7208_s15 + $0x50] sm:$0xff]  ;;  %v2519_v18 = vld [vmem:[%s7208_s15 + $0x60] sm:$0xff] }
 0xad7   : > { %v2384_v17 = vadd.f32 %v4343_v8, %v2373_v15  ;;  %v2365_v23 = vmul.f32 %v5680_v20, %v6533_v35  ;;  %v2516_v15 = vld [vmem:[%s7208_s15 + $0x48] sm:$0xff]  ;;  %v2521_v20 = vld [vmem:[%s7208_s15 + $0x70] sm:$0xff] }
 0xad8   : > { %v2375_v22 = vmul.f32 %v4342_v5, %v2364_v19  ;;  %v2520_v19 = vld [vmem:[%s7208_s15 + $0x68] sm:$0xff] }
 0xad9   : > { %5027 = vmatmul.mubr.msk.f32.gmra.mrb[2].mxu0 %vm576_vm0, %v2384_v17  ;;  %v2376_v25 = vmul.f32 %v4342_v5, %v2365_v23  ;;  %v2518_v17 = vld [vmem:[%s7208_s15 + $0x58] sm:$0xff]  ;;  %v2524_v23 = vld [vmem:[%s7208_s15 + $0x88] sm:$0xff] }
 0xada   : > { %5029 = vmatprep.mubr.msk.f32.mxu0 %vm5854_vm12, %v5855_v47  ;;  %v2386_v24 = vadd.f32 %v4343_v8, %v2375_v22  ;;  %v2523_v22 = vld [vmem:[%s7208_s15 + $0x80] sm:$0xff] }
 0xadb   : > { %v2387_v26 = vadd.f32 %v4343_v8, %v2376_v25  ;;  %v6654_v25 = vld [vmem:[%s7209_s23] sm:$0xff] }
 0xadd   : > { %5030 = vmatmul.mubr.msk.f32.gmra.mrb[4].mxu0 %vm576_vm0, %v2385_v21  ;;  %v2522_v21 = vld [vmem:[%s7208_s15 + $0x78] sm:$0xff] }
 0xade   : > { %5032 = vmatprep.mubr.msk.f32.mxu0 %vm5854_vm12, %v5855_v47 }
 0xae1   : > { %5033 = vmatmul.mubr.msk.f32.gmra.mrb[6].mxu0 %vm576_vm0, %v2386_v24  ;;  %v6651_v24 = vld [vmem:[%s7209_s23 + $0x8] sm:$0xff] }
 0xae2   : > { %5035 = vmatprep.mubr.msk.f32.mxu0 %vm5854_vm12, %v5855_v47 }
 0xae5   : > { %5036 = vmatmul.mubr.msk.f32.gmra.mrb[8].mxu0 %vm576_vm0, %v2387_v26 }
 0xae6   : > { %5085 = vmatprep.mubr.msk.f32.mxu0 %vm1581_vm11, %v2507_v37 }
 0xba7   : > { %v2483_v27 = vpop.f32.mrb[0].mxu0 }
 0xba8   : > { %v5025_v28 = vpop.f32.mrb[1].mxu0  ;;  %v6573_v31 = vadd.f32 %v4345_v29, %v2483_v27 }
 0xbac   : > { %v2488_v30 = vpop.f32.mrb[2].mxu0 }
 0xbad   : > { %v6575_v43 = vadd.f32 %v4345_v29, %v2488_v30  ;;  %v5028_v32 = vpop.f32.mrb[3].mxu0  ;;  %v6659_v30 = vld [vmem:[%s7209_s23 + $0x18] sm:$0xff] }
 0xbae   : > { %v3223_v32 = vld [vmem:[%s6068_s27 + $0x10] sm:$0xff] }
 0xbaf   : > { %v5650_v33 = vpack.i.bf16 %v6575_v43, %v6573_v31 }
 0xbb0   : > { %v2493_v34 = vpop.f32.mrb[4].mxu0 }
 0xbb1   : > { %5651 = vrot.lane.b32.xlu0 %v5650_v33, %s5856_s18  ;;  %v5031_v35 = vpop.f32.mrb[5].mxu0  ;;  %v6580_v38 = vadd.f32 %v4345_v29, %v2493_v34 }
 0xbb4   : > { %v2498_v36 = vpop.f32.mrb[6].mxu0 }
 0xbb5   : > { %v6582_v39 = vadd.f32 %v4345_v29, %v2498_v36  ;;  %v5034_v40 = vpop.f32.mrb[7].mxu0 }
 0xbb7   : > { %v5665_v41 = vpack.i.bf16 %v6582_v39, %v6580_v38 }
 0xbb8   : > { %v2503_v42 = vpop.f32.mrb[8].mxu0 }
 0xbb9   : > { %5666 = vrot.lane.b32.xlu0 %v5665_v41, %s5857_s22  ;;  %5656 = vrot.lane.b32.xlu1 %v5665_v41, %s5856_s18  ;;  %v5037_v44 = vpop.f32.mrb[9].mxu0  ;;  %v6588_v45 = vadd.f32 %v4345_v29, %v2503_v42  ;;  %v6675_v41 = vld [vmem:[%s7209_s23 + $0x28] sm:$0xff]  ;;  %v6679_v42 = vld [vmem:[%s7209_s23 + $0x20] sm:$0xff] }
 0xbbd   : > { %2538 = vrot.lane.b32.xlu1 %v6588_v45, %s5856_s18 }
 0xbc1   : > { %5661 = vrot.lane.b32.xlu1 %v5650_v33, %s5857_s22  ;;  %v6668_v33 = vld [vmem:[%s7209_s23 + $0x10] sm:$0xff] }
 0xbc5   : > { %2799 = vrot.lane.b32.xlu1 %v6588_v45, %s5857_s22 }
 0xc23   : > { %v5652_v48 = vpop.permute.xlu0 %5651 }
 0xc24   : > { %v5654_v49 = vunpack.i.h.bf16 %v5652_v48  ;;  %v5653_v50 = vunpack.i.l.bf16 %v5652_v48 }
 0xc26   : > { %v5357_v51 = vpack.c.bf16 %v5654_v49, %v5653_v50 }
 0xc28   : > { %5358 = vmatprep.subr.bf16.mxu1 %v5357_v51 }
 0xc29   : > { %5360 = vmatpush3.bf16.msra.mxu1 %v5357_v51 }
 0xc2b   : > { %v5657_v52 = vpop.permute.xlu1 %5656  ;;  %v5667_v54 = vpop.permute.xlu0 %5666 }
 0xc2c   : > { %v5659_v53 = vunpack.i.h.bf16 %v5657_v52  ;;  %v5658_v55 = vunpack.i.l.bf16 %v5657_v52  ;;  %v5669_v61 = vunpack.i.h.bf16 %v5667_v54  ;;  %v5668_v63 = vunpack.i.l.bf16 %v5667_v54  ;;  %v6684_v52 = vld [vmem:[%s7209_s23 + $0x38] sm:$0xff] }
 0xc2e   : > { %v5361_v57 = vpack.c.bf16 %v5659_v53, %v5658_v55  ;;  %v5369_v8 = vpack.c.bf16 %v5669_v61, %v5668_v63  ;;  %v6687_v53 = vld [vmem:[%s7209_s23 + $0x30] sm:$0xff]  ;;  %v6698_v61 = vld [vmem:[%s7209_s23 + $0x40] sm:$0xff] }
 0xc2f   : > { %v2539_v58 = vpop.permute.xlu1 %2538 }
 0xc30   : > { %5362 = vmatprep.subr.bf16.mxu1 %v5361_v57 }
 0xc31   : > { %5364 = vmatpush3.bf16.msra.mxu1 %v5361_v57 }
 0xc32   : > { %5046 = vmatprep.subr.msk.mxu1 %vm1597_vm10, %v2539_v58 }
 0xc33   : > { %v5662_v59 = vpop.permute.xlu1 %5661 }
 0xc34   : > { %v5664_v0 = vunpack.i.h.bf16 %v5662_v59  ;;  %v5663_v56 = vunpack.i.l.bf16 %v5662_v59 }
 0xc35   : > { %5047 = vmatpush3.msk.msra.mxu1 %vm1597_vm10, %v2539_v58 }
 0xc36   : > { %v5365_v5 = vpack.c.bf16 %v5664_v0, %v5663_v56  ;;  %5049 = vmatmul.mubr.msk.f32.vlgmr.msra.gmra.mrb[0].mxu1 %vm1581_vm11, %v2508_v60  ;;  %5373 = vmatprep.subr.bf16.mxu1 %v5853_v46 }
 0xc37   : > { %5051 = vmatprep.mubr.msk.f32.mxu1 %vm1581_vm11, %v2509_v3  ;;  %v2800_v12 = vpop.permute.xlu1 %2799 }
 0xc38   : > { %5366 = vmatprep.subr.bf16.mxu0 %v5365_v5 }
 0xc39   : > { %5368 = vmatpush3.bf16.msra.mxu0 %v5365_v5 }
 0xc3a   : > { %5370 = vmatprep.subr.bf16.mxu0 %v5369_v8  ;;  %5052 = vmatmul.mubr.msk.f32.gmra.mrb[2].mxu1 %vm1581_vm11, %v2510_v6 }
 0xc3b   : > { %5054 = vmatprep.mubr.msk.f32.mxu1 %vm1581_vm11, %v2511_v9 }
 0xc3d   : > { %5372 = vmatpush3.bf16.msra.mxu0 %v5369_v8  ;;  %v6706_v8 = vld [vmem:[%s7209_s23 + $0x50] sm:$0xff] }
 0xc3e   : > { %5083 = vmatprep.subr.msk.mxu0 %vm1597_vm10, %v2800_v12  ;;  %5055 = vmatmul.mubr.msk.f32.gmra.mrb[4].mxu1 %vm1581_vm11, %v2512_v11 }
 0xc3f   : > { %5057 = vmatprep.mubr.msk.f32.mxu1 %vm1581_vm11, %v2513_v2 }
 0xc41   : > { %5084 = vmatpush3.msk.msra.mxu0 %vm1597_vm10, %v2800_v12 }
 0xc42   : > { %5058 = vmatmul.mubr.msk.f32.gmra.mrb[6].mxu1 %vm1581_vm11, %v2514_v13  ;;  %5086 = vmatmul.mubr.msk.f32.vlgmr.msra.gmra.mrb[10].mxu0 %vm1581_vm11, %v2508_v60  ;;  %v6694_v60 = vld [vmem:[%s7209_s23 + $0x48] sm:$0xff] }
 0xc43   : > { %5060 = vmatprep.mubr.msk.f32.mxu1 %vm1581_vm11, %v2515_v14  ;;  %5409 = vmatprep.subr.bf16.mxu0 %v5853_v46 }
 0xc44   : > { %5088 = vmatprep.mubr.msk.f32.mxu0 %vm1581_vm11, %v2509_v3 }
 0xc46   : > { %5061 = vmatmul.mubr.msk.f32.gmra.mrb[8].mxu1 %vm1581_vm11, %v2516_v15  ;;  %5089 = vmatmul.mubr.msk.f32.gmra.mrb[12].mxu0 %vm1581_vm11, %v2510_v6  ;;  %v6703_v6 = vld [vmem:[%s7209_s23 + $0x58] sm:$0xff] }
 0xc47   : > { %5063 = vmatprep.mubr.msk.f32.mxu1 %vm1581_vm11, %v2517_v16  ;;  %5091 = vmatprep.mubr.msk.f32.mxu0 %vm1581_vm11, %v2511_v9 }
 0xc4a   : > { %5064 = vmatmul.mubr.msk.f32.gmra.mrb[10].mxu1 %vm1581_vm11, %v2518_v17  ;;  %5092 = vmatmul.mubr.msk.f32.gmra.mrb[14].mxu0 %vm1581_vm11, %v2512_v11 }
 0xc4b   : > { %5066 = vmatprep.mubr.msk.f32.mxu1 %vm1581_vm11, %v2519_v18  ;;  %5094 = vmatprep.mubr.msk.f32.mxu0 %vm1581_vm11, %v2513_v2 }
 0xc4e   : > { %5067 = vmatmul.mubr.msk.f32.gmra.mrb[12].mxu1 %vm1581_vm11, %v2520_v19  ;;  %5095 = vmatmul.mubr.msk.f32.gmra.mrb[16].mxu0 %vm1581_vm11, %v2514_v13 }
 0xc4f   : > { %5069 = vmatprep.mubr.msk.f32.mxu1 %vm1581_vm11, %v2521_v20  ;;  %5097 = vmatprep.mubr.msk.f32.mxu0 %vm1581_vm11, %v2515_v14  ;;  %v6713_v14 = vld [vmem:[%s7209_s23 + $0x68] sm:$0xff] }
 0xc52   : > { %5070 = vmatmul.mubr.msk.f32.gmra.mrb[14].mxu1 %vm1581_vm11, %v2522_v21  ;;  %5098 = vmatmul.mubr.msk.f32.gmra.mrb[18].mxu0 %vm1581_vm11, %v2516_v15  ;;  %v6717_v15 = vld [vmem:[%s7209_s23 + $0x60] sm:$0xff] }
 0xc53   : > { %5072 = vmatprep.mubr.msk.f32.mxu1 %vm1581_vm11, %v2523_v22  ;;  %5100 = vmatprep.mubr.msk.f32.mxu0 %vm1581_vm11, %v2517_v16 }
 0xc56   : > { %5073 = vmatmul.mubr.msk.f32.gmra.mrb[16].mxu1 %vm1581_vm11, %v2524_v23  ;;  %5101 = vmatmul.mubr.msk.f32.gmra.mrb[20].mxu0 %vm1581_vm11, %v2518_v17 }
 0xc57   : > { %3108 = vmatprep.mubr.f32.mxu1 %v5855_v47  ;;  %5103 = vmatprep.mubr.msk.f32.mxu0 %vm1581_vm11, %v2519_v18 }
 0xc5a   : > { %5104 = vmatmul.mubr.msk.f32.gmra.mrb[22].mxu0 %vm1581_vm11, %v2520_v19 }
 0xc5b   : > { %5106 = vmatprep.mubr.msk.f32.mxu0 %vm1581_vm11, %v2521_v20 }
 0xc5e   : > { %5107 = vmatmul.mubr.msk.f32.gmra.mrb[24].mxu0 %vm1581_vm11, %v2522_v21  ;;  %v6722_v21 = vld [vmem:[%s7209_s23 + $0x78] sm:$0xff] }
 0xc5f   : > { %5109 = vmatprep.mubr.msk.f32.mxu0 %vm1581_vm11, %v2523_v22  ;;  %v6725_v22 = vld [vmem:[%s7209_s23 + $0x70] sm:$0xff] }
 0xc62   : > { %5110 = vmatmul.mubr.msk.f32.gmra.mrb[26].mxu0 %vm1581_vm11, %v2524_v23 }
 0xd09   : > { %v5050_v26 = vpop.f32.mrb[0].mxu1 }
 0xd0a   : > { %v2774_v27 = vmul.f32 %v5050_v26, %v6651_v24  ;;  %v2666_v28 = vpop.f32.mrb[1].mxu1 }
 0xd0b   : > { %v2773_v29 = vmul.f32 %v6654_v25, %v2666_v28 }
 0xd0d   : > { %v5374_v34 = vpack.c.bf16 %v2774_v27, %v2773_v29  ;;  %v5053_v35 = vpop.f32.mrb[2].mxu1 }
 0xd0e   : > { %v2776_v36 = vmul.f32 %v5053_v35, %v6659_v30  ;;  %v2676_v37 = vpop.f32.mrb[3].mxu1  ;;  %v6736_v35 = vld [vmem:[%s7209_s23 + $0x80] sm:$0xff] }
 0xd0f   : > { %5376 = vmatpush1.bf16.xpose.msk.msra.mxu1 %vm6663_vm13, %v5374_v34  ;;  %v2775_v40 = vmul.f32 %v6668_v33, %v2676_v37  ;;  %v6732_v34 = vld [vmem:[%s7209_s23 + $0x88] sm:$0xff] }
 0xd10   : > { %5377 = vmatprep.subr.bf16.mxu1 %v5853_v46 }
 0xd11   : > { %v5378_v44 = vpack.c.bf16 %v2776_v36, %v2775_v40  ;;  %v5056_v48 = vpop.f32.mrb[4].mxu1 }
 0xd12   : > { %v2778_v49 = vmul.f32 %v5056_v48, %v6675_v41  ;;  %v2686_v50 = vpop.f32.mrb[5].mxu1 }
 0xd13   : > { %v2777_v51 = vmul.f32 %v6679_v42, %v2686_v50 }
 0xd15   : > { %v5382_v55 = vpack.c.bf16 %v2778_v49, %v2777_v51  ;;  %v5059_v57 = vpop.f32.mrb[6].mxu1  ;;  %v3224_v51 = vld [vmem:[%s6068_s27 + $0x18] sm:$0xff] }
 0xd16   : > { %v2780_v58 = vmul.f32 %v5059_v57, %v6684_v52  ;;  %v2696_v54 = vpop.f32.mrb[7].mxu1 }
 0xd17   : > { %5380 = vmatpush1.bf16.xpose.msk.msra.mxu1 %vm6663_vm13, %v5378_v44  ;;  %v2779_v59 = vmul.f32 %v6687_v53, %v2696_v54 }
 0xd18   : > { %5381 = vmatprep.subr.bf16.mxu1 %v5853_v46 }
 0xd19   : > { %v5386_v63 = vpack.c.bf16 %v2780_v58, %v2779_v59  ;;  %v5062_v0 = vpop.f32.mrb[8].mxu1  ;;  %v3227_v58 = vld [vmem:[%s6068_s27 + $0x30] sm:$0xff]  ;;  %v3229_v59 = vld [vmem:[%s6068_s27 + $0x40] sm:$0xff] }
 0xd1a   : > { %v2782_v56 = vmul.f32 %v5062_v0, %v6694_v60  ;;  %v2706_v3 = vpop.f32.mrb[9].mxu1 }
 0xd1b   : > { %v2781_v5 = vmul.f32 %v6698_v61, %v2706_v3 }
 0xd1d   : > { %v5390_v9 = vpack.c.bf16 %v2782_v56, %v2781_v5  ;;  %v5065_v11 = vpop.f32.mrb[10].mxu1 }
 0xd1e   : > { %v2784_v2 = vmul.f32 %v5065_v11, %v6703_v6  ;;  %v2716_v12 = vpop.f32.mrb[11].mxu1  ;;  %v3149_v11 = vld [vmem:[%s6063_s6] sm:$0xff] }
 0xd1f   : > { %5384 = vmatpush1.bf16.xpose.msk.msra.mxu1 %vm6663_vm13, %v5382_v55  ;;  %v2783_v13 = vmul.f32 %v6706_v8, %v2716_v12  ;;  %v3225_v55 = vld [vmem:[%s6068_s27 + $0x20] sm:$0xff] }
 0xd20   : > { %5385 = vmatprep.subr.bf16.mxu1 %v5853_v46 }
 0xd21   : > { %v5394_v16 = vpack.c.bf16 %v2784_v2, %v2783_v13  ;;  %v5068_v17 = vpop.f32.mrb[12].mxu1 }
 0xd22   : > { %v2786_v18 = vmul.f32 %v5068_v17, %v6713_v14  ;;  %v2726_v19 = vpop.f32.mrb[13].mxu1 }
 0xd23   : > { %v2785_v20 = vmul.f32 %v6717_v15, %v2726_v19  ;;  %v3152_v19 = vld [vmem:[%s6063_s6 + $0x18] sm:$0xff] }
 0xd25   : > { %v5398_v23 = vpack.c.bf16 %v2786_v18, %v2785_v20  ;;  %v5071_v26 = vpop.f32.mrb[14].mxu1  ;;  %v3151_v20 = vld [vmem:[%s6063_s6 + $0x10] sm:$0xff] }
 0xd26   : > { %v2788_v27 = vmul.f32 %v5071_v26, %v6722_v21  ;;  %v2736_v28 = vpop.f32.mrb[15].mxu1 }
 0xd27   : > { %5388 = vmatpush1.bf16.xpose.msk.msra.mxu1 %vm6663_vm13, %v5386_v63  ;;  %v2787_v29 = vmul.f32 %v6725_v22, %v2736_v28  ;;  %v3230_v63 = vld [vmem:[%s6068_s27 + $0x48] sm:$0xff] }
 0xd28   : > { %5389 = vmatprep.subr.bf16.mxu1 %v5853_v46  ;;  %v5422_v0 = vpack.c.bf16 %v3230_v63, %v3229_v59 }
 0xd29   : > { %v5402_v36 = vpack.c.bf16 %v2788_v27, %v2787_v29  ;;  %v5074_v37 = vpop.f32.mrb[16].mxu1 }
 0xd2a   : > { %v2790_v40 = vmul.f32 %v5074_v37, %v6732_v34  ;;  %v2746_v44 = vpop.f32.mrb[17].mxu1 }
 0xd2b   : > { %v2789_v48 = vmul.f32 %v6736_v35, %v2746_v44  ;;  %v3154_v44 = vld [vmem:[%s6063_s6 + $0x28] sm:$0xff] }
 0xd2d   : > { %v5406_v49 = vpack.c.bf16 %v2790_v40, %v2789_v48  ;;  %v3153_v48 = vld [vmem:[%s6063_s6 + $0x20] sm:$0xff] }
 0xd2f   : > { %5392 = vmatpush1.bf16.xpose.msk.msra.mxu1 %vm6663_vm13, %v5390_v9  ;;  %v3150_v9 = vld [vmem:[%s6063_s6 + $0x8] sm:$0xff] }
 0xd30   : > { %5393 = vmatprep.subr.bf16.mxu1 %v5853_v46 }
 0xd37   : > { %5396 = vmatpush1.bf16.xpose.msk.msra.mxu1 %vm6663_vm13, %v5394_v16 }
 0xd38   : > { %5397 = vmatprep.subr.bf16.mxu1 %v5853_v46 }
 0xd3f   : > { %5400 = vmatpush1.bf16.xpose.msk.msra.mxu1 %vm6663_vm13, %v5398_v23 }
 0xd40   : > { %5401 = vmatprep.subr.bf16.mxu1 %v5853_v46 }
 0xd47   : > { %5404 = vmatpush1.bf16.xpose.msk.msra.mxu1 %vm6663_vm13, %v5402_v36 }
 0xd48   : > { %5405 = vmatprep.subr.bf16.mxu1 %v5853_v46 }
 0xd4f   : > { %5408 = vmatpush1.bf16.xpose.msk.msra.mxu1 %vm6663_vm13, %v5406_v49 }
 0xd50   : > { %5436 = vmatprep.subr.bf16.mxu1 %v5853_v46 }
 0xd56   : > { %4407 = vmatmul.mubr.msk.f32.vlgmr.msra.gmra.mrb[18].mxu1 %vm576_vm0, %v6573_v31  ;;  %v3221_v31 = vld [vmem:[%s6068_s27] sm:$0xff] }
 0xd57   : > { %3114 = vmatprep.mubr.f32.mxu1 %v5855_v47 }
 0xd5a   : > { %4408 = vmatmul.mubr.msk.f32.gmra.mrb[20].mxu1 %vm576_vm0, %v6575_v43  ;;  %v3222_v43 = vld [vmem:[%s6068_s27 + $0x8] sm:$0xff] }
 0xd5b   : > { %3120 = vmatprep.mubr.f32.mxu1 %v5855_v47  ;;  %v5410_v50 = vpack.c.bf16 %v3222_v43, %v3221_v31 }
 0xd5d   : > { %5411 = vmatpush1.bf16.msra.mxu0 %v5410_v50 }
 0xd5e   : > { %4409 = vmatmul.mubr.msk.f32.gmra.mrb[22].mxu1 %vm576_vm0, %v6580_v38  ;;  %v5413_v38 = vpack.c.bf16 %v3224_v51, %v3223_v32  ;;  %5412 = vmatprep.subr.bf16.mxu0 %v5853_v46 }
 0xd5f   : > { %3126 = vmatprep.mubr.f32.mxu1 %v5855_v47 }
 0xd61   : > { %5414 = vmatpush1.bf16.msra.mxu0 %v5413_v38 }
 0xd62   : > { %4410 = vmatmul.mubr.msk.f32.gmra.mrb[24].mxu1 %vm576_vm0, %v6582_v39  ;;  %v3226_v39 = vld [vmem:[%s6068_s27 + $0x28] sm:$0xff]  ;;  %5415 = vmatprep.subr.bf16.mxu0 %v5853_v46 }
 0xd63   : > { %3132 = vmatprep.mubr.f32.mxu1 %v5855_v47  ;;  %v5416_v57 = vpack.c.bf16 %v3226_v39, %v3225_v55  ;;  %v3156_v39 = vld [vmem:[%s6063_s6 + $0x38] sm:$0xff] }
 0xd65   : > { %5417 = vmatpush1.bf16.msra.mxu0 %v5416_v57  ;;  %v3155_v57 = vld [vmem:[%s6063_s6 + $0x30] sm:$0xff] }
 0xd66   : > { %4411 = vmatmul.mubr.msk.f32.gmra.mrb[26].mxu1 %vm576_vm0, %v6588_v45  ;;  %v3228_v45 = vld [vmem:[%s6068_s27 + $0x38] sm:$0xff]  ;;  %5418 = vmatprep.subr.bf16.mxu0 %v5853_v46 }
 0xd67   : > { %v5419_v54 = vpack.c.bf16 %v3228_v45, %v3227_v58 }
 0xd69   : > { %5420 = vmatpush1.bf16.msra.mxu0 %v5419_v54 }
 0xd6a   : > { %5421 = vmatprep.subr.bf16.mxu0 %v5853_v46 }
 0xd6d   : > { %5423 = vmatpush1.bf16.msra.mxu0 %v5422_v0  ;;  %v3157_v0 = vld [vmem:[%s6063_s6 + $0x40] sm:$0xf] }
 0xd6e   : > { %5424 = vmatprep.subr.bf16.mxu0 %v5853_v46 }
 0xe29   : > { %v3110_v56 = vpop.f32.mrb[18].mxu1 }
 0xe2a   : > { %v3139_v3 = vmul.f32 0.35355338, %v3110_v56  ;;  %v3112_v5 = vpop.f32.mrb[19].mxu1 }
 0xe2b   : > { %v3140_v2 = vmul.f32 0.35355338, %v3112_v5 }
 0xe2c   : > { %v6788_v16 = vadd.f32 %v3149_v11, %v3139_v3 }
 0xe2d   : > { %v6786_v12 = vadd.f32 %v3150_v9, %v3140_v2  ;;  %v3116_v13 = vpop.f32.mrb[20].mxu1  ;;  %v3158_v9 = vld [vmem:[%s6063_s6 + $0x48] sm:$0xf] }
 0xe2e   : > { %v3141_v17 = vmul.f32 0.35355338, %v3116_v13  ;;  %v3118_v18 = vpop.f32.mrb[21].mxu1 }
 0xe2f   : > { %v3142_v23 = vmul.f32 0.35355338, %v3118_v18  ;;  %v3169_v26 = vsel %vm775_vm1, %v6786_v12, -inf }
 0xe30   : > { %v3170_v27 = vmax.f32 %v6788_v16, %v3169_v26  ;;  %v6797_v36 = vadd.f32 %v3151_v20, %v3141_v17  ;;  %v3232_v26 = vld [vmem:[%s6068_s27 + $0x58] sm:$0xff] }
 0xe31   : > { %v6795_v28 = vadd.f32 %v3152_v19, %v3142_v23  ;;  %v3122_v29 = vpop.f32.mrb[22].mxu1  ;;  %v3231_v23 = vld [vmem:[%s6068_s27 + $0x50] sm:$0xff] }
 0xe32   : > { %v3143_v37 = vmul.f32 0.35355338, %v3122_v29  ;;  %3171 = vmax.xlane.f32.xlu0 %v3170_v27  ;;  %v3124_v40 = vpop.f32.mrb[23].mxu1  ;;  %v5425_v29 = vpack.c.bf16 %v3232_v26, %v3231_v23 }
 0xe33   : > { %v3144_v49 = vmul.f32 0.35355338, %v3124_v40  ;;  %v3173_v31 = vsel %vm775_vm1, %v6795_v28, -inf  ;;  %v3234_v40 = vld [vmem:[%s6068_s27 + $0x68] sm:$0xff] }
 0xe34   : > { %v3174_v43 = vmax.f32 %v6797_v36, %v3173_v31  ;;  %v6806_v51 = vadd.f32 %v3153_v48, %v3143_v37  ;;  %5426 = vmatpush1.bf16.msra.mxu0 %v5425_v29  ;;  %v3233_v37 = vld [vmem:[%s6068_s27 + $0x60] sm:$0xff]  ;;  %v3235_v48 = vld [vmem:[%s6068_s27 + $0x70] sm:$0xff] }
 0xe35   : > { %v6804_v32 = vadd.f32 %v3154_v44, %v3144_v49  ;;  %v3128_v50 = vpop.f32.mrb[24].mxu1  ;;  %5427 = vmatprep.subr.bf16.mxu0 %v5853_v46  ;;  %v5428_v44 = vpack.c.bf16 %v3234_v40, %v3233_v37  ;;  %v3236_v49 = vld [vmem:[%s6068_s27 + $0x78] sm:$0xff] }
 0xe36   : > { %v3145_v38 = vmul.f32 0.35355338, %v3128_v50  ;;  %3175 = vmax.xlane.f32.xlu1 %v3174_v43  ;;  %v3130_v55 = vpop.f32.mrb[25].mxu1  ;;  %v5431_v31 = vpack.c.bf16 %v3236_v49, %v3235_v48  ;;  %v3237_v43 = vld [vmem:[%s6068_s27 + $0x80] sm:$0xff]  ;;  %v3238_v50 = vld [vmem:[%s6068_s27 + $0x88] sm:$0xff] }
 0xe37   : > { %v3146_v58 = vmul.f32 0.35355338, %v3130_v55  ;;  %v3177_v45 = vsel %vm775_vm1, %v6804_v32, -inf  ;;  %v5087_v55 = vpop.f32.mrb[10].mxu0 }
 0xe38   : > { %v3178_v54 = vmax.f32 %v6806_v51, %v3177_v45  ;;  %v6816_v56 = vadd.f32 %v3155_v57, %v3145_v38  ;;  %5429 = vmatpush1.bf16.msra.mxu0 %v5428_v44  ;;  %v5434_v38 = vpack.c.bf16 %v3238_v50, %v3237_v43  ;;  %v2963_v57 = vmul.f32 %v5087_v55, %v6651_v24 }
 0xe39   : > { %v6813_v59 = vadd.f32 %v3156_v39, %v3146_v58  ;;  %v3134_v63 = vpop.f32.mrb[26].mxu1  ;;  %5430 = vmatprep.subr.bf16.mxu0 %v5853_v46  ;;  %v6841_v39 = vld [vmem:[%s6073_s14] sm:$0xff]  ;;  %v2873_v58 = vpop.f32.mrb[11].mxu0 }
 0xe3a   : > { %v3147_v3 = vmul.f32 0.35355338, %v3134_v63  ;;  %3179 = vmax.xlane.f32.xlu0 %v3178_v54  ;;  %v3136_v5 = vpop.f32.mrb[27].mxu1  ;;  %v3356_v45 = vcombine.high %v6841_v39, %v6841_v39  ;;  %v2962_v54 = vmul.f32 %v2873_v58, %v6654_v25  ;;  %v5090_v63 = vpop.f32.mrb[12].mxu0 }
 0xe3b   : > { %v3148_v11 = vmul.f32 0.35355338, %v3136_v5  ;;  %v3181_v2 = vsel %vm775_vm1, %v6813_v59, -inf }
 0xe3c   : > { %v6821_v13 = vadd.f32 %v3157_v0, %v3147_v3  ;;  %v3182_v17 = vmax.f32 %v6816_v56, %v3181_v2  ;;  %5432 = vmatpush1.bf16.msra.mxu0 %v5431_v31  ;;  %v2965_v0 = vmul.f32 %v5090_v63, %v6659_v30  ;;  %v2883_v3 = vpop.f32.mrb[13].mxu0  ;;  %v5437_v5 = vpack.c.bf16 %v2963_v57, %v2962_v54 }
 0xe3d   : > { %v6824_v18 = vadd.f32 %v3158_v9, %v3148_v11  ;;  %5433 = vmatprep.subr.bf16.mxu0 %v5853_v46  ;;  %v2964_v9 = vmul.f32 %v2883_v3, %v6668_v33  ;;  %v5093_v11 = vpop.f32.mrb[14].mxu0 }
 0xe3e   : > { %3183 = vmax.xlane.f32.xlu0 %v3182_v17  ;;  %v3185_v19 = vsel %vm1597_vm10, %v6821_v13, -inf  ;;  %v2967_v2 = vmul.f32 %v5093_v11, %v6675_v41  ;;  %v2893_v17 = vpop.f32.mrb[15].mxu0  ;;  %5438 = vmatpush1.bf16.msra.mxu1 %v5437_v5 }
 0xe3f   : > { %v3187_v20 = vsel %vm3186_vm14, %v6824_v18, -inf  ;;  %v5440_v24 = vpack.c.bf16 %v2965_v0, %v2964_v9  ;;  %5439 = vmatprep.subr.bf16.mxu1 %v5853_v46 }
 0xe40   : > { %v3188_v27 = vmax.f32 %v3185_v19, %v3187_v20  ;;  %5435 = vmatpush1.bf16.msra.mxu0 %v5434_v38  ;;  %v2966_v19 = vmul.f32 %v2893_v17, %v6679_v42  ;;  %v5096_v20 = vpop.f32.mrb[16].mxu0 }
 0xe41   : > { %4417 = vmatprep.subr.msk.mxu0 %vm1597_vm10, %v3356_v45  ;;  %v2969_v25 = vmul.f32 %v5096_v20, %v6684_v52  ;;  %v2903_v30 = vpop.f32.mrb[17].mxu0 }
 0xe42   : > { %3189 = vmax.xlane.f32.xlu0 %v3188_v27  ;;  %v5443_v23 = vpack.c.bf16 %v2967_v2, %v2966_v19  ;;  %v2968_v26 = vmul.f32 %v2903_v30, %v6687_v53  ;;  %v5099_v27 = vpop.f32.mrb[18].mxu0  ;;  %5441 = vmatpush1.bf16.msra.mxu1 %v5440_v24 }
 0xe43   : > { %v2971_v33 = vmul.f32 %v5099_v27, %v6694_v60  ;;  %v2913_v29 = vpop.f32.mrb[19].mxu0  ;;  %5442 = vmatprep.subr.bf16.mxu1 %v5853_v46 }
 0xe44   : > { %v5446_v41 = vpack.c.bf16 %v2969_v25, %v2968_v26  ;;  %v2970_v37 = vmul.f32 %v2913_v29, %v6698_v61  ;;  %v5102_v40 = vpop.f32.mrb[20].mxu0 }
 0xe45   : > { %v2973_v42 = vmul.f32 %v5102_v40, %v6703_v6  ;;  %v2923_v44 = vpop.f32.mrb[21].mxu0 }
 0xe46   : > { %v5449_v48 = vpack.c.bf16 %v2971_v33, %v2970_v37  ;;  %v2972_v52 = vmul.f32 %v2923_v44, %v6706_v8  ;;  %v5105_v49 = vpop.f32.mrb[22].mxu0  ;;  %5444 = vmatpush1.bf16.msra.mxu1 %v5443_v23 }
 0xe47   : > { %v2975_v53 = vmul.f32 %v5105_v49, %v6713_v14  ;;  %v2933_v31 = vpop.f32.mrb[23].mxu0  ;;  %5445 = vmatprep.subr.bf16.mxu1 %v5853_v46 }
 0xe48   : > { %v5452_v60 = vpack.c.bf16 %v2973_v42, %v2972_v52  ;;  %v2974_v43 = vmul.f32 %v2933_v31, %v6717_v15  ;;  %v5108_v50 = vpop.f32.mrb[24].mxu0 }
 0xe49   : > { %v2977_v61 = vmul.f32 %v5108_v50, %v6722_v21  ;;  %v2943_v38 = vpop.f32.mrb[25].mxu0 }
 0xe4a   : > { %v5455_v55 = vpack.c.bf16 %v2975_v53, %v2974_v43  ;;  %v2976_v6 = vmul.f32 %v2943_v38, %v6725_v22  ;;  %v5111_v57 = vpop.f32.mrb[26].mxu0  ;;  %5447 = vmatpush1.bf16.msra.mxu1 %v5446_v41 }
 0xe4b   : > { %v2979_v8 = vmul.f32 %v5111_v57, %v6732_v34  ;;  %v2953_v58 = vpop.f32.mrb[27].mxu0  ;;  %5448 = vmatprep.subr.bf16.mxu1 %v5853_v46  ;;  %v3589_v57 = vld [vmem:[%s3587_s5 + $0x8] sm:$0xff] }
 0xe4c   : > { %v5458_v14 = vpack.c.bf16 %v2977_v61, %v2976_v6  ;;  %v2978_v45 = vmul.f32 %v2953_v58, %v6736_v35  ;;  %v3588_v6 = vld [vmem:[%s3587_s5] sm:$0xff] }
 0xe4d   : > { %v5464_v58 = vpack.c.bf16 %v3589_v57, %v3588_v6 }
 0xe4e   : > { %v5461_v15 = vpack.c.bf16 %v2979_v8, %v2978_v45  ;;  %5450 = vmatpush1.bf16.msra.mxu1 %v5449_v48  ;;  %v3590_v8 = vld [vmem:[%s3587_s5 + $0x10] sm:$0xff] }
 0xe4f   : > { %5451 = vmatprep.subr.bf16.mxu1 %v5853_v46 }
 0xe52   : > { %5453 = vmatpush1.bf16.msra.mxu1 %v5452_v60 }
 0xe53   : > { %5454 = vmatprep.subr.bf16.mxu1 %v5853_v46 }
 0xe56   : > { %5456 = vmatpush1.bf16.msra.mxu1 %v5455_v55 }
 0xe57   : > { %5457 = vmatprep.subr.bf16.mxu1 %v5853_v46 }
 0xe5a   : > { %5459 = vmatpush1.bf16.msra.mxu1 %v5458_v14  ;;  %v3591_v14 = vld [vmem:[%s3587_s5 + $0x18] sm:$0xff] }
 0xe5b   : > { %5460 = vmatprep.subr.bf16.mxu1 %v5853_v46  ;;  %v5467_v45 = vpack.c.bf16 %v3591_v14, %v3590_v8 }
 0xe5e   : > { %5462 = vmatpush1.bf16.msra.mxu1 %v5461_v15 }
 0xe5f   : > { %5491 = vmatprep.subr.bf16.mxu1 %v5853_v46 }
 0xebf   : > { %v3172_v21 = vpop.xlane.xlu0 %3171 }
 0xec0   : > { %v3191_v22 = vsub.f32 %v6788_v16, %v3172_v21  ;;  %v3192_v34 = vsub.f32 %v6786_v12, %v3172_v21 }
 0xec2   : > { %v3201_v35 = vmul.f32 1.442695, %v3191_v22  ;;  %v3203_v54 = vmul.f32 1.442695, %v3192_v34 }
 0xec3   : > { %v3176_v63 = vpop.xlane.xlu1 %3175 }
 0xec4   : > { %5681 = vpow2.f32 %v3201_v35  ;;  %v3193_v0 = vsub.f32 %v6797_v36, %v3176_v63  ;;  %v3194_v3 = vsub.f32 %v6795_v28, %v3176_v63 }
 0xec5   : > { %5683 = vpow2.f32 %v3203_v54 }
 0xec6   : > { %v3205_v5 = vmul.f32 1.442695, %v3193_v0  ;;  %v3207_v9 = vmul.f32 1.442695, %v3194_v3 }
 0xec7   : > { %v3180_v11 = vpop.xlane.xlu0 %3179 }
 0xec8   : > { %5685 = vpow2.f32 %v3205_v5  ;;  %v3195_v2 = vsub.f32 %v6806_v51, %v3180_v11  ;;  %v3196_v17 = vsub.f32 %v6804_v32, %v3180_v11 }
 0xec9   : > { %5687 = vpow2.f32 %v3207_v9 }
 0xeca   : > { %v3209_v16 = vmul.f32 1.442695, %v3195_v2  ;;  %v3211_v12 = vmul.f32 1.442695, %v3196_v17 }
 0xecb   : > { %v3184_v24 = vpop.xlane.xlu0 %3183 }
 0xecc   : > { %5689 = vpow2.f32 %v3209_v16  ;;  %v3197_v19 = vsub.f32 %v6816_v56, %v3184_v24  ;;  %v3198_v36 = vsub.f32 %v6813_v59, %v3184_v24 }
 0xecd   : > { %5691 = vpow2.f32 %v3211_v12 }
 0xece   : > { %v6881_v28 = vpop.eup %5681  ;;  %v3213_v20 = vmul.f32 1.442695, %v3197_v19  ;;  %v3215_v25 = vmul.f32 1.442695, %v3198_v36 }
 0xecf   : > { %v6883_v30 = vpop.eup %5683  ;;  %v3190_v23 = vpop.xlane.xlu0 %3189 }
 0xed0   : > { %5693 = vpow2.f32 %v3213_v20  ;;  %4412 = vmatprep.mubr.msk.f32.mxu0 %vm775_vm1, %v6883_v30  ;;  %v3199_v32 = vsub.f32 %v6821_v13, %v3190_v23  ;;  %v3200_v51 = vsub.f32 %v6824_v18, %v3190_v23 }
 0xed1   : > { %5695 = vpow2.f32 %v3215_v25  ;;  %3319 = vmatmul.mubr.f32.vlgmr.msra.gmra.mrb[28].mxu0 %v6881_v28 }
 0xed2   : > { %v6890_v59 = vpop.eup %5685  ;;  %v3217_v56 = vmul.f32 1.442695, %v3199_v32  ;;  %v3219_v26 = vmul.f32 1.442695, %v3200_v51  ;;  %4418 = vmatpush1.msk.msra.mxu0 %vm1597_vm10, %v6841_v39 }
 0xed3   : > { %v6894_v27 = vpop.eup %5687  ;;  %5463 = vmatprep.subr.bf16.mxu0 %v5853_v46 }
 0xed4   : > { %5697 = vpow2.f32 %v3217_v56  ;;  %4413 = vmatprep.mubr.msk.f32.mxu0 %vm775_vm1, %v6894_v27 }
 0xed5   : > { %5699 = vpow2.f32 %v3219_v26  ;;  %3324 = vmatmul.mubr.f32.gmra.mrb[30].mxu0 %v6890_v59 }
 0xed6   : > { %v6900_v13 = vpop.eup %5689 }
 0xed7   : > { %v6902_v18 = vpop.eup %5691 }
 0xed8   : > { %4414 = vmatprep.mubr.msk.f32.mxu0 %vm775_vm1, %v6902_v18 }
 0xed9   : > { %3329 = vmatmul.mubr.f32.gmra.mrb[32].mxu0 %v6900_v13 }
 0xeda   : > { %v6907_v39 = vpop.eup %5693 }
 0xedb   : > { %v6909_v33 = vpop.eup %5695 }
 0xedc   : > { %4415 = vmatprep.mubr.msk.f32.mxu0 %vm775_vm1, %v6909_v33 }
 0xedd   : > { %3334 = vmatmul.mubr.f32.gmra.mrb[34].mxu0 %v6907_v39 }
 0xede   : > { %v6914_v29 = vpop.eup %5697 }
 0xedf   : > { %v6916_v41 = vpop.eup %5699 }
 0xee0   : > { %4416 = vmatprep.mubr.msk.f32.mxu0 %vm775_vm1, %v6916_v41 }
 0xee1   : > { %3339 = vmatmul.mubr.f32.gmra.mrb[36].mxu0 %v6914_v29 }
 0xee2   : > { %3441 = vmatprep.mubr.f32.mxu0 %v5855_v47 }
 0xfa4   : > { %v3320_v37 = vpop.f32.mrb[28].mxu0 }
 0xfa5   : > { %5701 = vrcp.f32 %v3320_v37  ;;  %v3322_v40 = vpop.f32.mrb[29].mxu0 }
 0xfa8   : > { %v3325_v42 = vpop.f32.mrb[30].mxu0 }
 0xfa9   : > { %5703 = vrcp.f32 %v3325_v42  ;;  %v3327_v44 = vpop.f32.mrb[31].mxu0 }
 0xfac   : > { %v3330_v48 = vpop.f32.mrb[32].mxu0 }
 0xfad   : > { %5705 = vrcp.f32 %v3330_v48  ;;  %v3332_v52 = vpop.f32.mrb[33].mxu0 }
 0xfaf   : > { %v5702_v49 = vpop.eup %5701 }
 0xfb0   : > { %v3335_v53 = vpop.f32.mrb[34].mxu0  ;;  %4419 = vmatmul.mubr.msk.f32.vlgmr.msra.gmra.mrb[38].mxu0 %vm3357_vm15, %v5702_v49 }
 0xfb1   : > { %5707 = vrcp.f32 %v3335_v53  ;;  %v3337_v31 = vpop.f32.mrb[35].mxu0  ;;  %3447 = vmatprep.mubr.f32.mxu0 %v5855_v47  ;;  %5465 = vmatpush3.bf16.msra.mxu0 %v5464_v58 }
 0xfb2   : > { %5466 = vmatprep.subr.bf16.mxu0 %v5853_v46 }
 0xfb3   : > { %v5704_v60 = vpop.eup %5703 }
 0xfb4   : > { %v3340_v43 = vpop.f32.mrb[36].mxu0  ;;  %4420 = vmatmul.mubr.msk.f32.gmra.mrb[40].mxu0 %vm3357_vm15, %v5704_v60 }
 0xfb5   : > { %5709 = vrcp.f32 %v3340_v43  ;;  %v3342_v50 = vpop.f32.mrb[37].mxu0  ;;  %3453 = vmatprep.mubr.f32.mxu0 %v5855_v47  ;;  %5468 = vmatpush3.bf16.msra.mxu0 %v5467_v45 }
 0xfb6   : > { %5469 = vmatprep.subr.bf16.mxu0 %v5853_v46 }
 0xfb7   : > { %v5706_v61 = vpop.eup %5705 }
 0xfb8   : > { %4421 = vmatmul.mubr.msk.f32.gmra.mrb[42].mxu0 %vm3357_vm15, %v5706_v61 }
 0xfb9   : > { %3459 = vmatprep.mubr.f32.mxu0 %v5855_v47 }
 0xfbb   : > { %v5708_v38 = vpop.eup %5707 }
 0xfbc   : > { %4422 = vmatmul.mubr.msk.f32.gmra.mrb[44].mxu0 %vm3357_vm15, %v5708_v38 }
 0xfbd   : > { %3465 = vmatprep.mubr.f32.mxu0 %v5855_v47 }
 0xfbf   : > { %v5710_v55 = vpop.eup %5709 }
 0xfc0   : > { %4423 = vmatmul.mubr.msk.f32.gmra.mrb[46].mxu0 %vm3357_vm15, %v5710_v55 }
 0xfc1   : > { %5120 = vmatprep.mubr.msk.f32.mxu0 %vm5854_vm12, %v5855_v47 }
0x1083   : > { %v3443_v15 = vpop.f32.mrb[38].mxu0 }
0x1084   : > { %v3445_v21 = vpop.f32.mrb[39].mxu0  ;;  %v3472_v34 = vmul.f32 %v6881_v28, %v3443_v15 }
0x1085   : > { %v3473_v22 = vmul.f32 %v6883_v30, %v3445_v21 }
0x1087   : > { %v3449_v35 = vpop.f32.mrb[40].mxu0  ;;  %4424 = vmatprep.mubr.msk.f32.mxu1 %vm775_vm1, %v3473_v22 }
0x1088   : > { %v3451_v54 = vpop.f32.mrb[41].mxu0  ;;  %3562 = vmatmul.mubr.f32.vlgmr.msra.gmra.mrb[28].mxu1 %v3472_v34  ;;  %v3474_v0 = vmul.f32 %v6890_v59, %v3449_v35 }
0x1089   : > { %v3475_v63 = vmul.f32 %v6894_v27, %v3451_v54 }
0x108b   : > { %v3455_v3 = vpop.f32.mrb[42].mxu0  ;;  %4425 = vmatprep.mubr.msk.f32.mxu1 %vm775_vm1, %v3475_v63 }
0x108c   : > { %v3457_v5 = vpop.f32.mrb[43].mxu0  ;;  %3567 = vmatmul.mubr.f32.gmra.mrb[30].mxu1 %v3474_v0  ;;  %v3476_v11 = vmul.f32 %v6900_v13, %v3455_v3  ;;  %v4429_v13 = vld [vmem:[%s3592_s13] ss:$0 sm:$0xff] }
0x108d   : > { %v3477_v9 = vmul.f32 %v6902_v18, %v3457_v5 }
0x108f   : > { %v3461_v2 = vpop.f32.mrb[44].mxu0  ;;  %4426 = vmatprep.mubr.msk.f32.mxu1 %vm775_vm1, %v3477_v9 }
0x1090   : > { %v3463_v17 = vpop.f32.mrb[45].mxu0  ;;  %3572 = vmatmul.mubr.f32.gmra.mrb[32].mxu1 %v3476_v11  ;;  %v3478_v12 = vmul.f32 %v6907_v39, %v3461_v2 }
0x1091   : > { %v3479_v16 = vmul.f32 %v6909_v33, %v3463_v17 }
0x1093   : > { %v3467_v24 = vpop.f32.mrb[46].mxu0  ;;  %4427 = vmatprep.mubr.msk.f32.mxu1 %vm775_vm1, %v3479_v16 }
0x1094   : > { %v3469_v19 = vpop.f32.mrb[47].mxu0  ;;  %3577 = vmatmul.mubr.f32.gmra.mrb[34].mxu1 %v3478_v12  ;;  %v3480_v28 = vmul.f32 %v6914_v29, %v3467_v24 }
0x1095   : > { %v3481_v36 = vmul.f32 %v6916_v41, %v3469_v19 }
0x1097   : > { %4428 = vmatprep.mubr.msk.f32.mxu1 %vm775_vm1, %v3481_v36 }
0x1098   : > { %3582 = vmatmul.mubr.f32.gmra.mrb[36].mxu1 %v3480_v28  ;;  %v3802_v28 = vld [vmem:[%s3801_s21] sm:$0xff] }
0x1099   : > { %5177 = vmatprep.mubr.msk.f32.mxu1 %vm5854_vm12, %v5855_v47 }
0x115b   : > { %v3563_v20 = vpop.f32.mrb[28].mxu1 }
0x115c   : > { %v3565_v25 = vpop.f32.mrb[29].mxu1  ;;  %5121 = vmatmul.mubr.msk.f32.vlgmr.msra.gmra.mrb[48].mxu0 %vm576_vm0, %v3563_v20  ;;  %v3803_v20 = vld [vmem:[%s3801_s21 + $0x8] sm:$0xff] }
0x115d   : > { %5123 = vmatprep.mubr.msk.f32.mxu0 %vm5854_vm12, %v5855_v47  ;;  %v5470_v25 = vpack.c.bf16 %v3803_v20, %v3802_v28 }
0x115f   : > { %v3568_v30 = vpop.f32.mrb[30].mxu1  ;;  %5471 = vmatpush3.bf16.msra.mxu0 %v5470_v25 }
0x1160   : > { %v3570_v23 = vpop.f32.mrb[31].mxu1  ;;  %5124 = vmatmul.mubr.msk.f32.gmra.mrb[50].mxu0 %vm576_vm0, %v3568_v30  ;;  %5472 = vmatprep.subr.bf16.mxu0 %v5853_v46  ;;  %v3804_v30 = vld [vmem:[%s3801_s21 + $0x10] sm:$0xff] }
0x1161   : > { %5126 = vmatprep.mubr.msk.f32.mxu0 %vm5854_vm12, %v5855_v47  ;;  %v3805_v23 = vld [vmem:[%s3801_s21 + $0x18] sm:$0xff] }
0x1163   : > { %v3573_v32 = vpop.f32.mrb[32].mxu1 }
0x1164   : > { %v3575_v51 = vpop.f32.mrb[33].mxu1  ;;  %5127 = vmatmul.mubr.msk.f32.gmra.mrb[52].mxu0 %vm576_vm0, %v3573_v32  ;;  %v5473_v32 = vpack.c.bf16 %v3805_v23, %v3804_v30 }
0x1165   : > { %5129 = vmatprep.mubr.msk.f32.mxu0 %vm5854_vm12, %v5855_v47 }
0x1166   : > { %5474 = vmatpush3.bf16.msra.mxu0 %v5473_v32 }
0x1167   : > { %v3578_v59 = vpop.f32.mrb[34].mxu1  ;;  %5475 = vmatprep.subr.bf16.mxu0 %v5853_v46 }
0x1168   : > { %v3580_v56 = vpop.f32.mrb[35].mxu1  ;;  %5130 = vmatmul.mubr.msk.f32.gmra.mrb[54].mxu0 %vm576_vm0, %v3578_v59 }
0x1169   : > { %5132 = vmatprep.mubr.msk.f32.mxu0 %vm5854_vm12, %v5855_v47 }
0x116b   : > { %v3583_v26 = vpop.f32.mrb[36].mxu1 }
0x116c   : > { %v3585_v27 = vpop.f32.mrb[37].mxu1  ;;  %5133 = vmatmul.mubr.msk.f32.gmra.mrb[56].mxu0 %vm576_vm0, %v3583_v26 }
0x116d   : > { %5143 = vmatprep.mubr.msk.f32.mxu0 %vm5854_vm12, %v5855_v47 }
0x122f   : > { %v3681_v18 = vpop.f32.mrb[48].mxu0 }
0x1230   : > { %v3682_v39 = vadd.f32 %v4429_v13, %v3681_v18  ;;  %v5122_v33 = vpop.f32.mrb[49].mxu0 }
0x1232   : > { %v6972_v29 = vadd.f32 %v5797_v62, %v3682_v39 }
0x1233   : > { %v3686_v41 = vpop.f32.mrb[50].mxu0 }
0x1234   : > { %v3687_v37 = vadd.f32 %v4429_v13, %v3686_v41  ;;  %v5125_v40 = vpop.f32.mrb[51].mxu0  ;;  %v3714_v42 = vsel %vm576_vm0, %v6972_v29, 0.0 }
0x1235   : > { %3715 = vadd.xlane.f32.xlu1 %v3714_v42 }
0x1236   : > { %v6977_v44 = vadd.f32 %v5793_v1, %v3687_v37 }
0x1237   : > { %v3691_v48 = vpop.f32.mrb[52].mxu0 }
0x1238   : > { %v3692_v52 = vadd.f32 %v4429_v13, %v3691_v48  ;;  %v5128_v49 = vpop.f32.mrb[53].mxu0  ;;  %v3717_v53 = vsel %vm576_vm0, %v6977_v44, 0.0  ;;  %v4435_v48 = vld [vmem:[%s3710_s3] ss:$0 sm:$0xff] }
0x1239   : > { %3718 = vadd.xlane.f32.xlu0 %v3717_v53 }
0x123a   : > { %v6982_v62 = vadd.f32 %v5789_v4, %v3692_v52 }
0x123b   : > { %v3696_v31 = vpop.f32.mrb[54].mxu0 }
0x123c   : > { %v3697_v60 = vadd.f32 %v4429_v13, %v3696_v31  ;;  %v5131_v43 = vpop.f32.mrb[55].mxu0  ;;  %v3720_v50 = vsel %vm576_vm0, %v6982_v62, 0.0  ;;  %v4436_v31 = vld [vmem:[%s3712_s19] ss:$0 sm:$0xff] }
0x123d   : > { %3721 = vadd.xlane.f32.xlu1 %v3720_v50 }
0x123e   : > { %v6987_v1 = vadd.f32 %v5785_v7, %v3697_v60 }
0x123f   : > { %v3701_v61 = vpop.f32.mrb[56].mxu0 }
0x1240   : > { %v3702_v38 = vadd.f32 %v4429_v13, %v3701_v61  ;;  %v5134_v55 = vpop.f32.mrb[57].mxu0  ;;  %v3723_v6 = vsel %vm576_vm0, %v6987_v1, 0.0 }
0x1241   : > { %3724 = vadd.xlane.f32.xlu0 %v3723_v6 }
0x1242   : > { %v6992_v4 = vadd.f32 %v5781_v10, %v3702_v38 }
0x1244   : > { %v3726_v57 = vsel %vm1383_vm9, %v6992_v4, 0.0 }
0x1245   : > { %3727 = vadd.xlane.f32.xlu1 %v3726_v57 }
0x12c2   : > { %v3716_v8 = vpop.xlane.xlu1 %3715 }
0x12c3   : > { %v3729_v58 = vmul.f32 0.03125, %v3716_v8 }
0x12c5   : > { %v3734_v14 = vsub.f32 %v6972_v29, %v3729_v58 }
0x12c6   : > { %v3719_v7 = vpop.xlane.xlu0 %3718 }
0x12c7   : > { %v3730_v45 = vmul.f32 0.03125, %v3719_v7  ;;  %v3739_v15 = vmul.f32 %v3734_v14, %v3734_v14 }
0x12c9   : > { %v6998_v21 = vsub.f32 %v6977_v44, %v3730_v45  ;;  %v3744_v22 = vsel %vm576_vm0, %v3739_v15, 0.0 }
0x12ca   : > { %v3722_v34 = vpop.xlane.xlu1 %3721  ;;  %3745 = vadd.xlane.f32.xlu0 %v3744_v22 }
0x12cb   : > { %v3731_v10 = vmul.f32 0.03125, %v3722_v34  ;;  %v3740_v35 = vmul.f32 %v6998_v21, %v6998_v21 }
0x12cd   : > { %v7004_v54 = vsub.f32 %v6982_v62, %v3731_v10  ;;  %v3747_v63 = vsel %vm576_vm0, %v3740_v35, 0.0 }
0x12ce   : > { %v3725_v0 = vpop.xlane.xlu0 %3724  ;;  %3748 = vadd.xlane.f32.xlu1 %v3747_v63  ;;  %v3967_v63 = vld [vmem:[%s3965_s4 + $0x8] sm:$0xff] }
0x12cf   : > { %v3732_v3 = vmul.f32 0.03125, %v3725_v0  ;;  %v3741_v5 = vmul.f32 %v7004_v54, %v7004_v54 }
0x12d1   : > { %v7010_v9 = vsub.f32 %v6987_v1, %v3732_v3  ;;  %v3750_v11 = vsel %vm576_vm0, %v3741_v5, 0.0  ;;  %v3968_v3 = vld [vmem:[%s3965_s4 + $0x10] sm:$0xff]  ;;  %v3969_v5 = vld [vmem:[%s3965_s4 + $0x18] sm:$0xff] }
0x12d2   : > { %3751 = vadd.xlane.f32.xlu0 %v3750_v11  ;;  %v3728_v2 = vpop.xlane.xlu1 %3727  ;;  %v3970_v11 = vld [vmem:[%s3965_s4 + $0x20] sm:$0xff] }
0x12d3   : > { %v3733_v17 = vmul.f32 0.03125, %v3728_v2  ;;  %v3742_v16 = vmul.f32 %v7010_v9, %v7010_v9  ;;  %v3971_v2 = vld [vmem:[%s3965_s4 + $0x28] sm:$0xff] }
0x12d5   : > { %v7016_v12 = vsub.f32 %v6992_v4, %v3733_v17  ;;  %v3753_v24 = vsel %vm576_vm0, %v3742_v16, 0.0  ;;  %v5482_v17 = vpack.c.bf16 %v3971_v2, %v3970_v11  ;;  %v3972_v16 = vld [vmem:[%s3965_s4 + $0x30] sm:$0xff] }
0x12d6   : > { %3754 = vadd.xlane.f32.xlu1 %v3753_v24 }
0x12d7   : > { %v3743_v19 = vmul.f32 %v7016_v12, %v7016_v12 }
0x12d9   : > { %v3756_v36 = vsel %vm1383_vm9, %v3743_v19, 0.0  ;;  %v4437_v19 = vld [vmem:[%s3806_s28] ss:$0 sm:$0xff] }
0x12da   : > { %3757 = vadd.xlane.f32.xlu0 %v3756_v36 }
0x1357   : > { %v3746_v51 = vpop.xlane.xlu0 %3745 }
0x1358   : > { %v3759_v59 = vmul.f32 0.03125, %v3746_v51 }
0x135a   : > { %v3764_v56 = vadd.f32 1e-06, %v3759_v59 }
0x135b   : > { %v3749_v26 = vpop.xlane.xlu1 %3748 }
0x135c   : > { %5711 = vrsqrt.f32 %v3764_v56  ;;  %v3760_v27 = vmul.f32 0.03125, %v3749_v26 }
0x135e   : > { %v3765_v13 = vadd.f32 1e-06, %v3760_v27 }
0x135f   : > { %v3752_v18 = vpop.xlane.xlu0 %3751 }
0x1360   : > { %5713 = vrsqrt.f32 %v3765_v13  ;;  %v3761_v39 = vmul.f32 0.03125, %v3752_v18 }
0x1362   : > { %v3766_v33 = vadd.f32 1e-06, %v3761_v39 }
0x1363   : > { %v3755_v41 = vpop.xlane.xlu1 %3754 }
0x1364   : > { %5715 = vrsqrt.f32 %v3766_v33  ;;  %v3762_v37 = vmul.f32 0.03125, %v3755_v41 }
0x1366   : > { %v5712_v40 = vpop.eup %5711  ;;  %v3767_v42 = vadd.f32 1e-06, %v3762_v37 }
0x1367   : > { %v3774_v52 = vmul.f32 %v5712_v40, %v3734_v14  ;;  %v3758_v49 = vpop.xlane.xlu0 %3757 }
0x1368   : > { %5717 = vrsqrt.f32 %v3767_v42  ;;  %v3763_v53 = vmul.f32 0.03125, %v3758_v49 }
0x1369   : > { %v3785_v60 = vmul.f32 %v4435_v48, %v3774_v52 }
0x136a   : > { %v5714_v43 = vpop.eup %5713  ;;  %v3768_v50 = vadd.f32 1e-06, %v3763_v53 }
0x136b   : > { %v3796_v61 = vadd.f32 %v4436_v31, %v3785_v60  ;;  %v3775_v38 = vmul.f32 %v5714_v43, %v6998_v21 }
0x136c   : > { %5719 = vrsqrt.f32 %v3768_v50 }
0x136d   : > { %5144 = vmatmul.mubr.msk.f32.vlgmr.msra.gmra.mrb[58].mxu0 %vm576_vm0, %v3796_v61  ;;  %v3786_v55 = vmul.f32 %v4435_v48, %v3775_v38 }
0x136e   : > { %v5716_v6 = vpop.eup %5715  ;;  %5146 = vmatprep.mubr.msk.f32.mxu0 %vm5854_vm12, %v5855_v47 }
0x136f   : > { %v3797_v57 = vadd.f32 %v4436_v31, %v3786_v55  ;;  %v3776_v8 = vmul.f32 %v5716_v6, %v7004_v54  ;;  %v3966_v54 = vld [vmem:[%s3965_s4] sm:$0xff] }
0x1370   : > { %v5476_v0 = vpack.c.bf16 %v3967_v63, %v3966_v54 }
0x1371   : > { %5147 = vmatmul.mubr.msk.f32.gmra.mrb[60].mxu0 %vm576_vm0, %v3797_v57  ;;  %v3787_v58 = vmul.f32 %v4435_v48, %v3776_v8 }
0x1372   : > { %v5718_v14 = vpop.eup %5717  ;;  %5149 = vmatprep.mubr.msk.f32.mxu0 %vm5854_vm12, %v5855_v47  ;;  %5495 = vmatpush3.bf16.msra.mxu1 %v5476_v0 }
0x1373   : > { %v3798_v7 = vadd.f32 %v4436_v31, %v3787_v58  ;;  %v3777_v45 = vmul.f32 %v5718_v14, %v7010_v9  ;;  %5477 = vmatpush3.bf16.msra.mxu0 %v5476_v0  ;;  %5492 = vmatprep.subr.bf16.mxu1 %v5853_v46  ;;  %v5479_v9 = vpack.c.bf16 %v3969_v5, %v3968_v3 }
0x1374   : > { %5478 = vmatprep.subr.bf16.mxu0 %v5853_v46 }
0x1375   : > { %5150 = vmatmul.mubr.msk.f32.gmra.mrb[62].mxu0 %vm576_vm0, %v3798_v7  ;;  %v3788_v15 = vmul.f32 %v4435_v48, %v3777_v45 }
0x1376   : > { %v5720_v21 = vpop.eup %5719  ;;  %5152 = vmatprep.mubr.msk.f32.mxu0 %vm5854_vm12, %v5855_v47  ;;  %5496 = vmatpush3.bf16.msra.mxu1 %v5479_v9 }
0x1377   : > { %v3799_v22 = vadd.f32 %v4436_v31, %v3788_v15  ;;  %v3778_v34 = vmul.f32 %v5720_v21, %v7016_v12  ;;  %5480 = vmatpush3.bf16.msra.mxu0 %v5479_v9  ;;  %5493 = vmatprep.subr.bf16.mxu1 %v5853_v46  ;;  %v3973_v12 = vld [vmem:[%s3965_s4 + $0x38] sm:$0xff] }
0x1378   : > { %5481 = vmatprep.subr.bf16.mxu0 %v5853_v46  ;;  %v5485_v24 = vpack.c.bf16 %v3973_v12, %v3972_v16 }
0x1379   : > { %5153 = vmatmul.mubr.msk.f32.gmra.mrb[64].mxu0 %vm576_vm0, %v3799_v22  ;;  %v3789_v10 = vmul.f32 %v4435_v48, %v3778_v34 }
0x137a   : > { %5155 = vmatprep.mubr.msk.f32.mxu0 %vm5854_vm12, %v5855_v47  ;;  %5497 = vmatpush3.bf16.msra.mxu1 %v5482_v17 }
0x137b   : > { %v3800_v35 = vadd.f32 %v4436_v31, %v3789_v10  ;;  %5483 = vmatpush3.bf16.msra.mxu0 %v5482_v17  ;;  %5494 = vmatprep.subr.bf16.mxu1 %v5853_v46 }
0x137c   : > { %5484 = vmatprep.subr.bf16.mxu0 %v5853_v46 }
0x137d   : > { %5156 = vmatmul.mubr.msk.f32.gmra.mrb[66].mxu0 %vm576_vm0, %v3800_v35 }
0x137e   : > { %5174 = vmatprep.mubr.msk.f32.mxu0 %vm5854_vm12, %v5855_v47  ;;  %5498 = vmatpush3.bf16.msra.mxu1 %v5485_v24 }
0x137f   : > { %5486 = vmatpush3.bf16.msra.mxu0 %v5485_v24 }
0x1440   : > { %v3895_v36 = vpop.f32.mrb[58].mxu0 }
0x1441   : > { %v3896_v28 = vadd.f32 %v4437_v19, %v3895_v36  ;;  %v5145_v20 = vpop.f32.mrb[59].mxu0 }
0x1442   : > { %v4444_v20 = vld [vmem:[%s3974_s2] ss:$0 sm:$0xff] }
0x1443   : > { %v3919_v25 = vmul.f32 %v3896_v28, %v3896_v28 }
0x1444   : > { %v3900_v30 = vpop.f32.mrb[60].mxu0 }
0x1445   : > { %v3924_v23 = vmul.f32 %v3919_v25, %v3896_v28  ;;  %v3901_v32 = vadd.f32 %v4437_v19, %v3900_v30  ;;  %v5148_v51 = vpop.f32.mrb[61].mxu0 }
0x1447   : > { %v3929_v59 = vmul.f32 0.044715, %v3924_v23  ;;  %v3920_v56 = vmul.f32 %v3901_v32, %v3901_v32 }
0x1448   : > { %v3905_v26 = vpop.f32.mrb[62].mxu0 }
0x1449   : > { %v3934_v27 = vadd.f32 %v3929_v59, %v3896_v28  ;;  %v3925_v13 = vmul.f32 %v3920_v56, %v3901_v32  ;;  %v3906_v18 = vadd.f32 %v4437_v19, %v3905_v26  ;;  %v5151_v46 = vpop.f32.mrb[63].mxu0 }
0x144b   : > { %v3939_v39 = vmul.f32 0.7978846, %v3934_v27  ;;  %v3930_v33 = vmul.f32 0.044715, %v3925_v13  ;;  %v3921_v41 = vmul.f32 %v3906_v18, %v3906_v18 }
0x144c   : > { %v3910_v37 = vpop.f32.mrb[64].mxu0 }
0x144d   : > { %5721 = vtanh.f32 %v3939_v39  ;;  %v3935_v40 = vadd.f32 %v3930_v33, %v3901_v32  ;;  %v3926_v42 = vmul.f32 %v3921_v41, %v3906_v18  ;;  %v3911_v48 = vadd.f32 %v4437_v19, %v3910_v37  ;;  %v5154_v52 = vpop.f32.mrb[65].mxu0 }
0x144f   : > { %v3940_v49 = vmul.f32 0.7978846, %v3935_v40  ;;  %v3931_v53 = vmul.f32 0.044715, %v3926_v42  ;;  %v3922_v31 = vmul.f32 %v3911_v48, %v3911_v48 }
0x1450   : > { %v3915_v60 = vpop.f32.mrb[66].mxu0 }
0x1451   : > { %5723 = vtanh.f32 %v3940_v49  ;;  %v3936_v43 = vadd.f32 %v3931_v53, %v3906_v18  ;;  %v3927_v50 = vmul.f32 %v3922_v31, %v3911_v48  ;;  %v3916_v61 = vadd.f32 %v4437_v19, %v3915_v60  ;;  %v5157_v38 = vpop.f32.mrb[67].mxu0 }
0x1453   : > { %v3941_v55 = vmul.f32 0.7978846, %v3936_v43  ;;  %v3932_v6 = vmul.f32 0.044715, %v3927_v50  ;;  %v3923_v57 = vmul.f32 %v3916_v61, %v3916_v61 }
0x1455   : > { %5725 = vtanh.f32 %v3941_v55  ;;  %v3937_v8 = vadd.f32 %v3932_v6, %v3911_v48  ;;  %v3928_v58 = vmul.f32 %v3923_v57, %v3916_v61 }
0x1457   : > { %v5722_v14 = vpop.eup %5721  ;;  %v3942_v7 = vmul.f32 0.7978846, %v3937_v8  ;;  %v3933_v45 = vmul.f32 0.044715, %v3928_v58 }
0x1458   : > { %v3949_v15 = vadd.f32 1.0, %v5722_v14 }
0x1459   : > { %5727 = vtanh.f32 %v3942_v7  ;;  %v3938_v21 = vadd.f32 %v3933_v45, %v3916_v61 }
0x145a   : > { %v3954_v22 = vmul.f32 0.5, %v3949_v15 }
0x145b   : > { %v5724_v34 = vpop.eup %5723  ;;  %v3943_v10 = vmul.f32 0.7978846, %v3938_v21 }
0x145c   : > { %v3959_v35 = vmul.f32 %v3954_v22, %v3896_v28  ;;  %v3950_v54 = vadd.f32 1.0, %v5724_v34 }
0x145d   : > { %5729 = vtanh.f32 %v3943_v10 }
0x145e   : > { %v3955_v63 = vmul.f32 0.5, %v3950_v54  ;;  %5175 = vmatmul.mubr.msk.f32.vlgmr.msra.gmra.mrb[68].mxu0 %vm3982_vm2, %v3959_v35 }
0x145f   : > { %v5726_v0 = vpop.eup %5725 }
0x1460   : > { %v3960_v3 = vmul.f32 %v3955_v63, %v3901_v32  ;;  %v3951_v5 = vadd.f32 1.0, %v5726_v0 }
0x1462   : > { %5178 = vmatmul.mubr.msk.f32.vlgmr.msra.gmra.mrb[38].mxu1 %vm3982_vm2, %v3960_v3  ;;  %v3956_v9 = vmul.f32 0.5, %v3951_v5 }
0x1463   : > { %v5728_v11 = vpop.eup %5727  ;;  %5180 = vmatprep.mubr.msk.f32.mxu1 %vm5854_vm12, %v5855_v47 }
0x1464   : > { %v3961_v2 = vmul.f32 %v3956_v9, %v3906_v18  ;;  %v3952_v17 = vadd.f32 1.0, %v5728_v11 }
0x1466   : > { %5181 = vmatmul.mubr.msk.f32.gmra.mrb[40].mxu1 %vm3982_vm2, %v3961_v2  ;;  %v3957_v16 = vmul.f32 0.5, %v3952_v17 }
0x1467   : > { %v5730_v12 = vpop.eup %5729  ;;  %5183 = vmatprep.mubr.msk.f32.mxu1 %vm5854_vm12, %v5855_v47 }
0x1468   : > { %v3962_v24 = vmul.f32 %v3957_v16, %v3911_v48  ;;  %v3953_v19 = vadd.f32 1.0, %v5730_v12 }
0x146a   : > { %5184 = vmatmul.mubr.msk.f32.gmra.mrb[42].mxu1 %vm3982_vm2, %v3962_v24  ;;  %v3958_v36 = vmul.f32 0.5, %v3953_v19 }
0x146b   : > { %5186 = vmatprep.mubr.msk.f32.mxu1 %vm5854_vm12, %v5855_v47 }
0x146c   : > { %v3963_v28 = vmul.f32 %v3958_v36, %v3916_v61 }
0x146e   : > { %5187 = vmatmul.mubr.msk.f32.gmra.mrb[44].mxu1 %vm3982_vm2, %v3963_v28 }
0x1531   : > { %v4064_v25 = vpop.f32.mrb[68].mxu0 }
0x1532   : > { %v4065_v30 = vadd.f32 %v4444_v20, %v4064_v25  ;;  %v5176_v23 = vpop.f32.mrb[69].mxu0 }
0x1534   : > { %v7073_v32 = vadd.f32 %v4065_v30, %v6972_v29  }
0x1535   : > { %v4069_v51 = vpop.f32.mrb[38].mxu1 }
0x1536   : > { %v4070_v59 = vadd.f32 %v4444_v20, %v4069_v51  ;;  %v5179_v56 = vpop.f32.mrb[39].mxu1  ;;  %4097 = vst.msk [vmem:[%s6078_s8] sm:$0xff] (!%p4450_p8), %vm576_vm0, %v7073_v32 }
0x1538   : > { %v7076_v26 = vadd.f32 %v4070_v59, %v6977_v44  }
0x1539   : > { %v4074_v27 = vpop.f32.mrb[40].mxu1 }
0x153a   : > { %v4075_v13 = vadd.f32 %v4444_v20, %v4074_v27  ;;  %v5182_v47 = vpop.f32.mrb[41].mxu1  ;;  %4098 = vst.msk [vmem:[%s6078_s8 + $0x8] sm:$0xff] (!%p4450_p8), %vm576_vm0, %v7076_v26 }
0x153c   : > { %v7079_v18 = vadd.f32 %v4075_v13, %v6982_v62  }
0x153d   : > { %v4079_v46 = vpop.f32.mrb[42].mxu1 }
0x153e   : > { %v4080_v39 = vadd.f32 %v4444_v20, %v4079_v46  ;;  %v5185_v33 = vpop.f32.mrb[43].mxu1  ;;  %4099 = vst.msk [vmem:[%s6078_s8 + $0x10] sm:$0xff] (!%p4450_p8), %vm576_vm0, %v7079_v18 }
0x1540   : > { %v7082_v7 = vadd.f32 %v4080_v39, %v6987_v1   ;;  %4096 = sbr.rel (%p4450_p8) target bundleno = 5448 (0x1548), region = 184 }
0x1541   : > { %v4084_v29 = vpop.f32.mrb[44].mxu1 }
0x1542   : > { %v7220_v41 = vmov %v7082_v7  ;;  %v4085_v37 = vadd.f32 %v4444_v20, %v4084_v29  ;;  %v5188_v40 = vpop.f32.mrb[45].mxu1 }
0x1543   : > { %4100 = vst.msk [vmem:[%s6078_s8 + $0x18] sm:$0xff] (!%p4450_p8), %vm576_vm0, %v7220_v41 }
0x1544   : > { %v7085_v10 = vadd.f32 %v4085_v37, %v6992_v4  }
0x1546   : > { %v7221_v42 = vmov %v7085_v10 }
0x1547   : > { %4101 = vst.msk [vmem:[%s6078_s8 + $0x20] sm:$0xf] %vm1383_vm9, %v7221_v42 }
0x1548 PF: > { %p4451_p9 = scmp.ne.s32.totalorder %s5801_s20, 6 }
0x1549   : > { %s5858_s7 = smov (!%p4451_p9), 32   ;;  %vm4126_vm3 = vcmask (!%p4451_p9), 523520   ;;  %vm4131_vm4 = vcmask (!%p4451_p9), 519424  }
0x154a   : > { %4105 = sbr.rel (%p4451_p9) target bundleno = 5574 (0x15c6), region = 188  ;;  %4111 = vrot.lane.b32.xlu0 (!%p4451_p9), %v7073_v32, %s5858_s7  ;;  %4115 = vrot.lane.b32.xlu1 (!%p4451_p9), %v7079_v18, %s5858_s7 }
0x154e   : > { %4113 = vrot.lane.b32.xlu0 (!%p4451_p9), %v7076_v26, %s5858_s7  ;;  %4117 = vrot.lane.b32.xlu1 (!%p4451_p9), %v7220_v41, %s5858_s7 }
0x1552   : > { %4119 = vrot.lane.b32.xlu0 %v7221_v42, %s5858_s7 }
0x15bc   : > { %v4112_v44 = vpop.permute.xlu0 %4111  ;;  %v4116_v62 = vpop.permute.xlu1 %4115 }
0x15bd   : > { %4127 = vst.msk [vmem:[%s6078_s8] sm:$0xff] %vm4126_vm3, %v4112_v44  ;;  %4129 = vst.msk [vmem:[%s6078_s8 + $0x10] sm:$0xff] %vm4126_vm3, %v4116_v62 }
0x15c0   : > { %v4114_v1 = vpop.permute.xlu0 %4113  ;;  %v4118_v4 = vpop.permute.xlu1 %4117 }
0x15c1   : > { %4128 = vst.msk [vmem:[%s6078_s8 + $0x8] sm:$0xff] %vm4126_vm3, %v4114_v1  ;;  %4130 = vst.msk [vmem:[%s6078_s8 + $0x18] sm:$0xff] %vm4126_vm3, %v4118_v4 }
0x15c4   : > { %v4120_v48 = vpop.permute.xlu0 %4119 }
0x15c5   : > { %4132 = vst.msk [vmem:[%s6078_s8 + $0x20] sm:$0xf] %vm4131_vm4, %v4120_v48 }
0x15c6 PF: > { %p4452_p10 = scmp.ne.s32.totalorder %s5801_s20, 9 }
0x15c7   : > { %s5859_s10 = smov (!%p4452_p10), 64   ;;  %vm4157_vm5 = vcmask (!%p4452_p10), 785920   ;;  %vm4162_vm6 = vcmask (!%p4452_p10), 781824  }
0x15c8   : > { %4136 = sbr.rel (%p4452_p10) target bundleno = 5700 (0x1644), region = 192  ;;  %4142 = vrot.lane.b32.xlu0 (!%p4452_p10), %v7073_v32, %s5859_s10  ;;  %4146 = vrot.lane.b32.xlu1 (!%p4452_p10), %v7079_v18, %s5859_s10 }
0x15cc   : > { %4144 = vrot.lane.b32.xlu0 (!%p4452_p10), %v7076_v26, %s5859_s10  ;;  %4148 = vrot.lane.b32.xlu1 (!%p4452_p10), %v7220_v41, %s5859_s10 }
0x15d0   : > { %4150 = vrot.lane.b32.xlu0 %v7221_v42, %s5859_s10 }
0x163a   : > { %v4143_v52 = vpop.permute.xlu0 %4142  ;;  %v4147_v49 = vpop.permute.xlu1 %4146 }
0x163b   : > { %4158 = vst.msk [vmem:[%s6078_s8] sm:$0xff] %vm4157_vm5, %v4143_v52  ;;  %4160 = vst.msk [vmem:[%s6078_s8 + $0x10] sm:$0xff] %vm4157_vm5, %v4147_v49 }
0x163e   : > { %v4145_v53 = vpop.permute.xlu0 %4144  ;;  %v4149_v31 = vpop.permute.xlu1 %4148 }
0x163f   : > { %4159 = vst.msk [vmem:[%s6078_s8 + $0x8] sm:$0xff] %vm4157_vm5, %v4145_v53  ;;  %4161 = vst.msk [vmem:[%s6078_s8 + $0x18] sm:$0xff] %vm4157_vm5, %v4149_v31 }
0x1642   : > { %v4151_v60 = vpop.permute.xlu0 %4150 }
0x1643   : > { %4163 = vst.msk [vmem:[%s6078_s8 + $0x20] sm:$0xf] %vm4162_vm6, %v4151_v60 }
0x1644 PF: > { %s2291_s20 = sadd.s32 1, %s5801_s20   ;;  %v7222_v10 = vmov %v7221_v42  ;;  %v7223_v7 = vmov %v7220_v41  ;;  %v7224_v4 = vmov %v7079_v18  ;;  %v7225_v1 = vmov %v7076_v26 }
0x1645   : > { %p2288_p11 = scmp.ge.s32.totalorder %s2291_s20, 12   ;;  %v7226_v62 = vmov %v7073_v32 }
0x1646   :  { %4169 = vrot.lane.b32.xlu0 (%p2288_p11), %v7073_v32, %s5851_s24  ;;  %4173 = vrot.lane.b32.xlu1 (%p2288_p11), %v7079_v18, %s5851_s24  ;;  %vm4184_vm0 = vcmask (%p2288_p11), 1048320   ;;  %vm4189_vm1 = vcmask (%p2288_p11), 1044224  }
0x1647   :  { %2290 = sbr.rel (!%p2288_p11) target bundleno = 2459 (0x99b), region = 265 }
0x164a   :  { %4171 = vrot.lane.b32.xlu0 (%p2288_p11), %v7076_v26, %s5851_s24  ;;  %4175 = vrot.lane.b32.xlu1 (%p2288_p11), %v7220_v41, %s5851_s24 }
0x164e   :  { %4177 = vrot.lane.b32.xlu0 %v7221_v42, %s5851_s24 }
0x16b8   :  { %v4170_v43 = vpop.permute.xlu0 %4169  ;;  %v4174_v50 = vpop.permute.xlu1 %4173 }
0x16b9   :  { %4185 = vst.msk [vmem:[%s6078_s8] sm:$0xff] %vm4184_vm0, %v4170_v43  ;;  %4187 = vst.msk [vmem:[%s6078_s8 + $0x10] sm:$0xff] %vm4184_vm0, %v4174_v50 }
0x16bc   :  { %v4172_v61 = vpop.permute.xlu0 %4171  ;;  %v4176_v38 = vpop.permute.xlu1 %4175 }
0x16bd   :  { %4186 = vst.msk [vmem:[%s6078_s8 + $0x8] sm:$0xff] %vm4184_vm0, %v4172_v61  ;;  %4188 = vst.msk [vmem:[%s6078_s8 + $0x18] sm:$0xff] %vm4184_vm0, %v4176_v38 }
0x16c0   :  { %v4178_v55 = vpop.permute.xlu0 %4177 }
0x16c1   :  { %4190 = vst.msk [vmem:[%s6078_s8 + $0x20] sm:$0xf] %vm4189_vm1, %v4178_v55 }
0x16c2   :  { %4195 = vsyncpa [#allocation3], 1 }

</bundles_post_ra>
